<compile_context>
chip_gen: v7x
topology: tpu7x:2x2x1
jax: 0.10.0
libtpu: 0.0.40
codegen_flags: <defaults>
</compile_context>

<pallas_src>
import jax
import jax.numpy as jnp
from jax import lax
from jax.experimental import pallas as pl
from jax.experimental.pallas import tpu as pltpu

KERNEL_SIZE = (8, 5, 3)
CHANNELS = (1, 128, 256, 128)
LSTM_HS = 256
NUM_VARIABLES = 1
BN_EPS = 1e-3


def _round_up(v, m):
    return (v + m - 1) // m * m


def _fcn_lengths(T, kernels):
    """Valid conv output lengths and sublane-padded buffer lengths.

    Each padded length leaves headroom so the next layer's shifted window
    (shift k < K) never reads past the previous buffer."""
    k1, k2, k3 = kernels
    l1 = T - k1 + 1
    l2 = l1 - k2 + 1
    l3 = l2 - k3 + 1
    r3 = _round_up(l3, 8)
    r2 = _round_up(max(l2, r3 + k3 - 1), 8)
    r1 = _round_up(max(l1, r2 + k2 - 1), 8)
    return (l1, l2, l3), (r1, r2, r3)


def lstm_fcn_kernel(x_ref, xp1_ref, wih_ref, bg_ref,
                    w1_ref, s1_ref, t1_ref,
                    w2_ref, s2_ref, t2_ref,
                    w3_ref, s3_ref, t3_ref,
                    wdl_ref, wdf_ref, bd_ref,
                    out_ref):
    f32 = jnp.float32
    bf16 = jnp.bfloat16
    TB, T = x_ref.shape
    H = wih_ref.shape[1] // 3
    K1, C1 = w1_ref.shape
    C2 = w2_ref.shape[1]
    K2 = w2_ref.shape[0] // C1
    C3 = w3_ref.shape[1]
    K3 = w3_ref.shape[0] // C2
    (L1, L2, L3), (R1, R2, R3) = _fcn_lengths(T, (K1, K2, K3))
    assert xp1_ref.shape == (TB * R1, K1)

    # ---- LSTM path: one step from h0 = c0 = 0 (dropout is identity in eval).
    # Forget gate is dead (c0 == 0); only the i/g/o gate columns were kept.
    # TODO(synk): for very large T this matmul should be tiled over T with a
    # reduction grid axis; at these sizes the bf16 wih block fits VMEM easily.
    gates = jnp.dot(x_ref[...], wih_ref[...],
                    preferred_element_type=f32) + bg_ref[...]          # (TB, 3H)
    i_g = jax.nn.sigmoid(gates[:, 0:H])
    g_g = jnp.tanh(gates[:, H:2 * H])
    o_g = jax.nn.sigmoid(gates[:, 2 * H:3 * H])
    h = (o_g * jnp.tanh(i_g * g_g)).astype(bf16)                       # (TB, H)

    # ---- FCN path, fully batched.  Padded tail rows carry finite garbage that
    # is never read by valid rows and is masked out at the pooling step.

    # conv1 (+ folded BN + ReLU); patches were im2col'd host-side to (TB*R1, K1) bf16.
    y1 = jnp.dot(xp1_ref[...], w1_ref[...], preferred_element_type=f32)
    y1 = jnp.maximum(y1 * s1_ref[...] + t1_ref[...], 0.0)              # (TB*R1, C1)
    y1 = y1.astype(bf16).reshape(TB, R1, C1)                           # bf16 early

    def conv_bn_relu(y_prev_b, w_ref, k_sz, c_in, r_out, scale, shift):
        # Split-K accumulation over the kernel taps: no materialized im2col
        # patch tensor, each sub-matmul keeps a full-depth contraction (c_in).
        acc = jnp.dot(y_prev_b[:, 0:r_out, :].reshape(TB * r_out, c_in),
                      w_ref[0:c_in, :], preferred_element_type=f32)
        for k in range(1, k_sz):
            acc = acc + jnp.dot(
                y_prev_b[:, k:k + r_out, :].reshape(TB * r_out, c_in),
                w_ref[k * c_in:(k + 1) * c_in, :],
                preferred_element_type=f32)
        return jnp.maximum(acc * scale + shift, 0.0)

    # conv2
    y2 = conv_bn_relu(y1, w2_ref, K2, C1, R2, s2_ref[...], t2_ref[...])
    y2 = y2.astype(bf16).reshape(TB, R2, C2)

    # conv3
    y3 = conv_bn_relu(y2, w3_ref, K3, C2, R3, s3_ref[...], t3_ref[...])
    y3 = y3.reshape(TB, R3, C3)                                        # f32

    # global average pool over the true (unpadded) length L3: 1/L3 folded into
    # the validity mask, single sum over the time axis.
    row = lax.broadcasted_iota(jnp.int32, (R3, 1), 0)
    inv = jnp.where(row < L3, jnp.float32(1.0 / L3), jnp.float32(0.0)) # (R3, 1)
    pooled = jnp.sum(y3 * inv[None, :, :], axis=1).astype(bf16)        # (TB, C3)

    # ---- dense over concat([lstm, fcn], dim=1) (concat folded into two matmuls).
    logits = (jnp.dot(h, wdl_ref[...], preferred_element_type=f32)
              + jnp.dot(pooled, wdf_ref[...], preferred_element_type=f32)
              + bd_ref[...])                                           # (TB, nv)

    # ---- LogSoftmax over dim=1.
    m = jnp.max(logits, axis=1, keepdims=True)
    lse = m + jnp.log(jnp.sum(jnp.exp(logits - m), axis=1, keepdims=True))
    out_ref[...] = logits - lse


def _vmem_limit_bytes():
    """Generation-aware scoped-VMEM request (~80% of physical per-core VMEM)."""
    try:
        cap = int(pltpu.get_tpu_info().vmem_capacity_bytes)
    except Exception:
        cap = 64 * 1024 * 1024          # conservative (v7x-sized) fallback
    return int(cap * 0.8)


def _choose_tb(T, dims, weight_bytes, vmem_limit):
    """Largest multiple-of-8 batch tile (<=256) that fits the VMEM budget."""
    (R1, R2, R3), (C1, C2, C3), H = dims
    # Conservative per-batch-row footprint (bytes): lane-padded xp1 input block
    # (K1 -> 128 lanes, double-buffered), f32 + bf16 activation copies, transient
    # shifted-window copies for the split-K convs, LSTM gates.  1.5x safety for
    # Mosaic's own retiling scratch.
    per_row = (
        2 * R1 * 128 * 2
        + 2 * T * 2
        + R1 * C1 * (4 + 2)
        + R2 * C2 * (4 + 2)
        + R3 * C3 * 4
        + 2 * max(R2 * C1, R3 * C2) * 2
        + 6 * 4 * H
    )
    per_row = int(per_row * 1.5)
    budget = max(vmem_limit - 2 * weight_bytes - (8 << 20), 1 << 20)
    tb = int(budget // per_row)
    return max(8, min(256, (tb // 8) * 8))


def lstm_fcn_forward(x, params):
    B0, T = x.shape
    w1, w2, w3 = params["w1"], params["w2"], params["w3"]
    K1, C1 = w1.shape
    C2 = w2.shape[1]
    K2 = w2.shape[0] // C1
    C3 = w3.shape[1]
    K3 = w3.shape[0] // C2
    H = params["wih3_t"].shape[1] // 3
    nv = params["wd_lstm"].shape[1]
    (_, _, _), (R1, R2, R3) = _fcn_lengths(T, (K1, K2, K3))

    resident = (params["wih3_t"], params["b_gates3"],
                w1, params["s1"], params["t1"],
                w2, params["s2"], params["t2"],
                w3, params["s3"], params["t3"],
                params["wd_lstm"], params["wd_fcn"], params["bd"])
    weight_bytes = sum(int(a.size) * a.dtype.itemsize for a in resident)

    vmem_limit = _vmem_limit_bytes()
    if B0 < 8:
        TB = B0                                     # single block == full batch dim
    else:
        TB = _choose_tb(T, ((R1, R2, R3), (C1, C2, C3), H), weight_bytes, vmem_limit)
        if B0 >= 16:
            # keep >= 2 grid steps so both v7x TensorCores get work
            TB = min(TB, _round_up(pl.cdiv(B0, 2), 8))
        TB = min(TB, _round_up(B0, 8))
    B = _round_up(B0, TB)
    grid = (B // TB,)

    # Zero-pad the batch to a multiple of TB (padded rows stay finite end-to-end
    # and are sliced off at the end) -> no OOB tail blocks.
    xb = jnp.pad(x, ((0, B - B0), (0, 0))) if B != B0 else x

    # Host-side (XLA) im2col for conv1 only (C_in = 1): (B, T) -> (B*R1, K1) bf16,
    # zero-padded past t = T-1.  Everything else stays in-kernel.
    # TODO(synk): for very large B*T build these patches in-kernel (lane->sublane
    # relayout of x); the 8->128 lane padding of this block is already charged to
    # the TB budget above.
    tpad = max(R1 + K1 - 1 - T, 0)
    xpad = jnp.pad(xb, ((0, 0), (0, tpad)))
    xp1 = jnp.stack([xpad[:, k:k + R1] for k in range(K1)], axis=-1)   # (B, R1, K1)
    xp1 = xp1.reshape(B * R1, K1).astype(jnp.bfloat16)

    xb = xb.astype(jnp.bfloat16)                    # halves the x input DMA
    args = (xb, xp1) + resident

    def _call(single_buffer_weights):
        def _full(a):                               # resident weight, same block each step
            nd = a.ndim
            if single_buffer_weights:
                return pl.BlockSpec(a.shape, lambda i: (0,) * nd,
                                    pipeline_mode=pl.Buffered(buffer_count=1))
            return pl.BlockSpec(a.shape, lambda i: (0,) * nd)

        in_specs = [pl.BlockSpec((TB, T), lambda i: (i, 0)),
                    pl.BlockSpec((TB * R1, K1), lambda i: (i, 0))]
        in_specs += [_full(a) for a in resident]

        return pl.pallas_call(
            lstm_fcn_kernel,
            out_shape=jax.ShapeDtypeStruct((B, nv), jnp.float32),
            grid=grid,
            in_specs=in_specs,
            out_specs=pl.BlockSpec((TB, nv), lambda i: (i, 0)),
            compiler_params=pltpu.CompilerParams(
                dimension_semantics=("parallel",),
                vmem_limit_bytes=vmem_limit),
        )(*args)

    try:
        # Constant-index weight blocks are DMA'd once; single-buffering them
        # halves their VMEM so a larger TB fits.
        out = _call(single_buffer_weights=True)
    except Exception:
        # pipeline_mode=pl.Buffered(1) unsupported on this JAX/libtpu -> fall back
        # to default double-buffered weight blocks (same semantics, more VMEM).
        out = _call(single_buffer_weights=False)

    return out[:B0]


def _conv_bn_params(keys, cin, cout, ksz, eps):
    # torch Conv1d weight layout (Cout, Cin, K); eval-mode BatchNorm1d (with the
    # conv bias) folded into a per-channel scale/shift applied post-matmul.
    w = jax.random.normal(keys[0], (cout, cin, ksz), jnp.float32) * 0.1
    b = jax.random.normal(keys[1], (cout,), jnp.float32) * 0.1
    gamma = 1.0 + 0.1 * jax.random.normal(keys[2], (cout,), jnp.float32)
    beta = 0.1 * jax.random.normal(keys[3], (cout,), jnp.float32)
    r_mean = 0.1 * jax.random.normal(keys[4], (cout,), jnp.float32)
    r_var = jax.random.uniform(keys[5], (cout,), jnp.float32, 0.5, 1.5)
    scale = gamma / jnp.sqrt(r_var + eps)
    shift = (b - r_mean) * scale + beta
    # (Cout, Cin, K) -> (K*Cin, Cout): row index k*Cin + c matches the split-K
    # window order used in the kernel.  bf16 for the MXU, f32 accumulation.
    w_k = jnp.transpose(w, (2, 1, 0)).reshape(ksz * cin, cout).astype(jnp.bfloat16)
    raw = {"w": w, "b": b, "gamma": gamma, "beta": beta, "mean": r_mean, "var": r_var}
    return w_k, scale.reshape(1, cout), shift.reshape(1, cout), raw


def init_params(key, time_steps, num_variables=NUM_VARIABLES, lstm_hs=LSTM_HS,
                channels=CHANNELS, kernels=KERNEL_SIZE, eps=BN_EPS):
    ks = jax.random.split(key, 24)
    T, H = time_steps, lstm_hs
    # LSTM (single layer, input_size = T).  PyTorch gate order is (i, f, g, o);
    # with h0 = c0 = 0 and a single step, weight_hh and the forget gate are dead.
    w_ih = jax.random.normal(ks[0], (4 * H, T), jnp.float32) * 0.1
    b_ih = jax.random.normal(ks[1], (4 * H,), jnp.float32) * 0.1
    b_hh = jax.random.normal(ks[2], (4 * H,), jnp.float32) * 0.1
    keep = jnp.concatenate([jnp.arange(0, H), jnp.arange(2 * H, 3 * H),
                            jnp.arange(3 * H, 4 * H)])
    b_g = b_ih + b_hh
    params = {
        "wih3_t": jnp.transpose(w_ih[keep]).astype(jnp.bfloat16),   # (T, 3H) bf16
        "b_gates3": b_g[keep].reshape(1, 3 * H),                    # (1, 3H) f32
    }
    raw = {"w_ih": w_ih, "b_ih": b_ih, "b_hh": b_hh}
    kidx = 3
    for li, (cin, cout, ksz) in enumerate(zip(channels[:-1], channels[1:], kernels), 1):
        w_k, s, t, rw = _conv_bn_params(ks[kidx:kidx + 6], cin, cout, ksz, eps)
        kidx += 6
        params[f"w{li}"], params[f"s{li}"], params[f"t{li}"] = w_k, s, t
        for nm, v in rw.items():
            raw[f"conv{li}_{nm}"] = v
    # dense: Linear(channels[-1] + lstm_hs -> num_variables); concat is [lstm, fcn].
    wd = jax.random.normal(ks[kidx], (num_variables, channels[-1] + H), jnp.float32) * 0.1
    bd = jax.random.normal(ks[kidx + 1], (num_variables,), jnp.float32) * 0.1
    wd_t = jnp.transpose(wd)                                        # (H + C3, nv)
    params["wd_lstm"] = wd_t[:H, :].astype(jnp.bfloat16)            # (256, nv)
    params["wd_fcn"] = wd_t[H:, :].astype(jnp.bfloat16)             # (128, nv)
    params["bd"] = bd.reshape(1, num_variables)
    raw["wd"] = wd
    raw["bd"] = bd
    return params, raw


def lstm_fcn_reference(x, raw, eps=BN_EPS):
    """Pure-JAX f32 reference matching the PyTorch module's eval-mode forward."""
    H = raw["w_ih"].shape[0] // 4
    gates = x @ raw["w_ih"].T + raw["b_ih"] + raw["b_hh"]
    i = jax.nn.sigmoid(gates[:, 0:H])
    g = jnp.tanh(gates[:, 2 * H:3 * H])
    o = jax.nn.sigmoid(gates[:, 3 * H:4 * H])
    h = o * jnp.tanh(i * g)                        # f * c0 == 0 since c0 == 0

    y = x[:, None, :]                              # (B, 1, T)
    for li in range(1, 4):
        w, b = raw[f"conv{li}_w"], raw[f"conv{li}_b"]
        y = lax.conv_general_dilated(y, w, (1,), "VALID",
                                     dimension_numbers=("NCH", "OIH", "NCH"))
        y = y + b[None, :, None]
        scale = raw[f"conv{li}_gamma"] / jnp.sqrt(raw[f"conv{li}_var"] + eps)
        y = (y - raw[f"conv{li}_mean"][None, :, None]) * scale[None, :, None] \
            + raw[f"conv{li}_beta"][None, :, None]
        y = jnp.maximum(y, 0.0)
    pooled = jnp.mean(y, axis=2)                   # (B, C3)

    logits = jnp.concatenate([h, pooled], axis=1) @ raw["wd"].T + raw["bd"]
    return jax.nn.log_softmax(logits, axis=1)


if __name__ == "__main__":
    key = jax.random.PRNGKey(0)
    k_x, k_p, k_x2, k_p2 = jax.random.split(key, 4)

    # 1) Module defaults: num_variables = 1, tiny batch (time_steps must exceed 13).
    B, T = 2, 32
    x = jax.random.normal(k_x, (B, T), jnp.float32)
    params, raw = init_params(k_p, T)
    out = jax.block_until_ready(lstm_fcn_forward(x, params))
    assert out.shape == (B, NUM_VARIABLES), out.shape
    assert bool(jnp.all(jnp.isfinite(out)))
    # LogSoftmax over a size-1 class dim is identically zero, per the module.
    assert bool(jnp.allclose(out, 0.0, atol=1e-5))

    # 2) Parity vs a pure-JAX f32 reference with num_variables > 1 and a batch
    #    large enough to exercise the multi-step (megacore-parallel) grid and
    #    the batch-padding path.
    B2, T2, NV2 = 50, 32, 6
    x2 = jax.random.normal(k_x2, (B2, T2), jnp.float32)
    params2, raw2 = init_params(k_p2, T2, num_variables=NV2)
    out2 = jax.block_until_ready(lstm_fcn_forward(x2, params2))
    ref2 = lstm_fcn_reference(x2, raw2)
    assert out2.shape == (B2, NV2), out2.shape
    assert bool(jnp.all(jnp.isfinite(out2)))
    # bf16 weights/activations vs f32 reference: ~1e-2 relative drift tolerated.
    assert bool(jnp.allclose(out2, ref2, atol=5e-2, rtol=5e-2)), (
        float(jnp.max(jnp.abs(out2 - ref2))))

    print("KERNEL_OK")
</pallas_src>

<mosaic_0001>
module attributes {stable_mosaic.version = 11 : i64} {
  func.func @lstm_fcn_kernel(%arg0: i32, %arg1: memref<2x32xbf16, #tpu.memory_space<vmem>>, %arg2: memref<80x8xbf16, #tpu.memory_space<vmem>>, %arg3: memref<32x768xbf16, #tpu.memory_space<vmem>>, %arg4: memref<1x768xf32, #tpu.memory_space<vmem>>, %arg5: memref<8x128xbf16, #tpu.memory_space<vmem>>, %arg6: memref<1x128xf32, #tpu.memory_space<vmem>>, %arg7: memref<1x128xf32, #tpu.memory_space<vmem>>, %arg8: memref<640x256xbf16, #tpu.memory_space<vmem>>, %arg9: memref<1x256xf32, #tpu.memory_space<vmem>>, %arg10: memref<1x256xf32, #tpu.memory_space<vmem>>, %arg11: memref<768x128xbf16, #tpu.memory_space<vmem>>, %arg12: memref<1x128xf32, #tpu.memory_space<vmem>>, %arg13: memref<1x128xf32, #tpu.memory_space<vmem>>, %arg14: memref<256x1xbf16, #tpu.memory_space<vmem>>, %arg15: memref<128x1xbf16, #tpu.memory_space<vmem>>, %arg16: memref<1x1xf32, #tpu.memory_space<vmem>>, %arg17: memref<2x1xf32, #tpu.memory_space<vmem>>) attributes {dimension_semantics = [#tpu.dimension_semantics<parallel>], iteration_bounds = array<i64: 1>, scalar_prefetch = 0 : i64, scratch_operands = 0 : i64, tpu.core_type = #tpu.core_type<tc>, window_params = [{transform_indices = @transform_0, window_bounds = array<i64: 2, 32>}, {transform_indices = @transform_1, window_bounds = array<i64: 80, 8>}, {pipeline_mode = #tpu.pipeline_mode<synchronous>, transform_indices = @transform_2, window_bounds = array<i64: 32, 768>}, {pipeline_mode = #tpu.pipeline_mode<synchronous>, transform_indices = @transform_3, window_bounds = array<i64: 1, 768>}, {pipeline_mode = #tpu.pipeline_mode<synchronous>, transform_indices = @transform_4, window_bounds = array<i64: 8, 128>}, {pipeline_mode = #tpu.pipeline_mode<synchronous>, transform_indices = @transform_5, window_bounds = array<i64: 1, 128>}, {pipeline_mode = #tpu.pipeline_mode<synchronous>, transform_indices = @transform_6, window_bounds = array<i64: 1, 128>}, {pipeline_mode = #tpu.pipeline_mode<synchronous>, transform_indices = @transform_7, window_bounds = array<i64: 640, 256>}, {pipeline_mode = #tpu.pipeline_mode<synchronous>, transform_indices = @transform_8, window_bounds = array<i64: 1, 256>}, {pipeline_mode = #tpu.pipeline_mode<synchronous>, transform_indices = @transform_9, window_bounds = array<i64: 1, 256>}, {pipeline_mode = #tpu.pipeline_mode<synchronous>, transform_indices = @transform_10, window_bounds = array<i64: 768, 128>}, {pipeline_mode = #tpu.pipeline_mode<synchronous>, transform_indices = @transform_11, window_bounds = array<i64: 1, 128>}, {pipeline_mode = #tpu.pipeline_mode<synchronous>, transform_indices = @transform_12, window_bounds = array<i64: 1, 128>}, {pipeline_mode = #tpu.pipeline_mode<synchronous>, transform_indices = @transform_13, window_bounds = array<i64: 256, 1>}, {pipeline_mode = #tpu.pipeline_mode<synchronous>, transform_indices = @transform_14, window_bounds = array<i64: 128, 1>}, {pipeline_mode = #tpu.pipeline_mode<synchronous>, transform_indices = @transform_15, window_bounds = array<i64: 1, 1>}, {transform_indices = @transform_16, window_bounds = array<i64: 2, 1>}]} {
    %c0 = arith.constant 0 : index
    %c0_0 = arith.constant 0 : index
    %0 = vector.load %arg1[%c0, %c0_0] : memref<2x32xbf16, #tpu.memory_space<vmem>>, vector<2x32xbf16>
    %c0_1 = arith.constant 0 : index
    %c0_2 = arith.constant 0 : index
    %1 = vector.load %arg3[%c0_1, %c0_2] : memref<32x768xbf16, #tpu.memory_space<vmem>>, vector<32x768xbf16>
    %cst = arith.constant dense<0.000000e+00> : vector<2x768xf32>
    %2 = tpu.matmul %0, %1, %cst {dimension_numbers = #tpu.dot_dimension_numbers<[1], [0], [0], [1], [0, 0, 1, 1], [], []>} : vector<2x32xbf16>, vector<32x768xbf16>, vector<2x768xf32> -> vector<2x768xf32>
    %c0_3 = arith.constant 0 : index
    %c0_4 = arith.constant 0 : index
    %3 = vector.load %arg4[%c0_3, %c0_4] : memref<1x768xf32, #tpu.memory_space<vmem>>, vector<1x768xf32>
    %4 = vector.broadcast %3 : vector<1x768xf32> to vector<2x768xf32>
    %5 = arith.addf %2, %4 : vector<2x768xf32>
    %6 = vector.extract_strided_slice %5 {offsets = [0, 0], sizes = [2, 256], strides = [1, 1]} : vector<2x768xf32> to vector<2x256xf32>
    %7 = arith.negf %6 : vector<2x256xf32>
    %8 = math.exp %7 : vector<2x256xf32>
    %cst_5 = arith.constant 1.000000e+00 : f32
    %9 = vector.broadcast %cst_5 : f32 to vector<2x256xf32>
    %10 = arith.addf %9, %8 : vector<2x256xf32>
    %11 = arith.divf %9, %10 : vector<2x256xf32>
    %12 = vector.extract_strided_slice %5 {offsets = [0, 256], sizes = [2, 256], strides = [1, 1]} : vector<2x768xf32> to vector<2x256xf32>
    %13 = math.tanh %12 : vector<2x256xf32>
    %14 = vector.extract_strided_slice %5 {offsets = [0, 512], sizes = [2, 256], strides = [1, 1]} : vector<2x768xf32> to vector<2x256xf32>
    %15 = arith.negf %14 : vector<2x256xf32>
    %16 = math.exp %15 : vector<2x256xf32>
    %cst_6 = arith.constant 1.000000e+00 : f32
    %17 = vector.broadcast %cst_6 : f32 to vector<2x256xf32>
    %18 = arith.addf %17, %16 : vector<2x256xf32>
    %19 = arith.divf %17, %18 : vector<2x256xf32>
    %20 = arith.mulf %11, %13 : vector<2x256xf32>
    %21 = math.tanh %20 : vector<2x256xf32>
    %22 = arith.mulf %19, %21 : vector<2x256xf32>
    %23 = arith.truncf %22 : vector<2x256xf32> to vector<2x256xbf16>
    %c0_7 = arith.constant 0 : index
    %c0_8 = arith.constant 0 : index
    %24 = vector.load %arg2[%c0_7, %c0_8] : memref<80x8xbf16, #tpu.memory_space<vmem>>, vector<80x8xbf16>
    %c0_9 = arith.constant 0 : index
    %c0_10 = arith.constant 0 : index
    %25 = vector.load %arg5[%c0_9, %c0_10] : memref<8x128xbf16, #tpu.memory_space<vmem>>, vector<8x128xbf16>
    %cst_11 = arith.constant dense<0.000000e+00> : vector<80x128xf32>
    %26 = tpu.matmul %24, %25, %cst_11 {dimension_numbers = #tpu.dot_dimension_numbers<[1], [0], [0], [1], [0, 0, 1, 1], [], []>} : vector<80x8xbf16>, vector<8x128xbf16>, vector<80x128xf32> -> vector<80x128xf32>
    %c0_12 = arith.constant 0 : index
    %c0_13 = arith.constant 0 : index
    %27 = vector.load %arg6[%c0_12, %c0_13] : memref<1x128xf32, #tpu.memory_space<vmem>>, vector<1x128xf32>
    %28 = vector.broadcast %27 : vector<1x128xf32> to vector<80x128xf32>
    %29 = arith.mulf %26, %28 : vector<80x128xf32>
    %c0_14 = arith.constant 0 : index
    %c0_15 = arith.constant 0 : index
    %30 = vector.load %arg7[%c0_14, %c0_15] : memref<1x128xf32, #tpu.memory_space<vmem>>, vector<1x128xf32>
    %31 = vector.broadcast %30 : vector<1x128xf32> to vector<80x128xf32>
    %32 = arith.addf %29, %31 : vector<80x128xf32>
    %cst_16 = arith.constant 0.000000e+00 : f32
    %33 = vector.broadcast %cst_16 : f32 to vector<80x128xf32>
    %34 = arith.maximumf %32, %33 : vector<80x128xf32>
    %35 = arith.truncf %34 : vector<80x128xf32> to vector<80x128xbf16>
    %36 = vector.shape_cast %35 : vector<80x128xbf16> to vector<2x40x128xbf16>
    %c0_17 = arith.constant 0 : index
    %c0_18 = arith.constant 0 : index
    %37 = vector.load %arg9[%c0_17, %c0_18] : memref<1x256xf32, #tpu.memory_space<vmem>>, vector<1x256xf32>
    %c0_19 = arith.constant 0 : index
    %c0_20 = arith.constant 0 : index
    %38 = vector.load %arg10[%c0_19, %c0_20] : memref<1x256xf32, #tpu.memory_space<vmem>>, vector<1x256xf32>
    %39 = vector.extract_strided_slice %36 {offsets = [0, 0, 0], sizes = [2, 32, 128], strides = [1, 1, 1]} : vector<2x40x128xbf16> to vector<2x32x128xbf16>
    %40 = vector.shape_cast %39 : vector<2x32x128xbf16> to vector<64x128xbf16>
    %c0_21 = arith.constant 0 : index
    %c0_22 = arith.constant 0 : index
    %41 = vector.load %arg8[%c0_21, %c0_22] : memref<640x256xbf16, #tpu.memory_space<vmem>>, vector<128x256xbf16>
    %cst_23 = arith.constant dense<0.000000e+00> : vector<64x256xf32>
    %42 = tpu.matmul %40, %41, %cst_23 {dimension_numbers = #tpu.dot_dimension_numbers<[1], [0], [0], [1], [0, 0, 1, 1], [], []>} : vector<64x128xbf16>, vector<128x256xbf16>, vector<64x256xf32> -> vector<64x256xf32>
    %43 = vector.extract_strided_slice %36 {offsets = [0, 1, 0], sizes = [2, 32, 128], strides = [1, 1, 1]} : vector<2x40x128xbf16> to vector<2x32x128xbf16>
    %44 = vector.shape_cast %43 : vector<2x32x128xbf16> to vector<64x128xbf16>
    %c128 = arith.constant 128 : index
    %c0_24 = arith.constant 0 : index
    %45 = vector.load %arg8[%c128, %c0_24] : memref<640x256xbf16, #tpu.memory_space<vmem>>, vector<128x256xbf16>
    %cst_25 = arith.constant dense<0.000000e+00> : vector<64x256xf32>
    %46 = tpu.matmul %44, %45, %cst_25 {dimension_numbers = #tpu.dot_dimension_numbers<[1], [0], [0], [1], [0, 0, 1, 1], [], []>} : vector<64x128xbf16>, vector<128x256xbf16>, vector<64x256xf32> -> vector<64x256xf32>
    %47 = arith.addf %42, %46 : vector<64x256xf32>
    %48 = vector.extract_strided_slice %36 {offsets = [0, 2, 0], sizes = [2, 32, 128], strides = [1, 1, 1]} : vector<2x40x128xbf16> to vector<2x32x128xbf16>
    %49 = vector.shape_cast %48 : vector<2x32x128xbf16> to vector<64x128xbf16>
    %c256 = arith.constant 256 : index
    %c0_26 = arith.constant 0 : index
    %50 = vector.load %arg8[%c256, %c0_26] : memref<640x256xbf16, #tpu.memory_space<vmem>>, vector<128x256xbf16>
    %cst_27 = arith.constant dense<0.000000e+00> : vector<64x256xf32>
    %51 = tpu.matmul %49, %50, %cst_27 {dimension_numbers = #tpu.dot_dimension_numbers<[1], [0], [0], [1], [0, 0, 1, 1], [], []>} : vector<64x128xbf16>, vector<128x256xbf16>, vector<64x256xf32> -> vector<64x256xf32>
    %52 = arith.addf %47, %51 : vector<64x256xf32>
    %53 = vector.extract_strided_slice %36 {offsets = [0, 3, 0], sizes = [2, 32, 128], strides = [1, 1, 1]} : vector<2x40x128xbf16> to vector<2x32x128xbf16>
    %54 = vector.shape_cast %53 : vector<2x32x128xbf16> to vector<64x128xbf16>
    %c384 = arith.constant 384 : index
    %c0_28 = arith.constant 0 : index
    %55 = vector.load %arg8[%c384, %c0_28] : memref<640x256xbf16, #tpu.memory_space<vmem>>, vector<128x256xbf16>
    %cst_29 = arith.constant dense<0.000000e+00> : vector<64x256xf32>
    %56 = tpu.matmul %54, %55, %cst_29 {dimension_numbers = #tpu.dot_dimension_numbers<[1], [0], [0], [1], [0, 0, 1, 1], [], []>} : vector<64x128xbf16>, vector<128x256xbf16>, vector<64x256xf32> -> vector<64x256xf32>
    %57 = arith.addf %52, %56 : vector<64x256xf32>
    %58 = vector.extract_strided_slice %36 {offsets = [0, 4, 0], sizes = [2, 32, 128], strides = [1, 1, 1]} : vector<2x40x128xbf16> to vector<2x32x128xbf16>
    %59 = vector.shape_cast %58 : vector<2x32x128xbf16> to vector<64x128xbf16>
    %c512 = arith.constant 512 : index
    %c0_30 = arith.constant 0 : index
    %60 = vector.load %arg8[%c512, %c0_30] : memref<640x256xbf16, #tpu.memory_space<vmem>>, vector<128x256xbf16>
    %cst_31 = arith.constant dense<0.000000e+00> : vector<64x256xf32>
    %61 = tpu.matmul %59, %60, %cst_31 {dimension_numbers = #tpu.dot_dimension_numbers<[1], [0], [0], [1], [0, 0, 1, 1], [], []>} : vector<64x128xbf16>, vector<128x256xbf16>, vector<64x256xf32> -> vector<64x256xf32>
    %62 = arith.addf %57, %61 : vector<64x256xf32>
    %63 = vector.broadcast %37 : vector<1x256xf32> to vector<64x256xf32>
    %64 = arith.mulf %62, %63 : vector<64x256xf32>
    %65 = vector.broadcast %38 : vector<1x256xf32> to vector<64x256xf32>
    %66 = arith.addf %64, %65 : vector<64x256xf32>
    %cst_32 = arith.constant 0.000000e+00 : f32
    %67 = vector.broadcast %cst_32 : f32 to vector<64x256xf32>
    %68 = arith.maximumf %66, %67 : vector<64x256xf32>
    %69 = arith.truncf %68 : vector<64x256xf32> to vector<64x256xbf16>
    %70 = vector.shape_cast %69 : vector<64x256xbf16> to vector<2x32x256xbf16>
    %c0_33 = arith.constant 0 : index
    %c0_34 = arith.constant 0 : index
    %71 = vector.load %arg12[%c0_33, %c0_34] : memref<1x128xf32, #tpu.memory_space<vmem>>, vector<1x128xf32>
    %c0_35 = arith.constant 0 : index
    %c0_36 = arith.constant 0 : index
    %72 = vector.load %arg13[%c0_35, %c0_36] : memref<1x128xf32, #tpu.memory_space<vmem>>, vector<1x128xf32>
    %73 = vector.extract_strided_slice %70 {offsets = [0, 0, 0], sizes = [2, 24, 256], strides = [1, 1, 1]} : vector<2x32x256xbf16> to vector<2x24x256xbf16>
    %74 = vector.shape_cast %73 : vector<2x24x256xbf16> to vector<48x256xbf16>
    %c0_37 = arith.constant 0 : index
    %c0_38 = arith.constant 0 : index
    %75 = vector.load %arg11[%c0_37, %c0_38] : memref<768x128xbf16, #tpu.memory_space<vmem>>, vector<256x128xbf16>
    %cst_39 = arith.constant dense<0.000000e+00> : vector<48x128xf32>
    %76 = tpu.matmul %74, %75, %cst_39 {dimension_numbers = #tpu.dot_dimension_numbers<[1], [0], [0], [1], [0, 0, 1, 1], [], []>} : vector<48x256xbf16>, vector<256x128xbf16>, vector<48x128xf32> -> vector<48x128xf32>
    %77 = vector.extract_strided_slice %70 {offsets = [0, 1, 0], sizes = [2, 24, 256], strides = [1, 1, 1]} : vector<2x32x256xbf16> to vector<2x24x256xbf16>
    %78 = vector.shape_cast %77 : vector<2x24x256xbf16> to vector<48x256xbf16>
    %c256_40 = arith.constant 256 : index
    %c0_41 = arith.constant 0 : index
    %79 = vector.load %arg11[%c256_40, %c0_41] : memref<768x128xbf16, #tpu.memory_space<vmem>>, vector<256x128xbf16>
    %cst_42 = arith.constant dense<0.000000e+00> : vector<48x128xf32>
    %80 = tpu.matmul %78, %79, %cst_42 {dimension_numbers = #tpu.dot_dimension_numbers<[1], [0], [0], [1], [0, 0, 1, 1], [], []>} : vector<48x256xbf16>, vector<256x128xbf16>, vector<48x128xf32> -> vector<48x128xf32>
    %81 = arith.addf %76, %80 : vector<48x128xf32>
    %82 = vector.extract_strided_slice %70 {offsets = [0, 2, 0], sizes = [2, 24, 256], strides = [1, 1, 1]} : vector<2x32x256xbf16> to vector<2x24x256xbf16>
    %83 = vector.shape_cast %82 : vector<2x24x256xbf16> to vector<48x256xbf16>
    %c512_43 = arith.constant 512 : index
    %c0_44 = arith.constant 0 : index
    %84 = vector.load %arg11[%c512_43, %c0_44] : memref<768x128xbf16, #tpu.memory_space<vmem>>, vector<256x128xbf16>
    %cst_45 = arith.constant dense<0.000000e+00> : vector<48x128xf32>
    %85 = tpu.matmul %83, %84, %cst_45 {dimension_numbers = #tpu.dot_dimension_numbers<[1], [0], [0], [1], [0, 0, 1, 1], [], []>} : vector<48x256xbf16>, vector<256x128xbf16>, vector<48x128xf32> -> vector<48x128xf32>
    %86 = arith.addf %81, %85 : vector<48x128xf32>
    %87 = vector.broadcast %71 : vector<1x128xf32> to vector<48x128xf32>
    %88 = arith.mulf %86, %87 : vector<48x128xf32>
    %89 = vector.broadcast %72 : vector<1x128xf32> to vector<48x128xf32>
    %90 = arith.addf %88, %89 : vector<48x128xf32>
    %cst_46 = arith.constant 0.000000e+00 : f32
    %91 = vector.broadcast %cst_46 : f32 to vector<48x128xf32>
    %92 = arith.maximumf %90, %91 : vector<48x128xf32>
    %93 = vector.shape_cast %92 : vector<48x128xf32> to vector<2x24x128xf32>
    %94 = tpu.iota {dimensions = array<i32: 0>} : vector<24x1xi32>
    %c19_i32 = arith.constant 19 : i32
    %95 = vector.broadcast %c19_i32 : i32 to vector<24x1xi32>
    %96 = arith.cmpi slt, %94, %95 : vector<24x1xi32>
    %cst_47 = arith.constant 0.0526315793 : f32
    %cst_48 = arith.constant 0.000000e+00 : f32
    %97 = vector.broadcast %cst_47 : f32 to vector<24x1xf32>
    %98 = vector.broadcast %cst_48 : f32 to vector<24x1xf32>
    %99 = arith.select %96, %97, %98 : vector<24x1xi1>, vector<24x1xf32>
    %100 = vector.shape_cast %99 : vector<24x1xf32> to vector<1x24x1xf32>
    %101 = vector.broadcast %100 : vector<1x24x1xf32> to vector<2x24x128xf32>
    %102 = arith.mulf %93, %101 : vector<2x24x128xf32>
    %cst_49 = arith.constant dense<0.000000e+00> : vector<2x128xf32>
    %103 = vector.multi_reduction <add>, %102, %cst_49 [1] : vector<2x24x128xf32> to vector<2x128xf32>
    %104 = arith.truncf %103 : vector<2x128xf32> to vector<2x128xbf16>
    %c0_50 = arith.constant 0 : index
    %c0_51 = arith.constant 0 : index
    %105 = vector.load %arg14[%c0_50, %c0_51] : memref<256x1xbf16, #tpu.memory_space<vmem>>, vector<256x1xbf16>
    %cst_52 = arith.constant dense<0.000000e+00> : vector<2x1xf32>
    %106 = tpu.matmul %23, %105, %cst_52 {dimension_numbers = #tpu.dot_dimension_numbers<[1], [0], [0], [1], [0, 0, 1, 1], [], []>} : vector<2x256xbf16>, vector<256x1xbf16>, vector<2x1xf32> -> vector<2x1xf32>
    %c0_53 = arith.constant 0 : index
    %c0_54 = arith.constant 0 : index
    %107 = vector.load %arg15[%c0_53, %c0_54] : memref<128x1xbf16, #tpu.memory_space<vmem>>, vector<128x1xbf16>
    %cst_55 = arith.constant dense<0.000000e+00> : vector<2x1xf32>
    %108 = tpu.matmul %104, %107, %cst_55 {dimension_numbers = #tpu.dot_dimension_numbers<[1], [0], [0], [1], [0, 0, 1, 1], [], []>} : vector<2x128xbf16>, vector<128x1xbf16>, vector<2x1xf32> -> vector<2x1xf32>
    %109 = arith.addf %106, %108 : vector<2x1xf32>
    %c0_56 = arith.constant 0 : index
    %c0_57 = arith.constant 0 : index
    %110 = vector.load %arg16[%c0_56, %c0_57] : memref<1x1xf32, #tpu.memory_space<vmem>>, vector<1x1xf32>
    %111 = vector.broadcast %110 : vector<1x1xf32> to vector<2x1xf32>
    %112 = arith.addf %109, %111 : vector<2x1xf32>
    %cst_58 = arith.constant dense<0xFF800000> : vector<2xf32>
    %113 = vector.multi_reduction <maximumf>, %112, %cst_58 [1] : vector<2x1xf32> to vector<2xf32>
    %114 = vector.shape_cast %113 : vector<2xf32> to vector<2x1xf32>
    %115 = arith.subf %112, %114 : vector<2x1xf32>
    %116 = math.exp %115 : vector<2x1xf32>
    %cst_59 = arith.constant dense<0.000000e+00> : vector<2xf32>
    %117 = vector.multi_reduction <add>, %116, %cst_59 [1] : vector<2x1xf32> to vector<2xf32>
    %118 = vector.shape_cast %117 : vector<2xf32> to vector<2x1xf32>
    %119 = math.log %118 : vector<2x1xf32>
    %120 = arith.addf %114, %119 : vector<2x1xf32>
    %121 = arith.subf %112, %120 : vector<2x1xf32>
    %c0_60 = arith.constant 0 : index
    %c0_61 = arith.constant 0 : index
    %122 = vector.load %arg17[%c0_60, %c0_61] : memref<2x1xf32, #tpu.memory_space<vmem>>, vector<2x1xf32>
    tpu.vector_store %arg17[%c0_60, %c0_61], %121 {strides = array<i32>} : memref<2x1xf32, #tpu.memory_space<vmem>>, vector<2x1xf32>,
    return
  }
  func.func @transform_0(%arg0: i32) -> (i32, i32) {
    %c0_i32 = arith.constant 0 : i32
    %c0_i32_0 = arith.constant 0 : i32
    return %arg0, %c0_i32 : i32, i32
  }
  func.func @transform_1(%arg0: i32) -> (i32, i32) {
    %c0_i32 = arith.constant 0 : i32
    %c0_i32_0 = arith.constant 0 : i32
    return %arg0, %c0_i32 : i32, i32
  }
  func.func @transform_2(%arg0: i32) -> (i32, i32) {
    %c0_i32 = arith.constant 0 : i32
    %c0_i32_0 = arith.constant 0 : i32
    %c0_i32_1 = arith.constant 0 : i32
    return %c0_i32, %c0_i32_0 : i32, i32
  }
  func.func @transform_3(%arg0: i32) -> (i32, i32) {
    %c0_i32 = arith.constant 0 : i32
    %c0_i32_0 = arith.constant 0 : i32
    %c0_i32_1 = arith.constant 0 : i32
    return %c0_i32, %c0_i32_0 : i32, i32
  }
  func.func @transform_4(%arg0: i32) -> (i32, i32) {
    %c0_i32 = arith.constant 0 : i32
    %c0_i32_0 = arith.constant 0 : i32
    %c0_i32_1 = arith.constant 0 : i32
    return %c0_i32, %c0_i32_0 : i32, i32
  }
  func.func @transform_5(%arg0: i32) -> (i32, i32) {
    %c0_i32 = arith.constant 0 : i32
    %c0_i32_0 = arith.constant 0 : i32
    %c0_i32_1 = arith.constant 0 : i32
    return %c0_i32, %c0_i32_0 : i32, i32
  }
  func.func @transform_6(%arg0: i32) -> (i32, i32) {
    %c0_i32 = arith.constant 0 : i32
    %c0_i32_0 = arith.constant 0 : i32
    %c0_i32_1 = arith.constant 0 : i32
    return %c0_i32, %c0_i32_0 : i32, i32
  }
  func.func @transform_7(%arg0: i32) -> (i32, i32) {
    %c0_i32 = arith.constant 0 : i32
    %c0_i32_0 = arith.constant 0 : i32
    %c0_i32_1 = arith.constant 0 : i32
    return %c0_i32, %c0_i32_0 : i32, i32
  }
  func.func @transform_8(%arg0: i32) -> (i32, i32) {
    %c0_i32 = arith.constant 0 : i32
    %c0_i32_0 = arith.constant 0 : i32
    %c0_i32_1 = arith.constant 0 : i32
    return %c0_i32, %c0_i32_0 : i32, i32
  }
  func.func @transform_9(%arg0: i32) -> (i32, i32) {
    %c0_i32 = arith.constant 0 : i32
    %c0_i32_0 = arith.constant 0 : i32
    %c0_i32_1 = arith.constant 0 : i32
    return %c0_i32, %c0_i32_0 : i32, i32
  }
  func.func @transform_10(%arg0: i32) -> (i32, i32) {
    %c0_i32 = arith.constant 0 : i32
    %c0_i32_0 = arith.constant 0 : i32
    %c0_i32_1 = arith.constant 0 : i32
    return %c0_i32, %c0_i32_0 : i32, i32
  }
  func.func @transform_11(%arg0: i32) -> (i32, i32) {
    %c0_i32 = arith.constant 0 : i32
    %c0_i32_0 = arith.constant 0 : i32
    %c0_i32_1 = arith.constant 0 : i32
    return %c0_i32, %c0_i32_0 : i32, i32
  }
  func.func @transform_12(%arg0: i32) -> (i32, i32) {
    %c0_i32 = arith.constant 0 : i32
    %c0_i32_0 = arith.constant 0 : i32
    %c0_i32_1 = arith.constant 0 : i32
    return %c0_i32, %c0_i32_0 : i32, i32
  }
  func.func @transform_13(%arg0: i32) -> (i32, i32) {
    %c0_i32 = arith.constant 0 : i32
    %c0_i32_0 = arith.constant 0 : i32
    %c0_i32_1 = arith.constant 0 : i32
    return %c0_i32, %c0_i32_0 : i32, i32
  }
  func.func @transform_14(%arg0: i32) -> (i32, i32) {
    %c0_i32 = arith.constant 0 : i32
    %c0_i32_0 = arith.constant 0 : i32
    %c0_i32_1 = arith.constant 0 : i32
    return %c0_i32, %c0_i32_0 : i32, i32
  }
  func.func @transform_15(%arg0: i32) -> (i32, i32) {
    %c0_i32 = arith.constant 0 : i32
    %c0_i32_0 = arith.constant 0 : i32
    %c0_i32_1 = arith.constant 0 : i32
    return %c0_i32, %c0_i32_0 : i32, i32
  }
  func.func @transform_16(%arg0: i32) -> (i32, i32) {
    %c0_i32 = arith.constant 0 : i32
    %c0_i32_0 = arith.constant 0 : i32
    return %arg0, %c0_i32 : i32, i32
  }
}

module attributes {stable_mosaic.version = 11 : i64} {
  func.func @lstm_fcn_kernel(%arg0: i32, %arg1: memref<2x32xbf16, #tpu.memory_space<vmem>>, %arg2: memref<80x8xbf16, #tpu.memory_space<vmem>>, %arg3: memref<32x768xbf16, #tpu.memory_space<vmem>>, %arg4: memref<1x768xf32, #tpu.memory_space<vmem>>, %arg5: memref<8x128xbf16, #tpu.memory_space<vmem>>, %arg6: memref<1x128xf32, #tpu.memory_space<vmem>>, %arg7: memref<1x128xf32, #tpu.memory_space<vmem>>, %arg8: memref<640x256xbf16, #tpu.memory_space<vmem>>, %arg9: memref<1x256xf32, #tpu.memory_space<vmem>>, %arg10: memref<1x256xf32, #tpu.memory_space<vmem>>, %arg11: memref<768x128xbf16, #tpu.memory_space<vmem>>, %arg12: memref<1x128xf32, #tpu.memory_space<vmem>>, %arg13: memref<1x128xf32, #tpu.memory_space<vmem>>, %arg14: memref<256x1xbf16, #tpu.memory_space<vmem>>, %arg15: memref<128x1xbf16, #tpu.memory_space<vmem>>, %arg16: memref<1x1xf32, #tpu.memory_space<vmem>>, %arg17: memref<2x1xf32, #tpu.memory_space<vmem>>) attributes {dimension_semantics = [#tpu.dimension_semantics<parallel>], iteration_bounds = array<i64: 1>, scalar_prefetch = 0 : i64, scratch_operands = 0 : i64, tpu.core_type = #tpu.core_type<tc>, window_params = [{transform_indices = @transform_0, window_bounds = array<i64: 2, 32>}, {transform_indices = @transform_1, window_bounds = array<i64: 80, 8>}, {pipeline_mode = #tpu.pipeline_mode<synchronous>, transform_indices = @transform_2, window_bounds = array<i64: 32, 768>}, {pipeline_mode = #tpu.pipeline_mode<synchronous>, transform_indices = @transform_3, window_bounds = array<i64: 1, 768>}, {pipeline_mode = #tpu.pipeline_mode<synchronous>, transform_indices = @transform_4, window_bounds = array<i64: 8, 128>}, {pipeline_mode = #tpu.pipeline_mode<synchronous>, transform_indices = @transform_5, window_bounds = array<i64: 1, 128>}, {pipeline_mode = #tpu.pipeline_mode<synchronous>, transform_indices = @transform_6, window_bounds = array<i64: 1, 128>}, {pipeline_mode = #tpu.pipeline_mode<synchronous>, transform_indices = @transform_7, window_bounds = array<i64: 640, 256>}, {pipeline_mode = #tpu.pipeline_mode<synchronous>, transform_indices = @transform_8, window_bounds = array<i64: 1, 256>}, {pipeline_mode = #tpu.pipeline_mode<synchronous>, transform_indices = @transform_9, window_bounds = array<i64: 1, 256>}, {pipeline_mode = #tpu.pipeline_mode<synchronous>, transform_indices = @transform_10, window_bounds = array<i64: 768, 128>}, {pipeline_mode = #tpu.pipeline_mode<synchronous>, transform_indices = @transform_11, window_bounds = array<i64: 1, 128>}, {pipeline_mode = #tpu.pipeline_mode<synchronous>, transform_indices = @transform_12, window_bounds = array<i64: 1, 128>}, {pipeline_mode = #tpu.pipeline_mode<synchronous>, transform_indices = @transform_13, window_bounds = array<i64: 256, 1>}, {pipeline_mode = #tpu.pipeline_mode<synchronous>, transform_indices = @transform_14, window_bounds = array<i64: 128, 1>}, {pipeline_mode = #tpu.pipeline_mode<synchronous>, transform_indices = @transform_15, window_bounds = array<i64: 1, 1>}, {transform_indices = @transform_16, window_bounds = array<i64: 2, 1>}]} {
    %c0 = arith.constant 0 : index
    %c0_0 = arith.constant 0 : index
    %0 = vector.load %arg1[%c0, %c0_0] : memref<2x32xbf16, #tpu.memory_space<vmem>>, vector<2x32xbf16>
    %c0_1 = arith.constant 0 : index
    %c0_2 = arith.constant 0 : index
    %1 = vector.load %arg3[%c0_1, %c0_2] : memref<32x768xbf16, #tpu.memory_space<vmem>>, vector<32x768xbf16>
    %cst = arith.constant dense<0.000000e+00> : vector<2x768xf32>
    %2 = tpu.matmul %0, %1, %cst {dimension_numbers = #tpu.dot_dimension_numbers<[1], [0], [0], [1], [0, 0, 1, 1], [], []>} : vector<2x32xbf16>, vector<32x768xbf16>, vector<2x768xf32> -> vector<2x768xf32>
    %c0_3 = arith.constant 0 : index
    %c0_4 = arith.constant 0 : index
    %3 = vector.load %arg4[%c0_3, %c0_4] : memref<1x768xf32, #tpu.memory_space<vmem>>, vector<1x768xf32>
    %4 = vector.broadcast %3 : vector<1x768xf32> to vector<2x768xf32>
    %5 = arith.addf %2, %4 : vector<2x768xf32>
    %6 = vector.extract_strided_slice %5 {offsets = [0, 0], sizes = [2, 256], strides = [1, 1]} : vector<2x768xf32> to vector<2x256xf32>
    %7 = arith.negf %6 : vector<2x256xf32>
    %8 = math.exp %7 : vector<2x256xf32>
    %cst_5 = arith.constant 1.000000e+00 : f32
    %9 = vector.broadcast %cst_5 : f32 to vector<2x256xf32>
    %10 = arith.addf %9, %8 : vector<2x256xf32>
    %11 = arith.divf %9, %10 : vector<2x256xf32>
    %12 = vector.extract_strided_slice %5 {offsets = [0, 256], sizes = [2, 256], strides = [1, 1]} : vector<2x768xf32> to vector<2x256xf32>
    %13 = math.tanh %12 : vector<2x256xf32>
    %14 = vector.extract_strided_slice %5 {offsets = [0, 512], sizes = [2, 256], strides = [1, 1]} : vector<2x768xf32> to vector<2x256xf32>
    %15 = arith.negf %14 : vector<2x256xf32>
    %16 = math.exp %15 : vector<2x256xf32>
    %cst_6 = arith.constant 1.000000e+00 : f32
    %17 = vector.broadcast %cst_6 : f32 to vector<2x256xf32>
    %18 = arith.addf %17, %16 : vector<2x256xf32>
    %19 = arith.divf %17, %18 : vector<2x256xf32>
    %20 = arith.mulf %11, %13 : vector<2x256xf32>
    %21 = math.tanh %20 : vector<2x256xf32>
    %22 = arith.mulf %19, %21 : vector<2x256xf32>
    %23 = arith.truncf %22 : vector<2x256xf32> to vector<2x256xbf16>
    %c0_7 = arith.constant 0 : index
    %c0_8 = arith.constant 0 : index
    %24 = vector.load %arg2[%c0_7, %c0_8] : memref<80x8xbf16, #tpu.memory_space<vmem>>, vector<80x8xbf16>
    %c0_9 = arith.constant 0 : index
    %c0_10 = arith.constant 0 : index
    %25 = vector.load %arg5[%c0_9, %c0_10] : memref<8x128xbf16, #tpu.memory_space<vmem>>, vector<8x128xbf16>
    %cst_11 = arith.constant dense<0.000000e+00> : vector<80x128xf32>
    %26 = tpu.matmul %24, %25, %cst_11 {dimension_numbers = #tpu.dot_dimension_numbers<[1], [0], [0], [1], [0, 0, 1, 1], [], []>} : vector<80x8xbf16>, vector<8x128xbf16>, vector<80x128xf32> -> vector<80x128xf32>
    %c0_12 = arith.constant 0 : index
    %c0_13 = arith.constant 0 : index
    %27 = vector.load %arg6[%c0_12, %c0_13] : memref<1x128xf32, #tpu.memory_space<vmem>>, vector<1x128xf32>
    %28 = vector.broadcast %27 : vector<1x128xf32> to vector<80x128xf32>
    %29 = arith.mulf %26, %28 : vector<80x128xf32>
    %c0_14 = arith.constant 0 : index
    %c0_15 = arith.constant 0 : index
    %30 = vector.load %arg7[%c0_14, %c0_15] : memref<1x128xf32, #tpu.memory_space<vmem>>, vector<1x128xf32>
    %31 = vector.broadcast %30 : vector<1x128xf32> to vector<80x128xf32>
    %32 = arith.addf %29, %31 : vector<80x128xf32>
    %cst_16 = arith.constant 0.000000e+00 : f32
    %33 = vector.broadcast %cst_16 : f32 to vector<80x128xf32>
    %34 = arith.maximumf %32, %33 : vector<80x128xf32>
    %35 = arith.truncf %34 : vector<80x128xf32> to vector<80x128xbf16>
    %36 = vector.shape_cast %35 : vector<80x128xbf16> to vector<2x40x128xbf16>
    %c0_17 = arith.constant 0 : index
    %c0_18 = arith.constant 0 : index
    %37 = vector.load %arg9[%c0_17, %c0_18] : memref<1x256xf32, #tpu.memory_space<vmem>>, vector<1x256xf32>
    %c0_19 = arith.constant 0 : index
    %c0_20 = arith.constant 0 : index
    %38 = vector.load %arg10[%c0_19, %c0_20] : memref<1x256xf32, #tpu.memory_space<vmem>>, vector<1x256xf32>
    %39 = vector.extract_strided_slice %36 {offsets = [0, 0, 0], sizes = [2, 32, 128], strides = [1, 1, 1]} : vector<2x40x128xbf16> to vector<2x32x128xbf16>
    %40 = vector.shape_cast %39 : vector<2x32x128xbf16> to vector<64x128xbf16>
    %c0_21 = arith.constant 0 : index
    %c0_22 = arith.constant 0 : index
    %41 = vector.load %arg8[%c0_21, %c0_22] : memref<640x256xbf16, #tpu.memory_space<vmem>>, vector<128x256xbf16>
    %cst_23 = arith.constant dense<0.000000e+00> : vector<64x256xf32>
    %42 = tpu.matmul %40, %41, %cst_23 {dimension_numbers = #tpu.dot_dimension_numbers<[1], [0], [0], [1], [0, 0, 1, 1], [], []>} : vector<64x128xbf16>, vector<128x256xbf16>, vector<64x256xf32> -> vector<64x256xf32>
    %43 = vector.extract_strided_slice %36 {offsets = [0, 1, 0], sizes = [2, 32, 128], strides = [1, 1, 1]} : vector<2x40x128xbf16> to vector<2x32x128xbf16>
    %44 = vector.shape_cast %43 : vector<2x32x128xbf16> to vector<64x128xbf16>
    %c128 = arith.constant 128 : index
    %c0_24 = arith.constant 0 : index
    %45 = vector.load %arg8[%c128, %c0_24] : memref<640x256xbf16, #tpu.memory_space<vmem>>, vector<128x256xbf16>
    %cst_25 = arith.constant dense<0.000000e+00> : vector<64x256xf32>
    %46 = tpu.matmul %44, %45, %cst_25 {dimension_numbers = #tpu.dot_dimension_numbers<[1], [0], [0], [1], [0, 0, 1, 1], [], []>} : vector<64x128xbf16>, vector<128x256xbf16>, vector<64x256xf32> -> vector<64x256xf32>
    %47 = arith.addf %42, %46 : vector<64x256xf32>
    %48 = vector.extract_strided_slice %36 {offsets = [0, 2, 0], sizes = [2, 32, 128], strides = [1, 1, 1]} : vector<2x40x128xbf16> to vector<2x32x128xbf16>
    %49 = vector.shape_cast %48 : vector<2x32x128xbf16> to vector<64x128xbf16>
    %c256 = arith.constant 256 : index
    %c0_26 = arith.constant 0 : index
    %50 = vector.load %arg8[%c256, %c0_26] : memref<640x256xbf16, #tpu.memory_space<vmem>>, vector<128x256xbf16>
    %cst_27 = arith.constant dense<0.000000e+00> : vector<64x256xf32>
    %51 = tpu.matmul %49, %50, %cst_27 {dimension_numbers = #tpu.dot_dimension_numbers<[1], [0], [0], [1], [0, 0, 1, 1], [], []>} : vector<64x128xbf16>, vector<128x256xbf16>, vector<64x256xf32> -> vector<64x256xf32>
    %52 = arith.addf %47, %51 : vector<64x256xf32>
    %53 = vector.extract_strided_slice %36 {offsets = [0, 3, 0], sizes = [2, 32, 128], strides = [1, 1, 1]} : vector<2x40x128xbf16> to vector<2x32x128xbf16>
    %54 = vector.shape_cast %53 : vector<2x32x128xbf16> to vector<64x128xbf16>
    %c384 = arith.constant 384 : index
    %c0_28 = arith.constant 0 : index
    %55 = vector.load %arg8[%c384, %c0_28] : memref<640x256xbf16, #tpu.memory_space<vmem>>, vector<128x256xbf16>
    %cst_29 = arith.constant dense<0.000000e+00> : vector<64x256xf32>
    %56 = tpu.matmul %54, %55, %cst_29 {dimension_numbers = #tpu.dot_dimension_numbers<[1], [0], [0], [1], [0, 0, 1, 1], [], []>} : vector<64x128xbf16>, vector<128x256xbf16>, vector<64x256xf32> -> vector<64x256xf32>
    %57 = arith.addf %52, %56 : vector<64x256xf32>
    %58 = vector.extract_strided_slice %36 {offsets = [0, 4, 0], sizes = [2, 32, 128], strides = [1, 1, 1]} : vector<2x40x128xbf16> to vector<2x32x128xbf16>
    %59 = vector.shape_cast %58 : vector<2x32x128xbf16> to vector<64x128xbf16>
    %c512 = arith.constant 512 : index
    %c0_30 = arith.constant 0 : index
    %60 = vector.load %arg8[%c512, %c0_30] : memref<640x256xbf16, #tpu.memory_space<vmem>>, vector<128x256xbf16>
    %cst_31 = arith.constant dense<0.000000e+00> : vector<64x256xf32>
    %61 = tpu.matmul %59, %60, %cst_31 {dimension_numbers = #tpu.dot_dimension_numbers<[1], [0], [0], [1], [0, 0, 1, 1], [], []>} : vector<64x128xbf16>, vector<128x256xbf16>, vector<64x256xf32> -> vector<64x256xf32>
    %62 = arith.addf %57, %61 : vector<64x256xf32>
    %63 = vector.broadcast %37 : vector<1x256xf32> to vector<64x256xf32>
    %64 = arith.mulf %62, %63 : vector<64x256xf32>
    %65 = vector.broadcast %38 : vector<1x256xf32> to vector<64x256xf32>
    %66 = arith.addf %64, %65 : vector<64x256xf32>
    %cst_32 = arith.constant 0.000000e+00 : f32
    %67 = vector.broadcast %cst_32 : f32 to vector<64x256xf32>
    %68 = arith.maximumf %66, %67 : vector<64x256xf32>
    %69 = arith.truncf %68 : vector<64x256xf32> to vector<64x256xbf16>
    %70 = vector.shape_cast %69 : vector<64x256xbf16> to vector<2x32x256xbf16>
    %c0_33 = arith.constant 0 : index
    %c0_34 = arith.constant 0 : index
    %71 = vector.load %arg12[%c0_33, %c0_34] : memref<1x128xf32, #tpu.memory_space<vmem>>, vector<1x128xf32>
    %c0_35 = arith.constant 0 : index
    %c0_36 = arith.constant 0 : index
    %72 = vector.load %arg13[%c0_35, %c0_36] : memref<1x128xf32, #tpu.memory_space<vmem>>, vector<1x128xf32>
    %73 = vector.extract_strided_slice %70 {offsets = [0, 0, 0], sizes = [2, 24, 256], strides = [1, 1, 1]} : vector<2x32x256xbf16> to vector<2x24x256xbf16>
    %74 = vector.shape_cast %73 : vector<2x24x256xbf16> to vector<48x256xbf16>
    %c0_37 = arith.constant 0 : index
    %c0_38 = arith.constant 0 : index
    %75 = vector.load %arg11[%c0_37, %c0_38] : memref<768x128xbf16, #tpu.memory_space<vmem>>, vector<256x128xbf16>
    %cst_39 = arith.constant dense<0.000000e+00> : vector<48x128xf32>
    %76 = tpu.matmul %74, %75, %cst_39 {dimension_numbers = #tpu.dot_dimension_numbers<[1], [0], [0], [1], [0, 0, 1, 1], [], []>} : vector<48x256xbf16>, vector<256x128xbf16>, vector<48x128xf32> -> vector<48x128xf32>
    %77 = vector.extract_strided_slice %70 {offsets = [0, 1, 0], sizes = [2, 24, 256], strides = [1, 1, 1]} : vector<2x32x256xbf16> to vector<2x24x256xbf16>
    %78 = vector.shape_cast %77 : vector<2x24x256xbf16> to vector<48x256xbf16>
    %c256_40 = arith.constant 256 : index
    %c0_41 = arith.constant 0 : index
    %79 = vector.load %arg11[%c256_40, %c0_41] : memref<768x128xbf16, #tpu.memory_space<vmem>>, vector<256x128xbf16>
    %cst_42 = arith.constant dense<0.000000e+00> : vector<48x128xf32>
    %80 = tpu.matmul %78, %79, %cst_42 {dimension_numbers = #tpu.dot_dimension_numbers<[1], [0], [0], [1], [0, 0, 1, 1], [], []>} : vector<48x256xbf16>, vector<256x128xbf16>, vector<48x128xf32> -> vector<48x128xf32>
    %81 = arith.addf %76, %80 : vector<48x128xf32>
    %82 = vector.extract_strided_slice %70 {offsets = [0, 2, 0], sizes = [2, 24, 256], strides = [1, 1, 1]} : vector<2x32x256xbf16> to vector<2x24x256xbf16>
    %83 = vector.shape_cast %82 : vector<2x24x256xbf16> to vector<48x256xbf16>
    %c512_43 = arith.constant 512 : index
    %c0_44 = arith.constant 0 : index
    %84 = vector.load %arg11[%c512_43, %c0_44] : memref<768x128xbf16, #tpu.memory_space<vmem>>, vector<256x128xbf16>
    %cst_45 = arith.constant dense<0.000000e+00> : vector<48x128xf32>
    %85 = tpu.matmul %83, %84, %cst_45 {dimension_numbers = #tpu.dot_dimension_numbers<[1], [0], [0], [1], [0, 0, 1, 1], [], []>} : vector<48x256xbf16>, vector<256x128xbf16>, vector<48x128xf32> -> vector<48x128xf32>
    %86 = arith.addf %81, %85 : vector<48x128xf32>
    %87 = vector.broadcast %71 : vector<1x128xf32> to vector<48x128xf32>
    %88 = arith.mulf %86, %87 : vector<48x128xf32>
    %89 = vector.broadcast %72 : vector<1x128xf32> to vector<48x128xf32>
    %90 = arith.addf %88, %89 : vector<48x128xf32>
    %cst_46 = arith.constant 0.000000e+00 : f32
    %91 = vector.broadcast %cst_46 : f32 to vector<48x128xf32>
    %92 = arith.maximumf %90, %91 : vector<48x128xf32>
    %93 = vector.shape_cast %92 : vector<48x128xf32> to vector<2x24x128xf32>
    %94 = tpu.iota {dimensions = array<i32: 0>} : vector<24x1xi32>
    %c19_i32 = arith.constant 19 : i32
    %95 = vector.broadcast %c19_i32 : i32 to vector<24x1xi32>
    %96 = arith.cmpi slt, %94, %95 : vector<24x1xi32>
    %cst_47 = arith.constant 0.0526315793 : f32
    %cst_48 = arith.constant 0.000000e+00 : f32
    %97 = vector.broadcast %cst_47 : f32 to vector<24x1xf32>
    %98 = vector.broadcast %cst_48 : f32 to vector<24x1xf32>
    %99 = arith.select %96, %97, %98 : vector<24x1xi1>, vector<24x1xf32>
    %100 = vector.shape_cast %99 : vector<24x1xf32> to vector<1x24x1xf32>
    %101 = vector.broadcast %100 : vector<1x24x1xf32> to vector<2x24x128xf32>
    %102 = arith.mulf %93, %101 : vector<2x24x128xf32>
    %cst_49 = arith.constant dense<0.000000e+00> : vector<2x128xf32>
    %103 = vector.multi_reduction <add>, %102, %cst_49 [1] : vector<2x24x128xf32> to vector<2x128xf32>
    %104 = arith.truncf %103 : vector<2x128xf32> to vector<2x128xbf16>
    %c0_50 = arith.constant 0 : index
    %c0_51 = arith.constant 0 : index
    %105 = vector.load %arg14[%c0_50, %c0_51] : memref<256x1xbf16, #tpu.memory_space<vmem>>, vector<256x1xbf16>
    %cst_52 = arith.constant dense<0.000000e+00> : vector<2x1xf32>
    %106 = tpu.matmul %23, %105, %cst_52 {dimension_numbers = #tpu.dot_dimension_numbers<[1], [0], [0], [1], [0, 0, 1, 1], [], []>} : vector<2x256xbf16>, vector<256x1xbf16>, vector<2x1xf32> -> vector<2x1xf32>
    %c0_53 = arith.constant 0 : index
    %c0_54 = arith.constant 0 : index
    %107 = vector.load %arg15[%c0_53, %c0_54] : memref<128x1xbf16, #tpu.memory_space<vmem>>, vector<128x1xbf16>
    %cst_55 = arith.constant dense<0.000000e+00> : vector<2x1xf32>
    %108 = tpu.matmul %104, %107, %cst_55 {dimension_numbers = #tpu.dot_dimension_numbers<[1], [0], [0], [1], [0, 0, 1, 1], [], []>} : vector<2x128xbf16>, vector<128x1xbf16>, vector<2x1xf32> -> vector<2x1xf32>
    %109 = arith.addf %106, %108 : vector<2x1xf32>
    %c0_56 = arith.constant 0 : index
    %c0_57 = arith.constant 0 : index
    %110 = vector.load %arg16[%c0_56, %c0_57] : memref<1x1xf32, #tpu.memory_space<vmem>>, vector<1x1xf32>
    %111 = vector.broadcast %110 : vector<1x1xf32> to vector<2x1xf32>
    %112 = arith.addf %109, %111 : vector<2x1xf32>
    %cst_58 = arith.constant dense<0xFF800000> : vector<2xf32>
    %113 = vector.multi_reduction <maximumf>, %112, %cst_58 [1] : vector<2x1xf32> to vector<2xf32>
    %114 = vector.shape_cast %113 : vector<2xf32> to vector<2x1xf32>
    %115 = arith.subf %112, %114 : vector<2x1xf32>
    %116 = math.exp %115 : vector<2x1xf32>
    %cst_59 = arith.constant dense<0.000000e+00> : vector<2xf32>
    %117 = vector.multi_reduction <add>, %116, %cst_59 [1] : vector<2x1xf32> to vector<2xf32>
    %118 = vector.shape_cast %117 : vector<2xf32> to vector<2x1xf32>
    %119 = math.log %118 : vector<2x1xf32>
    %120 = arith.addf %114, %119 : vector<2x1xf32>
    %121 = arith.subf %112, %120 : vector<2x1xf32>
    %c0_60 = arith.constant 0 : index
    %c0_61 = arith.constant 0 : index
    %122 = vector.load %arg17[%c0_60, %c0_61] : memref<2x1xf32, #tpu.memory_space<vmem>>, vector<2x1xf32>
    tpu.vector_store %arg17[%c0_60, %c0_61], %121 {strides = array<i32>} : memref<2x1xf32, #tpu.memory_space<vmem>>, vector<2x1xf32>,
    return
  }
  func.func @transform_0(%arg0: i32) -> (i32, i32) {
    %c0_i32 = arith.constant 0 : i32
    %c0_i32_0 = arith.constant 0 : i32
    return %arg0, %c0_i32 : i32, i32
  }
  func.func @transform_1(%arg0: i32) -> (i32, i32) {
    %c0_i32 = arith.constant 0 : i32
    %c0_i32_0 = arith.constant 0 : i32
    return %arg0, %c0_i32 : i32, i32
  }
  func.func @transform_2(%arg0: i32) -> (i32, i32) {
    %c0_i32 = arith.constant 0 : i32
    %c0_i32_0 = arith.constant 0 : i32
    %c0_i32_1 = arith.constant 0 : i32
    return %c0_i32, %c0_i32_0 : i32, i32
  }
  func.func @transform_3(%arg0: i32) -> (i32, i32) {
    %c0_i32 = arith.constant 0 : i32
    %c0_i32_0 = arith.constant 0 : i32
    %c0_i32_1 = arith.constant 0 : i32
    return %c0_i32, %c0_i32_0 : i32, i32
  }
  func.func @transform_4(%arg0: i32) -> (i32, i32) {
    %c0_i32 = arith.constant 0 : i32
    %c0_i32_0 = arith.constant 0 : i32
    %c0_i32_1 = arith.constant 0 : i32
    return %c0_i32, %c0_i32_0 : i32, i32
  }
  func.func @transform_5(%arg0: i32) -> (i32, i32) {
    %c0_i32 = arith.constant 0 : i32
    %c0_i32_0 = arith.constant 0 : i32
    %c0_i32_1 = arith.constant 0 : i32
    return %c0_i32, %c0_i32_0 : i32, i32
  }
  func.func @transform_6(%arg0: i32) -> (i32, i32) {
    %c0_i32 = arith.constant 0 : i32
    %c0_i32_0 = arith.constant 0 : i32
    %c0_i32_1 = arith.constant 0 : i32
    return %c0_i32, %c0_i32_0 : i32, i32
  }
  func.func @transform_7(%arg0: i32) -> (i32, i32) {
    %c0_i32 = arith.constant 0 : i32
    %c0_i32_0 = arith.constant 0 : i32
    %c0_i32_1 = arith.constant 0 : i32
    return %c0_i32, %c0_i32_0 : i32, i32
  }
  func.func @transform_8(%arg0: i32) -> (i32, i32) {
    %c0_i32 = arith.constant 0 : i32
    %c0_i32_0 = arith.constant 0 : i32
    %c0_i32_1 = arith.constant 0 : i32
    return %c0_i32, %c0_i32_0 : i32, i32
  }
  func.func @transform_9(%arg0: i32) -> (i32, i32) {
    %c0_i32 = arith.constant 0 : i32
    %c0_i32_0 = arith.constant 0 : i32
    %c0_i32_1 = arith.constant 0 : i32
    return %c0_i32, %c0_i32_0 : i32, i32
  }
  func.func @transform_10(%arg0: i32) -> (i32, i32) {
    %c0_i32 = arith.constant 0 : i32
    %c0_i32_0 = arith.constant 0 : i32
    %c0_i32_1 = arith.constant 0 : i32
    return %c0_i32, %c0_i32_0 : i32, i32
  }
  func.func @transform_11(%arg0: i32) -> (i32, i32) {
    %c0_i32 = arith.constant 0 : i32
    %c0_i32_0 = arith.constant 0 : i32
    %c0_i32_1 = arith.constant 0 : i32
    return %c0_i32, %c0_i32_0 : i32, i32
  }
  func.func @transform_12(%arg0: i32) -> (i32, i32) {
    %c0_i32 = arith.constant 0 : i32
    %c0_i32_0 = arith.constant 0 : i32
    %c0_i32_1 = arith.constant 0 : i32
    return %c0_i32, %c0_i32_0 : i32, i32
  }
  func.func @transform_13(%arg0: i32) -> (i32, i32) {
    %c0_i32 = arith.constant 0 : i32
    %c0_i32_0 = arith.constant 0 : i32
    %c0_i32_1 = arith.constant 0 : i32
    return %c0_i32, %c0_i32_0 : i32, i32
  }
  func.func @transform_14(%arg0: i32) -> (i32, i32) {
    %c0_i32 = arith.constant 0 : i32
    %c0_i32_0 = arith.constant 0 : i32
    %c0_i32_1 = arith.constant 0 : i32
    return %c0_i32, %c0_i32_0 : i32, i32
  }
  func.func @transform_15(%arg0: i32) -> (i32, i32) {
    %c0_i32 = arith.constant 0 : i32
    %c0_i32_0 = arith.constant 0 : i32
    %c0_i32_1 = arith.constant 0 : i32
    return %c0_i32, %c0_i32_0 : i32, i32
  }
  func.func @transform_16(%arg0: i32) -> (i32, i32) {
    %c0_i32 = arith.constant 0 : i32
    %c0_i32_0 = arith.constant 0 : i32
    return %arg0, %c0_i32 : i32, i32
  }
}

</mosaic_0001>

<bundles_post_ra>
// kernel: tpu_custom_call.1
= control target key start
LH: loop header
LB: loop body
LE: loop exit
PB: predicated region body
PF: predicated region fallthrough
CT: control target
= control target key end

     0   :  { %s4599_s0 = inlined_call_operand.vmem [shape: bf16[2,32], index: 0, kind: input, shape index: {}]   ;;  %s4600_s1 = inlined_call_operand.vmem [shape: bf16[80,8], index: 1, kind: input, shape index: {}]   ;;  %s4601_s2 = inlined_call_operand.vmem [shape: bf16[32,768], index: 2, kind: input, shape index: {}]   ;;  %s4602_s3 = inlined_call_operand.vmem [shape: f32[1,768], index: 3, kind: input, shape index: {}]   ;;  %s4603_s4 = inlined_call_operand.vmem [shape: bf16[8,128], index: 4, kind: input, shape index: {}]   ;;  %s4604_s5 = inlined_call_operand.vmem [shape: f32[1,128], index: 5, kind: input, shape index: {}]   ;;  %s4605_s6 = inlined_call_operand.vmem [shape: f32[1,128], index: 6, kind: input, shape index: {}]   ;;  %s4606_s7 = inlined_call_operand.hbm [shape: bf16[640,256], index: 7, kind: input, shape index: {}]   ;;  %s4607_s8 = inlined_call_operand.vmem [shape: f32[1,256], index: 8, kind: input, shape index: {}]   ;;  %s4608_s9 = inlined_call_operand.vmem [shape: f32[1,256], index: 9, kind: input, shape index: {}]   ;;  %s4609_s10 = inlined_call_operand.hbm [shape: bf16[768,128], index: 10, kind: input, shape index: {}]   ;;  %s4610_s11 = inlined_call_operand.vmem [shape: f32[1,128], index: 11, kind: input, shape index: {}]   ;;  %s4611_s12 = inlined_call_operand.vmem [shape: f32[1,128], index: 12, kind: input, shape index: {}]   ;;  %s4612_s13 = inlined_call_operand.vmem [shape: bf16[256,1], index: 13, kind: input, shape index: {}]   ;;  %s4613_s14 = inlined_call_operand.vmem [shape: bf16[128,1], index: 14, kind: input, shape index: {}]   ;;  %s4614_s15 = inlined_call_operand.<no memory space> [shape: f32[1,1], index: 15, kind: input, shape index: {}]   ;;  %s4615_s16 = inlined_call_operand.vmem [shape: f32[2,1], index: 16, kind: output, shape index: {}]  }
   0x1   :  { %4629 = sst [smem:[#allocation11_spill]] %s4599_s0  ;;  %v21_v0 = vstv %s4614_s15 }
   0x2   :  { %22 = vst [vmem:[#allocation2] sm:$0x1] %v21_v0 }
   0x3   :  { %23 = vsyncpa [#allocation4], 0 }
   0x4   :  { %24 = vsyncpa [#allocation6], 0  ;;  %s3716_s23 = smov [#allocation3]   ;;  %s3668_s27 = scalar_lea.hbm %s4606_s7, 10240 }
   0x5   :  { %s44_s24 = sshll.u32 %s3716_s23, 4  ;;  %p3669_p0 = scmp.ne.s32.totalorder %s4606_s7, %s3668_s27  ;;  %s45_s24 = int_to_ptr.vmem [resolvable:$true] %s44_s24 }
   0x6   :  { %p3672_p1 = scmp.lt.u32.totalorder %s3668_s27, %s4606_s7 }
   0x8   :  { %p3674_p2 = pnand %p3672_p1, %p3669_p0 }
   0xa   :  { %3677 = shalt.err (!%p3674_p2)
}
   0xb   :  { %s3678_s15 = scalar_lea.vmem %s45_s24, 10240  ;;  %p3683_p4 = scmp.lt.s32.totalorder %s45_s24, %s45_s24 }
   0xc   :  { %p3679_p3 = scmp.ne.s32.totalorder %s45_s24, %s3678_s15  ;;  %p3684_p5 = scmp.lt.s32.totalorder %s3678_s15, %s3678_s15 }
   0xe   :  { %p3685_p6 = por %p3684_p5, %p3683_p4 }
  0x10   :  { %p3686_p7 = pnand %p3685_p6, %p3679_p3 }
  0x12   :  { %3689 = shalt.err (!%p3686_p7)
}
  0x13   :  { %s3717_s17 = smov 128   ;;  %s3718_s18 = smov 8  }
  0x14   :  { %50 = dma.hbm_to_vmem [thread:$0]  %s4606_s7, 10240, %s45_s24, [#allocation4], %s3717_s17, %s3717_s17, %s3718_s18  }
  0x15   :  { %s3719_s21 = smov [#allocation5]   ;;  %s3690_s26 = scalar_lea.hbm %s4609_s10, 6144 }
  0x16   :  { %s60_s22 = sshll.u32 %s3719_s21, 4  ;;  %p3691_p8 = scmp.ne.s32.totalorder %s4609_s10, %s3690_s26  ;;  %s61_s22 = int_to_ptr.vmem [resolvable:$true] %s60_s22 }
  0x17   :  { %p3694_p9 = scmp.lt.u32.totalorder %s3690_s26, %s4609_s10 }
  0x19   :  { %p3696_p10 = pnand %p3694_p9, %p3691_p8 }
  0x1b   :  { %3699 = shalt.err (!%p3696_p10)
}
  0x1c   :  { %s3700_s0 = scalar_lea.vmem %s61_s22, 6144  ;;  %p3705_p12 = scmp.lt.s32.totalorder %s61_s22, %s61_s22 }
  0x1d   :  { %p3701_p11 = scmp.ne.s32.totalorder %s61_s22, %s3700_s0  ;;  %p3706_p13 = scmp.lt.s32.totalorder %s3700_s0, %s3700_s0 }
  0x1f   :  { %p3707_p0 = por %p3706_p13, %p3705_p12 }
  0x21   :  { %p3708_p1 = pnand %p3707_p0, %p3701_p11 }
  0x23   :  { %3711 = shalt.err (!%p3708_p1)
}
  0x24   :  { %s3720_s7 = smov 64   ;;  %s3721_s24 = smov 4  }
  0x25   :  { %66 = dma.hbm_to_vmem [thread:$0]  %s4609_s10, 6144, %s61_s22, [#allocation6], %s3720_s7, %s3720_s7, %s3721_s24  }
  0x26   :  { %3712 = dma.done.wait [#allocation4], 10240  }
  0x27   :  { %3713 = vsyncadd [#allocation4], 4294957056 }
  0x28   :  { %3714 = dma.done.wait [#allocation6], 6144  }
  0x29   :  { %3715 = vsyncadd [#allocation6], 4294961152  ;;  %v4624_v1 = vmov 0   ;;  %v3425_v2 = vld [vmem:[%s4601_s2 + $0x4] ss:$24 sps:$4 sm:$0xff]   ;;  %s4630_s30 = sld [smem:[#allocation11_spill]]  ;;  %v99_v40 = vlaneseq }
  0x2a   :  { %225 = vmatprep.mubr.bf16.mxu1 %v4624_v1  ;;  %307 = vmatprep.mubr.bf16.mxu0 %v4624_v1  ;;  %v3427_v3 = vld [vmem:[%s4601_s2] ss:$24 sps:$4 sm:$0xff]   ;;  %v3428_v4 = vld [vmem:[%s4601_s2 + $0x34] ss:$24 sps:$4 sm:$0xff]   ;;  %v3430_v5 = vld [vmem:[%s4601_s2 + $0x30] ss:$24 sps:$4 sm:$0xff]  }
  0x2b   :  { %193 = vmatprep.subr.bf16.mxu1 %v3425_v2  ;;  %v3433_v6 = vld [vmem:[%s4601_s2 + $0xc] ss:$24 sps:$4 sm:$0xff]   ;;  %v3431_v8 = vld [vmem:[%s4601_s2 + $0x8] ss:$24 sps:$4 sm:$0xff]   ;;  %vm189_vm0 = vcmask 261120   ;;  %vm402_vm1 = vcmask 1043456  }
  0x2c   :  { %194 = vmatpush1.bf16.msra.mxu1 %v3427_v3  ;;  %v3437_v9 = vld [vmem:[%s4601_s2 + $0x14] ss:$24 sps:$4 sm:$0xff]   ;;  %v3439_v10 = vld [vmem:[%s4601_s2 + $0x10] ss:$24 sps:$4 sm:$0xff]   ;;  %v3440_v11 = vld [vmem:[%s4601_s2 + $0x44] ss:$24 sps:$4 sm:$0xff]  }
  0x2d   :  { %195 = vmatprep.subr.bf16.mxu1 %v3428_v4  ;;  %v3436_v12 = vld [vmem:[%s4601_s2 + $0x3c] ss:$24 sps:$4 sm:$0xff]   ;;  %275 = vmatprep.subr.bf16.mxu0 %v3437_v9  ;;  %v3442_v13 = vld [vmem:[%s4601_s2 + $0x40] ss:$24 sps:$4 sm:$0xff]   ;;  %v4616_v16 = vmov 0.0   ;;  %vm3724_vm2 = vmmov 0  }
  0x2e   :  { %276 = vmatpush1.bf16.msra.mxu0 %v3439_v10  ;;  %v3434_v14 = vld [vmem:[%s4601_s2 + $0x38] ss:$24 sps:$4 sm:$0xff]   ;;  %v360_v15 = vld [vmem:[%s4603_s4] sm:$0xf]  ;;  %vm386_vm3 = vcmask 64512   ;;  %v3444_v19 = vld [vmem:[%s4600_s1 + $0x8] sm:$0xff]  }
  0x2f   :  { %v84_v7 = vld [vmem:[%s4630_s30] sm:$0x1]  ;;  %277 = vmatprep.subr.bf16.mxu0 %v3440_v11  ;;  %v404_v17 = vsel %vm402_vm1, %v360_v15, 0  ;;  %v3445_v20 = vld [vmem:[%s4600_s1 + $0x10] sm:$0xff]   ;;  %v3446_v21 = vld [vmem:[%s4600_s1 + $0x18] sm:$0xff]   ;;  %v3912_v41 = vshrl.u32 %v99_v40, 7 }
  0x30   :  { %196 = vmatpush1.bf16.msra.mxu1 %v3430_v5  ;;  %v3443_v18 = vld [vmem:[%s4600_s1] sm:$0xff]   ;;  %v3451_v26 = vld [vmem:[#allocation3 + $0x90] ss:$8 sps:$4 sm:$0xff]   ;;  %vm1008_vm4 = vcmask 1042432   ;;  %vm1009_vm5 = vcmask 1046532   ;;  %vm1492_vm13 = vcmask 1041408  }
  0x31   :  { %234 = vmatprep.subr.bf16.mxu1 %v3433_v6  ;;  %v3447_v22 = vld [vmem:[%s4600_s1 + $0x20] sm:$0xff]   ;;  %v3457_v30 = vld [vmem:[#allocation3 + $0xb0] ss:$8 sps:$4 sm:$0xff]   ;;  %4631 = vst [vmem:[#allocation9_spill] sm:$0xff] %v3912_v41  ;;  %v3915_v42 = vsub.s32 0, %v3912_v41  ;;  %v3921_v44 = vsub.s32 1, %v3912_v41  ;;  %vm3971_vm10 = vmor %vm1008_vm4, %vm1009_vm5 }
  0x32   :  { %278 = vmatpush1.bf16.msra.mxu0 %v3442_v13  ;;  %v3450_v23 = vld [vmem:[#allocation3 + $0x84] ss:$8 sps:$4 sm:$0xff]   ;;  %v3448_v24 = vld [vmem:[#allocation3 + $0x80] ss:$8 sps:$4 sm:$0xff]   ;;  %v3453_v25 = vld [vmem:[#allocation3 + $0x94] ss:$8 sps:$4 sm:$0xff]  }
  0x33   :  { %2923 = vmatmul.mubr.msk.bf16.vlgmr.msra.gmra.mrb[0].mxu1 %vm189_vm0, %v84_v7  ;;  %774 = vmatprep.subr.bf16.mxu0 %v3450_v23  ;;  %v3456_v27 = vld [vmem:[#allocation3 + $0xa4] ss:$8 sps:$4 sm:$0xff]   ;;  %v3454_v28 = vld [vmem:[#allocation3 + $0xa0] ss:$8 sps:$4 sm:$0xff]   ;;  %v3459_v29 = vld [vmem:[#allocation3 + $0xb4] ss:$8 sps:$4 sm:$0xff]  }
  0x34   :  { %235 = vmatpush1.bf16.msra.mxu1 %v3431_v8  ;;  %266 = vmatprep.mubr.bf16.mxu1 %v4624_v1  ;;  %v3462_v31 = vld [vmem:[#allocation3 + $0xc4] ss:$8 sps:$4 sm:$0xff]   ;;  %v3460_v32 = vld [vmem:[#allocation3 + $0xc0] ss:$8 sps:$4 sm:$0xff]   ;;  %v3465_v33 = vld [vmem:[#allocation3 + $0xd4] ss:$8 sps:$4 sm:$0xff]  }
  0x35   :  { %236 = vmatprep.subr.bf16.mxu1 %v3436_v12  ;;  %2925 = vmatmul.mubr.msk.bf16.vlgmr.msra.gmra.mrb[0].mxu0 %vm189_vm0, %v84_v7  ;;  %v3463_v34 = vld [vmem:[#allocation3 + $0xd0] ss:$8 sps:$4 sm:$0xff]   ;;  %v3468_v35 = vld [vmem:[#allocation3 + $0xe4] ss:$8 sps:$4 sm:$0xff]   ;;  %v3466_v36 = vld [vmem:[#allocation3 + $0xe0] ss:$8 sps:$4 sm:$0xff]  }
  0x36   :  { %806 = vmatprep.mubr.bf16.mxu0 %v4624_v1  ;;  %775 = vmatpush1.bf16.msra.mxu0 %v3448_v24  ;;  %v3471_v37 = vld [vmem:[#allocation3 + $0xf4] ss:$8 sps:$4 sm:$0xff]   ;;  %v3469_v38 = vld [vmem:[#allocation3 + $0xf0] ss:$8 sps:$4 sm:$0xff]   ;;  %v3474_v39 = vld [vmem:[#allocation3 + $0x4] ss:$8 sps:$4 sm:$0xff]  }
  0x37   :  { %776 = vmatprep.subr.bf16.mxu0 %v3453_v25  ;;  %v97_v43 = vld [vmem:[%s4602_s3] sm:$0x3f]  ;;  %v117_v47 = vsub.s32 4, %v3912_v41  ;;  %v121_v49 = vsub.s32 5, %v3912_v41  ;;  %v109_v58 = vsub.s32 2, %v3912_v41  ;;  %v113_v60 = vsub.s32 3, %v3912_v41 }
  0x38   :  { %237 = vmatpush1.bf16.msra.mxu1 %v3434_v14  ;;  %v102_v45 = vrot.slane %v97_v43, %v3915_v42  ;;  %v106_v46 = vrot.slane %v97_v43, %v3921_v44  ;;  %v3932_v14 = vld [vmem:[%s4604_s5] ss:$0 sm:$0xff]  ;;  %vm571_vm6 = vsmask.f32 3328  ;;  %vm572_vm7 = vsmask.f32 7440 }
  0x39   :  { %3310 = vmatprep.subr.bf16.mxu1 %v4616_v16  ;;  %v118_v56 = vrot.slane %v97_v43, %v117_v47  ;;  %v122_v59 = vrot.slane %v97_v43, %v121_v49  ;;  %v110_v0 = vrot.slane %v97_v43, %v109_v58  ;;  %v114_v5 = vrot.slane %v97_v43, %v113_v60  ;;  %vm3986_vm11 = vmor %vm571_vm6, %vm572_vm7  ;;  %v3493_v41 = vld [vmem:[#allocation3 + $0x70] ss:$8 sps:$4 sm:$0xff]  }
  0x3a   :  { %777 = vmatpush1.bf16.msra.mxu0 %v3451_v26  ;;  %vm1238_vm8 = vsmask.f32 2304  ;;  %vm1239_vm9 = vsmask.f32 6416  ;;  %vm1493_vm14 = vcmask 1045508   ;;  %vm2659_vm1 = vcmask 1041409  }
  0x3b   :  { %2924 = vmatmul.mubr.msk.bf16.vlgmr.msra.gmra.mrb[4].mxu1 %vm189_vm0, %v84_v7  ;;  %778 = vmatprep.subr.bf16.mxu0 %v3456_v27  ;;  %vm4000_vm12 = vmor %vm1238_vm8, %vm1239_vm9 }
  0x3c   :  { %3311 = vmatpush3.bf16.msra.mxu1 %v404_v17  ;;  %3312 = vmatprep.mubr.msk.bf16.mxu1 %vm3724_vm2, %v4616_v16  ;;  %vm4204_vm15 = vmor %vm1492_vm13, %vm1493_vm14 }
  0x3e   :  { %779 = vmatpush1.bf16.msra.mxu0 %v3454_v28 }
  0x3f   :  { %780 = vmatprep.subr.bf16.mxu0 %v3459_v29 }
  0x42   :  { %781 = vmatpush1.bf16.msra.mxu0 %v3457_v30 }
  0x43   :  { %3313 = vmatmul.mubr.msk.bf16.vlgmr.msra.gmra.mrb[8].mxu1 %vm386_vm3, %v3443_v18  ;;  %782 = vmatprep.subr.bf16.mxu0 %v3462_v31 }
  0x44   :  { %3316 = vmatprep.mubr.msk.bf16.mxu1 %vm3724_vm2, %v4616_v16 }
  0x46   :  { %783 = vmatpush1.bf16.msra.mxu0 %v3460_v32 }
  0x47   :  { %784 = vmatprep.subr.bf16.mxu0 %v3465_v33 }
  0x4a   :  { %785 = vmatpush1.bf16.msra.mxu0 %v3463_v34 }
  0x4b   :  { %3317 = vmatmul.mubr.msk.bf16.gmra.mrb[12].mxu1 %vm386_vm3, %v3444_v19  ;;  %786 = vmatprep.subr.bf16.mxu0 %v3468_v35 }
  0x4c   :  { %3320 = vmatprep.mubr.msk.bf16.mxu1 %vm3724_vm2, %v4616_v16 }
  0x4e   :  { %787 = vmatpush1.bf16.msra.mxu0 %v3466_v36 }
  0x4f   :  { %788 = vmatprep.subr.bf16.mxu0 %v3471_v37 }
  0x52   :  { %789 = vmatpush1.bf16.msra.mxu0 %v3469_v38 }
  0x53   :  { %3321 = vmatmul.mubr.msk.bf16.gmra.mrb[16].mxu1 %vm386_vm3, %v3445_v20  ;;  %935 = vmatprep.subr.bf16.mxu0 %v3474_v39  ;;  %v3937_v20 = vld [vmem:[%s4605_s6] ss:$0 sm:$0xff] }
  0x54   :  { %3324 = vmatprep.mubr.msk.bf16.mxu1 %vm3724_vm2, %v4616_v16 }
  0x5b   :  { %3325 = vmatmul.mubr.msk.bf16.gmra.mrb[20].mxu1 %vm386_vm3, %v3446_v21 }
  0x5c   :  { %3328 = vmatprep.mubr.msk.bf16.mxu1 %vm3724_vm2, %v4616_v16 }
  0x63   :  { %3329 = vmatmul.mubr.msk.bf16.gmra.mrb[24].mxu1 %vm386_vm3, %v3447_v22 }
 0x106   :  { %v227_v48 = vpop.f32.mrb[0].mxu1 }
 0x107   :  { %v228_v50 = vadd.f32 %v227_v48, %v102_v45  ;;  %v229_v51 = vpop.f32.mrb[1].mxu1 }
 0x108   :  { %v230_v52 = vadd.f32 %v229_v51, %v106_v46  ;;  %v231_v53 = vpop.f32.mrb[2].mxu1  ;;  %v309_v61 = vpop.f32.mrb[0].mxu0 }
 0x109   :  { %v2926_v54 = vmul.f32 -1.442695, %v228_v50  ;;  %v232_v55 = vpop.f32.mrb[3].mxu1  ;;  %v310_v62 = vadd.f32 %v309_v61, %v118_v56  ;;  %v311_v63 = vpop.f32.mrb[1].mxu0 }
 0x10a   :  { %v2927_v57 = vmul.f32 -1.442695, %v230_v52  ;;  %v312_v3 = vadd.f32 %v311_v63, %v122_v59  ;;  %v313_v4 = vpop.f32.mrb[2].mxu0 }
 0x10b   :  { %3640 = vpow2.f32 %v2926_v54  ;;  %v2928_v7 = vmul.f32 -1.442695, %v310_v62  ;;  %v314_v8 = vpop.f32.mrb[3].mxu0 }
 0x10c   :  { %3642 = vpow2.f32 %v2927_v57  ;;  %v2929_v10 = vmul.f32 -1.442695, %v312_v3 }
 0x10d   :  { %3644 = vpow2.f32 %v2928_v7 }
 0x10e   :  { %v268_v2 = vpop.f32.mrb[4].mxu1  ;;  %3646 = vpow2.f32 %v2929_v10 }
 0x10f   :  { %v270_v6 = vpop.f32.mrb[5].mxu1  ;;  %v269_v12 = vadd.f32 %v268_v2, %v110_v0 }
 0x110   :  { %v272_v9 = vpop.f32.mrb[6].mxu1  ;;  %v271_v13 = vadd.f32 %v270_v6, %v114_v5  ;;  %v3600_v5 = vld [vmem:[#allocation5 + $0x140] sm:$0xff]  }
 0x111   :  { %v273_v11 = vpop.f32.mrb[7].mxu1  ;;  %3648 = vtanh.f32 %v269_v12 }
 0x112   :  { %3650 = vtanh.f32 %v271_v13 }
 0x115   :  { %v3641_v15 = vpop.eup %3640 }
 0x116   :  { %v3643_v17 = vpop.eup %3642  ;;  %v322_v18 = vadd.f32 1.0, %v3641_v15  ;;  %v440_v19 = vpop.f32.mrb[8].mxu1 }
 0x117   :  { %v323_v21 = vadd.f32 1.0, %v3643_v17  ;;  %v486_v22 = vmul.f32 %v3932_v14, %v440_v19  ;;  %v3314_v23 = vpop.f32.mrb[9].mxu1  ;;  %v3645_v30 = vpop.eup %3644 }
 0x118   :  { %3652 = vrcp.f32 %v322_v18  ;;  %v443_v24 = vpop.f32.mrb[10].mxu1  ;;  %v3647_v33 = vpop.eup %3646  ;;  %v336_v34 = vadd.f32 1.0, %v3645_v30  ;;  %v4634_v18 = vmov 0 }
 0x119   :  { %3654 = vrcp.f32 %v323_v21  ;;  %v503_v25 = vadd.f32 %v3937_v20, %v486_v22  ;;  %v487_v26 = vmul.f32 %v3932_v14, %v443_v24  ;;  %v3315_v27 = vpop.f32.mrb[11].mxu1  ;;  %v337_v36 = vadd.f32 1.0, %v3647_v33 }
 0x11a   :  { %3656 = vrcp.f32 %v336_v34  ;;  %v4635_v18 = vsel %vm3986_vm11, 4294967295, %v4634_v18 }
 0x11b   :  { %v3942_v28 = vmax.f32 %v503_v25, 0.0  ;;  %v504_v29 = vadd.f32 %v3937_v20, %v487_v26  ;;  %v3649_v43 = vpop.eup %3648  ;;  %3658 = vrcp.f32 %v337_v36  ;;  %4636 = vst [vmem:[#allocation10_spill] sm:$0xff] %v4635_v18  ;;  %v4646_v18 = vmov 0   ;;  %v3573_v26 = vld [vmem:[#allocation5 + $0x90] sm:$0xff]  }
 0x11c   :  { %v3651_v49 = vpop.eup %3650 }
 0x11d   :  { %v3947_v31 = vpack.c.bf16 %v3942_v28, %v3942_v28  ;;  %v3949_v32 = vmax.f32 %v504_v29, 0.0 }
 0x11e   :  { %v448_v35 = vpop.f32.mrb[12].mxu1 }
 0x11f   :  { %v575_v37 = vshrl.u32 %v3947_v31, 16  ;;  %v578_v38 = vshll.u32 %v3947_v31, 16  ;;  %v2988_v39 = vrot.slane %v3947_v31, 9  ;;  %v3318_v40 = vpop.f32.mrb[13].mxu1  ;;  %v3959_v47 = vpack.c.bf16 %v3949_v32, %v3949_v32 }
 0x120   :  { %v451_v48 = vpop.f32.mrb[14].mxu1  ;;  %v488_v62 = vmul.f32 %v3932_v14, %v448_v35 }
 0x121   :  { %v577_v50 = vrot.slane %v575_v37, 4  ;;  %v580_v51 = vrot.slane %v578_v38, 5  ;;  %v1241_v52 = vrot.slane %v575_v37, 5  ;;  %v3319_v53 = vpop.f32.mrb[15].mxu1  ;;  %v1242_v55 = vrot.slane %v578_v38, 6 }
 0x122   :  { %v3653_v54 = vpop.eup %3652  ;;  %v584_v56 = vshll.u32 %v3959_v47, 16  ;;  %v588_v57 = vshrl.u32 %v3959_v47, 16  ;;  %v1013_v58 = vrot.slane %v3959_v47, 5  ;;  %v4618_v61 = vrot.slane %v3959_v47, 6 }
 0x123   :  { %v3655_v59 = vpop.eup %3654  ;;  %v342_v60 = vmul.f32 %v3653_v54, %v3649_v43  ;;  %v489_v63 = vmul.f32 %v3932_v14, %v451_v48  ;;  %v1243_v2 = vor.u32 %v1242_v55, %v1241_v52  ;;  %v505_v9 = vadd.f32 %v3937_v20, %v488_v62 }
 0x124   :  { %v343_v0 = vmul.f32 %v3655_v59, %v3651_v49  ;;  %v590_v3 = vrot.slane %v588_v57, 4  ;;  %v3967_v4 = vrot.slane %v1013_v58, 4  ;;  %v1245_v6 = vrot.slane %v588_v57, 5  ;;  %v4009_v36 = vpop.eup %3656 }
 0x125   :  { %3660 = vtanh.f32 %v342_v60  ;;  %v1246_v7 = vrot.slane %v584_v56, 6  ;;  %v3977_v8 = vrot.slane %v4618_v61, 4  ;;  %v506_v10 = vadd.f32 %v3937_v20, %v489_v63  ;;  %v4023_v43 = vpop.eup %3658 }
 0x126   :  { %3662 = vtanh.f32 %v343_v0  ;;  %v456_v11 = vpop.f32.mrb[16].mxu1  ;;  %v581_v12 = vor.u32 %v580_v51, %v577_v50  ;;  %v586_v19 = vrot.slane %v584_v56, 5  ;;  %v3992_v21 = vsel %vm3971_vm10, %v2988_v39, %v1013_v58 }
 0x127   :  { %v3981_v13 = vor.u32 %v1246_v7, %v1245_v6  ;;  %v490_v15 = vmul.f32 %v3932_v14, %v456_v11  ;;  %v3322_v17 = vpop.f32.mrb[17].mxu1  ;;  %v3994_v22 = vmax.f32 %v505_v9, 0.0  ;;  %v3996_v23 = vmax.f32 %v506_v10, 0.0 }
 0x128   :  { %v459_v24 = vpop.f32.mrb[18].mxu1  ;;  %v582_v25 = vrot.slane %v581_v12, 4  ;;  %v4004_v27 = vrot.slane %v1243_v2, 4  ;;  %v591_v34 = vor.u32 %v590_v3, %v586_v19 }
 0x129   :  { %v507_v29 = vadd.f32 %v3937_v20, %v490_v15  ;;  %v491_v30 = vmul.f32 %v3932_v14, %v459_v24  ;;  %v3323_v33 = vpop.f32.mrb[19].mxu1  ;;  %v1249_v35 = vrot.slane %v3981_v13, 4  ;;  %v4013_v37 = vpack.c.bf16 %v3994_v22, %v3994_v22 }
 0x12a   :  { %v4017_v38 = vpack.c.bf16 %v3996_v23, %v3996_v23  ;;  %v587_v39 = vsel %vm3986_vm11, %v582_v25, %v586_v19  ;;  %v592_v50 = vrot.slane %v591_v34, 4  ;;  %v1248_v51 = vsel %vm4000_vm12, %v4004_v27, %v3981_v13 }
 0x12b   :  { %v517_v48 = vmax.f32 %v507_v29, 0.0  ;;  %v508_v49 = vadd.f32 %v3937_v20, %v491_v30  ;;  %v594_v52 = vshll.u32 %v4013_v37, 16  ;;  %v598_v53 = vshrl.u32 %v4013_v37, 16 }
 0x12c   :  { %v1016_v54 = vrot.slane %v4013_v37, 5  ;;  %v608_v56 = vshrl.u32 %v4017_v38, 16  ;;  %v604_v59 = vshll.u32 %v4017_v38, 16 }
 0x12d   :  { %v4035_v57 = vpack.c.bf16 %v517_v48, %v517_v48  ;;  %v518_v58 = vmax.f32 %v508_v49, 0.0  ;;  %v1250_v60 = vrot.slane %v598_v53, 5  ;;  %v1251_v62 = vrot.slane %v594_v52, 6  ;;  %v3472_v49 = vld [vmem:[#allocation3] ss:$8 sps:$4 sm:$0xff]  }
 0x12e   :  { %v464_v63 = vpop.f32.mrb[20].mxu1  ;;  %v596_v0 = vrot.slane %v594_v52, 5  ;;  %v600_v2 = vrot.slane %v598_v53, 4  ;;  %v606_v11 = vrot.slane %v604_v59, 5  ;;  %v610_v25 = vrot.slane %v608_v56, 4 }
 0x12f   :  { %v4038_v3 = vpop.eup %3660  ;;  %v525_v6 = vpack.c.bf16 %v518_v58, %v517_v48  ;;  %v4040_v7 = vpack.c.bf16 %v518_v58, %v518_v58  ;;  %v492_v9 = vmul.f32 %v3932_v14, %v464_v63  ;;  %v3326_v10 = vpop.f32.mrb[21].mxu1  ;;  %v4047_v15 = vor.u32 %v1251_v62, %v1250_v60  ;;  %v3477_v60 = vld [vmem:[#allocation3 + $0x14] ss:$8 sps:$4 sm:$0xff]  }
 0x130   :  { %v4045_v12 = vpop.eup %3662  ;;  %v597_v17 = vsel %vm3986_vm11, %v592_v50, %v596_v0  ;;  %v467_v19 = vpop.f32.mrb[22].mxu1  ;;  %v601_v24 = vor.u32 %v600_v2, %v596_v0  ;;  %v611_v50 = vor.u32 %v610_v25, %v606_v11  ;;  %v614_v63 = vshll.u32 %v4035_v57, 16  ;;  %v3480_v25 = vld [vmem:[#allocation3 + $0x24] ss:$8 sps:$4 sm:$0xff]  }
 0x131   :  { %v4053_v29 = vunpack.c.h.b16 %v525_v6  ;;  %v619_v30 = vshrl.u32 %v4040_v7, 16  ;;  %v622_v33 = vshll.u32 %v4040_v7, 16  ;;  %v509_v34 = vadd.f32 %v3937_v20, %v492_v9  ;;  %v3327_v48 = vpop.f32.mrb[23].mxu1 }
 0x132   :  { %v2952_v52 = vcombine.low %v587_v39, %v597_v17  ;;  %v493_v53 = vmul.f32 %v3932_v14, %v467_v19  ;;  %v602_v58 = vrot.slane %v601_v24, 4  ;;  %v612_v9 = vrot.slane %v611_v50, 4  ;;  %v3475_v24 = vld [vmem:[#allocation3 + $0x10] ss:$8 sps:$4 sm:$0xff]  }
 0x133   :  { %v519_v62 = vmax.f32 %v509_v34, 0.0  ;;  %v621_v0 = vrot.slane %v619_v30, 4  ;;  %v624_v2 = vrot.slane %v622_v33, 5  ;;  %v4070_v10 = vsel %vm3971_vm10, %v3967_v4, %v1016_v54 }
 0x134   :  { %807 = vmatmul.mubr.bf16.vlgmr.msra.gmra.mrb[4].mxu0 %v2952_v52  ;;  %v510_v6 = vadd.f32 %v3937_v20, %v493_v53  ;;  %v607_v39 = vsel %vm3986_vm11, %v602_v58, %v606_v11  ;;  %v616_v19 = vrot.slane %v614_v63, 5  ;;  %v1018_v53 = vrot.slane %v1016_v54, 4 }
 0x135   :  { %v4072_v17 = vpack.c.bf16 %v519_v62, %v519_v62  ;;  %936 = vmatpush1.bf16.msra.mxu0 %v3472_v49  ;;  %816 = vmatprep.mubr.bf16.mxu0 %v4624_v1  ;;  %v625_v34 = vor.u32 %v624_v2, %v621_v0  ;;  %v1019_v4 = vrot.slane %v4017_v38, 5  ;;  %v1022_v58 = vrot.slane %v4035_v57, 5 }
 0x136   :  { %v520_v48 = vmax.f32 %v510_v6, 0.0  ;;  %v472_v52 = vpop.f32.mrb[24].mxu1  ;;  %937 = vmatprep.subr.bf16.mxu0 %v3477_v60  ;;  %v617_v16 = vsel %vm3986_vm11, %v612_v9, %v616_v19  ;;  %v1263_v13 = vrot.slane %v614_v63, 6 }
 0x137   :  { %v632_v49 = vshrl.u32 %v4072_v17, 16  ;;  %v494_v50 = vmul.f32 %v3932_v14, %v472_v52  ;;  %v3330_v40 = vpop.f32.mrb[25].mxu1  ;;  %v626_v0 = vrot.slane %v625_v34, 4  ;;  %v2953_v6 = vcombine.low %v607_v39, %v617_v16  ;;  %v3478_v52 = vld [vmem:[#allocation3 + $0x20] ss:$8 sps:$4 sm:$0xff]  }
 0x138   :  { %v4085_v2 = vpack.c.bf16 %v520_v48, %v519_v62  ;;  %v4087_v11 = vpack.c.bf16 %v520_v48, %v520_v48  ;;  %v475_v60 = vpop.f32.mrb[26].mxu1  ;;  %v4619_v54 = vshll.u32 %v4072_v17, 16  ;;  %v4096_v40 = vsel %vm3971_vm10, %v1018_v53, %v1019_v4  ;;  %v3483_v16 = vld [vmem:[#allocation3 + $0x34] ss:$8 sps:$4 sm:$0xff]  }
 0x139   :  { %v511_v46 = vadd.f32 %v3937_v20, %v494_v50  ;;  %938 = vmatpush1.bf16.msra.mxu0 %v3475_v24  ;;  %v495_v55 = vmul.f32 %v3932_v14, %v475_v60  ;;  %v3331_v45 = vpop.f32.mrb[27].mxu1  ;;  %v634_v9 = vrot.slane %v632_v49, 4  ;;  %v1021_v48 = vrot.slane %v1019_v4, 4 }
 0x13a   :  { %v4621_v62 = vshrl.u32 %v4087_v11, 16  ;;  %939 = vmatprep.subr.bf16.mxu0 %v3480_v25  ;;  %v630_v39 = vrot.slane %v4619_v54, 5  ;;  %v4620_v19 = vshll.u32 %v4087_v11, 16  ;;  %v539_v14 = vunpack.c.l.b16 %v4085_v2 }
 0x13b   :  { %v521_v45 = vmax.f32 %v511_v46, 0.0  ;;  %v512_v24 = vadd.f32 %v3937_v20, %v495_v55  ;;  %v540_v34 = vunpack.c.h.b16 %v4085_v2  ;;  %v3481_v46 = vld [vmem:[#allocation3 + $0x30] ss:$8 sps:$4 sm:$0xff]   ;;  %v4119_v55 = vsel %vm3971_vm10, %v1021_v48, %v1022_v58 }
 0x13c   :  { %817 = vmatmul.mubr.bf16.gmra.mrb[8].mxu0 %v2953_v6  ;;  %v631_v53 = vsel %vm3986_vm11, %v626_v0, %v630_v39  ;;  %v635_v50 = vor.u32 %v634_v9, %v630_v39  ;;  %v640_v25 = vrot.slane %v4620_v19, 5  ;;  %v644_v60 = vrot.slane %v4621_v62, 4  ;;  %v3486_v0 = vld [vmem:[#allocation3 + $0x44] ss:$8 sps:$4 sm:$0xff]   ;;  %v3484_v6 = vld [vmem:[#allocation3 + $0x40] ss:$8 sps:$4 sm:$0xff]  }
 0x13d   :  { %v4111_v61 = vpack.c.bf16 %v521_v45, %v521_v45  ;;  %v522_v54 = vmax.f32 %v512_v24, 0.0  ;;  %940 = vmatpush1.bf16.msra.mxu0 %v3478_v52  ;;  %826 = vmatprep.mubr.bf16.mxu0 %v4624_v1  ;;  %v4115_v20 = vpack.c.b16 %v539_v14, %v4053_v29  ;;  %v2989_v9 = vrot.slane %v4040_v7, 9  ;;  %v3489_v19 = vld [vmem:[#allocation3 + $0x54] ss:$8 sps:$4 sm:$0xff]  }
 0x13e   :  { %941 = vmatprep.subr.bf16.mxu0 %v3483_v16  ;;  %v636_v4 = vrot.slane %v635_v50, 4  ;;  %v645_v2 = vor.u32 %v644_v60, %v640_v25  ;;  %v1026_v14 = vrot.slane %v4072_v17, 5  ;;  %v1029_v48 = vrot.slane %v4087_v11, 5 }
 0x13f   :  { %v4623_v52 = vshrl.u32 %v4111_v61, 16  ;;  %v527_v39 = vpack.c.bf16 %v522_v54, %v521_v45  ;;  %v4125_v24 = vpack.c.bf16 %v522_v54, %v522_v54  ;;  %v4622_v29 = vshll.u32 %v4111_v61, 16 }
 0x140   :  { %v641_v58 = vsel %vm3986_vm11, %v636_v4, %v640_v25  ;;  %v646_v16 = vrot.slane %v645_v2, 4  ;;  %v4139_v25 = vsel %vm3971_vm10, %v2989_v9, %v1026_v14  ;;  %v1028_v4 = vrot.slane %v1026_v14, 4  ;;  %v3569_v14 = vld [vmem:[#allocation5 + $0x80] sm:$0xff]  }
 0x141   :  { %v541_v50 = vunpack.c.l.b16 %v527_v39  ;;  %942 = vmatpush1.bf16.msra.mxu0 %v3481_v46  ;;  %v2954_v60 = vcombine.low %v631_v53, %v641_v58  ;;  %v650_v54 = vrot.slane %v4622_v29, 5  ;;  %v654_v45 = vrot.slane %v4623_v52, 4 }
 0x142   :  { %943 = vmatprep.subr.bf16.mxu0 %v3486_v0  ;;  %v658_v62 = vshll.u32 %v4125_v24, 16  ;;  %v1031_v2 = vrot.slane %v1029_v48, 4  ;;  %v1032_v58 = vrot.slane %v4111_v61, 5  ;;  %v4148_v0 = vsel %vm3971_vm10, %v1028_v4, %v1029_v48 }
 0x143   :  { %v651_v53 = vsel %vm3986_vm11, %v646_v16, %v650_v54  ;;  %v655_v46 = vor.u32 %v654_v45, %v650_v54  ;;  %v4143_v39 = vpack.c.b16 %v541_v50, %v540_v34  ;;  %v1035_v52 = vrot.slane %v4125_v24, 5  ;;  %v3487_v16 = vld [vmem:[#allocation3 + $0x50] ss:$8 sps:$4 sm:$0xff]  }
 0x144   :  { %827 = vmatmul.mubr.bf16.gmra.mrb[12].mxu0 %v2954_v60  ;;  %v660_v29 = vrot.slane %v658_v62, 5  ;;  %v1253_v9 = vsel %vm4000_vm12, %v1249_v35, %v4047_v15  ;;  %v4161_v48 = vsel %vm3971_vm10, %v1031_v2, %v1032_v58  ;;  %v1034_v50 = vrot.slane %v1032_v58, 4  ;;  %v3492_v60 = vld [vmem:[#allocation3 + $0x64] ss:$8 sps:$4 sm:$0xff]  }
 0x145   :  { %944 = vmatpush1.bf16.msra.mxu0 %v3484_v6  ;;  %836 = vmatprep.mubr.bf16.mxu0 %v4624_v1  ;;  %v656_v34 = vrot.slane %v655_v46, 4  ;;  %v4168_v35 = vcombine.low %v1248_v51, %v1253_v9  ;;  %v1254_v6 = vrot.slane %v4047_v15, 4  ;;  %v1255_v54 = vrot.slane %v608_v56, 5  ;;  %v3490_v15 = vld [vmem:[#allocation3 + $0x60] ss:$8 sps:$4 sm:$0xff]  }
 0x146   :  { %945 = vmatprep.subr.bf16.mxu0 %v3489_v19  ;;  %v1256_v45 = vrot.slane %v604_v59, 6  ;;  %v4179_v19 = vsel %vm3971_vm10, %v1034_v50, %v1035_v52  ;;  %v1260_v2 = vshrl.u32 %v4035_v57, 16  ;;  %v1266_v59 = vrot.slane %v619_v30, 5  ;;  %v3568_v51 = vld [vmem:[#allocation5 + $0xc0] sm:$0xff]   ;;  %v3570_v1 = vld [vmem:[#allocation5 + $0xc8] sm:$0xff]  }
 0x147   :  { %v661_v4 = vsel %vm3986_vm11, %v656_v34, %v660_v29  ;;  %v1267_v52 = vrot.slane %v622_v33, 6  ;;  %v1270_v46 = vrot.slane %v632_v49, 5  ;;  %v4639_v58 = vshll.u32 %v4072_v17, 16  ;;  %3177 = vmatprep.subr.bf16.mxu1 %v3568_v51  ;;  %v3510_v33 = vld [vmem:[#allocation3 + $0x144] ss:$8 sps:$4 sm:$0xff]  }
 0x148   :  { %v2955_v27 = vcombine.low %v651_v53, %v661_v4  ;;  %v1257_v56 = vor.u32 %v1256_v45, %v1255_v54  ;;  %v1262_v29 = vrot.slane %v1260_v2, 5  ;;  %v3495_v53 = vld [vmem:[#allocation3 + $0x74] ss:$8 sps:$4 sm:$0xff]   ;;  %v4640_v30 = vshrl.u32 %v4087_v11, 16  ;;  %3178 = vmatpush3.bf16.msra.mxu1 %v3569_v14 }
 0x149   :  { %946 = vmatpush1.bf16.msra.mxu0 %v3487_v16  ;;  %v1271_v63 = vrot.slane %v4639_v58, 6  ;;  %v4641_v50 = vshll.u32 %v4087_v11, 16  ;;  %v4644_v4 = vshrl.u32 %v4111_v61, 16  ;;  %3179 = vmatprep.subr.bf16.mxu1 %v3570_v1  ;;  %v1506_v14 = vrot.slane %v4035_v57, 6 }
 0x14a   :  { %947 = vmatprep.subr.bf16.mxu0 %v3492_v60  ;;  %v4196_v9 = vsel %vm4000_vm12, %v1254_v6, %v1257_v56  ;;  %v1259_v34 = vrot.slane %v1257_v56, 4  ;;  %v1275_v16 = vrot.slane %v4640_v30, 5  ;;  %v1264_v49 = vor.u32 %v1263_v13, %v1262_v29 }
 0x14b   :  { %v1276_v54 = vrot.slane %v4641_v50, 6  ;;  %v1268_v60 = vor.u32 %v1267_v52, %v1266_v59  ;;  %v1272_v45 = vor.u32 %v1271_v63, %v1270_v46  ;;  %v1280_v6 = vrot.slane %v4644_v4, 5  ;;  %v3498_v46 = vld [vmem:[#allocation3 + $0x104] ss:$8 sps:$4 sm:$0xff]  }
 0x14c   :  { %837 = vmatmul.mubr.bf16.gmra.mrb[16].mxu0 %v2955_v27  ;;  %v4645_v56 = vshll.u32 %v4111_v61, 16  ;;  %v1285_v30 = vshrl.u32 %v4125_v24, 16  ;;  %v1288_v50 = vrot.slane %v658_v62, 6  ;;  %v4216_v13 = vsel %vm4000_vm12, %v1259_v34, %v1264_v49  ;;  %v3571_v4 = vld [vmem:[#allocation5 + $0x88] sm:$0xff]  }
 0x14d   :  { %v1277_v2 = vor.u32 %v1276_v54, %v1275_v16  ;;  %948 = vmatpush1.bf16.msra.mxu0 %v3490_v15  ;;  %967 = vmatprep.mubr.bf16.mxu0 %v4646_v18  ;;  %v1269_v59 = vrot.slane %v1268_v60, 4  ;;  %v1274_v27 = vrot.slane %v1272_v45, 4  ;;  %v4647_v29 = vrot.slane %v3959_v47, 6 }
 0x14e   :  { %v1281_v58 = vrot.slane %v4645_v56, 6  ;;  %v4648_v52 = vrot.slane %v3947_v31, 10  ;;  %949 = vmatprep.subr.bf16.mxu0 %v3495_v53  ;;  %v3011_v15 = vcombine.low %v4196_v9, %v4216_v13  ;;  %v1287_v54 = vrot.slane %v1285_v30, 5  ;;  %v3572_v56 = vld [vmem:[#allocation5 + $0xd0] sm:$0xff]   ;;  %3180 = vmatpush3.bf16.msra.mxu1 %v3571_v4  ;;  %v3508_v4 = vld [vmem:[#allocation3 + $0x140] ss:$8 sps:$4 sm:$0xff]  }
 0x14f   :  { %v1279_v63 = vrot.slane %v1277_v2, 4  ;;  %v1273_v34 = vsel %vm4000_vm12, %v1269_v59, %v1272_v45  ;;  %v1278_v47 = vsel %vm4000_vm12, %v1274_v27, %v1277_v2  ;;  %v4649_v31 = vrot.slane %v4013_v37, 6  ;;  %v3501_v59 = vld [vmem:[#allocation3 + $0x114] ss:$8 sps:$4 sm:$0xff]   ;;  %3181 = vmatprep.subr.bf16.mxu1 %v3572_v56  ;;  %v3516_v56 = vld [vmem:[#allocation3 + $0x164] ss:$8 sps:$4 sm:$0xff]  }
 0x150   :  { %v4224_v62 = vsel %vm4204_vm15, %v4648_v52, %v4647_v29  ;;  %v1282_v16 = vor.u32 %v1281_v58, %v1280_v6  ;;  %v4241_v6 = vcombine.low %v1273_v34, %v1278_v47  ;;  %v1289_v2 = vor.u32 %v1288_v50, %v1287_v54  ;;  %v3496_v58 = vld [vmem:[#allocation3 + $0x100] ss:$8 sps:$4 sm:$0xff]   ;;  %v3567_v13 = vld [vmem:[#allocation3 + $0x274] ss:$8 sps:$4 sm:$0xff]  }
 0x151   :  { %v4237_v53 = vsel %vm4204_vm15, %v3977_v8, %v4649_v31  ;;  %v4650_v49 = vmov %v4649_v31  ;;  %950 = vmatpush1.bf16.msra.mxu0 %v3493_v41  ;;  %v1503_v37 = vrot.slane %v4017_v38, 6  ;;  %v3031_v30 = vrot.slane %v4040_v7, 10  ;;  %v3507_v31 = vld [vmem:[#allocation3 + $0x134] ss:$8 sps:$4 sm:$0xff]   ;;  %v3562_v9 = vld [vmem:[#allocation3 + $0x260] ss:$8 sps:$4 sm:$0xff]  }
 0x152   :  { %v1502_v60 = vrot.slane %v4650_v49, 4  ;;  %v4245_v51 = vsel %vm4000_vm12, %v1279_v63, %v1282_v16  ;;  %v1284_v45 = vrot.slane %v1282_v16, 4  ;;  %v3032_v8 = vcombine.low %v4224_v62, %v4237_v53  ;;  %1149 = vmatprep.subr.bf16.mxu0 %v3498_v46  ;;  %v3499_v63 = vld [vmem:[#allocation3 + $0x110] ss:$8 sps:$4 sm:$0xff]   ;;  %v3504_v16 = vld [vmem:[#allocation3 + $0x124] ss:$8 sps:$4 sm:$0xff]   ;;  %3182 = vmatpush3.bf16.msra.mxu1 %v3573_v26 }
 0x153   :  { %v1510_v1 = vrot.slane %v4072_v17, 6  ;;  %v1513_v41 = vrot.slane %v4087_v11, 6  ;;  %v1516_v50 = vrot.slane %v4111_v61, 6  ;;  %v1505_v57 = vrot.slane %v1503_v37, 4  ;;  %v3574_v62 = vld [vmem:[#allocation5 + $0xd8] sm:$0xff]  }
 0x154   :  { %v4254_v27 = vsel %vm4000_vm12, %v1284_v45, %v1289_v2  ;;  %v4263_v38 = vsel %vm4204_vm15, %v1502_v60, %v1503_v37  ;;  %v1519_v7 = vrot.slane %v4125_v24, 6  ;;  %v4651_v52 = vpack.c.bf16 %v3949_v32, %v3942_v28  ;;  %v3505_v60 = vld [vmem:[#allocation3 + $0x130] ss:$8 sps:$4 sm:$0xff]   ;;  %v3513_v45 = vld [vmem:[#allocation3 + $0x154] ss:$8 sps:$4 sm:$0xff]   ;;  %3183 = vmatprep.subr.bf16.mxu1 %v3574_v62 }
 0x155   :  { %v3013_v29 = vcombine.low %v4245_v51, %v4254_v27  ;;  %v4271_v17 = vsel %vm4204_vm15, %v3031_v30, %v1510_v1  ;;  %v1512_v61 = vrot.slane %v1510_v1, 4  ;;  %v1515_v11 = vrot.slane %v1513_v41, 4  ;;  %v3511_v2 = vld [vmem:[#allocation3 + $0x150] ss:$8 sps:$4 sm:$0xff]   ;;  %v3522_v37 = vld [vmem:[#allocation3 + $0x184] ss:$8 sps:$4 sm:$0xff]  }
 0x156   :  { %968 = vmatmul.mubr.bf16.vlgmr.msra.gmra.mrb[4].mxu0 %v4651_v52  ;;  %v1518_v46 = vrot.slane %v1516_v50, 4  ;;  %v4276_v24 = vsel %vm4204_vm15, %v1505_v57, %v1506_v14  ;;  %v4280_v28 = vmul.f32 %v4045_v12, %v4023_v43  ;;  %v4284_v32 = vmul.f32 %v4038_v3, %v4009_v36  ;;  %v3502_v12 = vld [vmem:[#allocation3 + $0x120] ss:$8 sps:$4 sm:$0xff]   ;;  %v3525_v14 = vld [vmem:[#allocation3 + $0x194] ss:$8 sps:$4 sm:$0xff]  }
 0x157   :  { %1150 = vmatpush1.bf16.msra.mxu0 %v3496_v58  ;;  %977 = vmatprep.mubr.bf16.mxu0 %v4646_v18  ;;  %v3033_v54 = vcombine.low %v4263_v38, %v4276_v24  ;;  %v4290_v34 = vsel %vm4204_vm15, %v1512_v61, %v1513_v41  ;;  %v4294_v47 = vsel %vm4204_vm15, %v1515_v11, %v1516_v50  ;;  %v3517_v58 = vld [vmem:[#allocation3 + $0x170] ss:$8 sps:$4 sm:$0xff]   ;;  %v3526_v1 = vld [vmem:[#allocation3 + $0x1a0] ss:$8 sps:$4 sm:$0xff]   ;;  %v3531_v41 = vld [vmem:[#allocation3 + $0x1b4] ss:$8 sps:$4 sm:$0xff]  }
 0x158   :  { %1151 = vmatprep.subr.bf16.mxu0 %v3501_v59  ;;  %v4298_v43 = vsel %vm4204_vm15, %v1518_v46, %v1519_v7  ;;  %v3034_v36 = vcombine.low %v4271_v17, %v4290_v34  ;;  %v4652_v49 = vpack.c.bf16 %v3996_v23, %v3994_v22  ;;  %v3514_v22 = vld [vmem:[#allocation3 + $0x160] ss:$8 sps:$4 sm:$0xff]   ;;  %v3519_v23 = vld [vmem:[#allocation3 + $0x174] ss:$8 sps:$4 sm:$0xff]   ;;  %v4653_v30 = vcombine.low %v3992_v21, %v4070_v10  ;;  %v3523_v59 = vld [vmem:[#allocation3 + $0x190] ss:$8 sps:$4 sm:$0xff]  }
 0x159   :  { %v3035_v3 = vcombine.low %v4294_v47, %v4298_v43  ;;  %v4654_v50 = vcombine.low %v4096_v40, %v4119_v55  ;;  %v3529_v57 = vld [vmem:[#allocation3 + $0x1b0] ss:$8 sps:$4 sm:$0xff]   ;;  %v3534_v21 = vld [vmem:[#allocation3 + $0x1c4] ss:$8 sps:$4 sm:$0xff]   ;;  %v3532_v10 = vld [vmem:[#allocation3 + $0x1c0] ss:$8 sps:$4 sm:$0xff]   ;;  %v4655_v26 = vcombine.low %v4139_v25, %v4148_v0  ;;  %v4656_v11 = vcombine.low %v4161_v48, %v4179_v19 }
 0x15a   :  { %v3537_v7 = vld [vmem:[#allocation3 + $0x1d4] ss:$8 sps:$4 sm:$0xff]   ;;  %v3535_v52 = vld [vmem:[#allocation3 + $0x1d0] ss:$8 sps:$4 sm:$0xff]   ;;  %v3540_v40 = vld [vmem:[#allocation3 + $0x1e4] ss:$8 sps:$4 sm:$0xff]  }
 0x15b   :  { %1152 = vmatpush1.bf16.msra.mxu0 %v3499_v63  ;;  %v3538_v55 = vld [vmem:[#allocation3 + $0x1e0] ss:$8 sps:$4 sm:$0xff]   ;;  %v3543_v61 = vld [vmem:[#allocation3 + $0x1f4] ss:$8 sps:$4 sm:$0xff]   ;;  %v3541_v46 = vld [vmem:[#allocation3 + $0x1f0] ss:$8 sps:$4 sm:$0xff]  }
 0x15c   :  { %1153 = vmatprep.subr.bf16.mxu0 %v3504_v16  ;;  %v3546_v25 = vld [vmem:[#allocation3 + $0x204] ss:$8 sps:$4 sm:$0xff]   ;;  %v3544_v0 = vld [vmem:[#allocation3 + $0x200] ss:$8 sps:$4 sm:$0xff]   ;;  %v3549_v63 = vld [vmem:[#allocation3 + $0x214] ss:$8 sps:$4 sm:$0xff]  }
 0x15d   :  { %v3547_v16 = vld [vmem:[#allocation3 + $0x210] ss:$8 sps:$4 sm:$0xff]   ;;  %v3550_v48 = vld [vmem:[#allocation3 + $0x220] ss:$8 sps:$4 sm:$0xff]   ;;  %v3555_v19 = vld [vmem:[#allocation3 + $0x234] ss:$8 sps:$4 sm:$0xff]  }
 0x15e   :  { %978 = vmatmul.mubr.bf16.gmra.mrb[8].mxu0 %v4652_v49  ;;  %v3556_v49 = vld [vmem:[#allocation3 + $0x240] ss:$8 sps:$4 sm:$0xff]   ;;  %v3575_v53 = vld [vmem:[#allocation5 + $0x98] sm:$0xff]   ;;  %v3581_v38 = vld [vmem:[#allocation5 + $0xb0] sm:$0xff]  }
 0x15f   :  { %1154 = vmatpush1.bf16.msra.mxu0 %v3502_v12  ;;  %987 = vmatprep.mubr.bf16.mxu0 %v4646_v18  ;;  %v3552_v12 = vld [vmem:[#allocation3 + $0x224] ss:$8 sps:$4 sm:$0xff]   ;;  %v3583_v17 = vld [vmem:[#allocation5 + $0xb8] sm:$0xff]  }
 0x160   :  { %1155 = vmatprep.subr.bf16.mxu0 %v3507_v31  ;;  %v3553_v31 = vld [vmem:[#allocation3 + $0x230] ss:$8 sps:$4 sm:$0xff]   ;;  %3184 = vmatpush3.bf16.msra.mxu1 %v3575_v53  ;;  %v3577_v51 = vld [vmem:[#allocation5 + $0xa0] sm:$0xff]   ;;  %v3579_v27 = vld [vmem:[#allocation5 + $0xa8] sm:$0xff]  }
 0x161   :  { %v3584_v24 = vld [vmem:[#allocation5 + $0x40] sm:$0xff]  }
 0x162   :  { %v554_v34 = vld [vmem:[%s4608_s9] sm:$0x3] }
 0x163   :  { %1156 = vmatpush1.bf16.msra.mxu0 %v3505_v60  ;;  %v3561_v60 = vld [vmem:[#allocation3 + $0x254] ss:$8 sps:$4 sm:$0xff]  }
 0x164   :  { %1157 = vmatprep.subr.bf16.mxu0 %v3510_v33  ;;  %v3559_v33 = vld [vmem:[#allocation3 + $0x250] ss:$8 sps:$4 sm:$0xff]  }
 0x166   :  { %988 = vmatmul.mubr.bf16.gmra.mrb[12].mxu0 %v4115_v20  ;;  %v3520_v20 = vld [vmem:[#allocation3 + $0x180] ss:$8 sps:$4 sm:$0xff]  }
 0x167   :  { %1158 = vmatpush1.bf16.msra.mxu0 %v3508_v4  ;;  %997 = vmatprep.mubr.bf16.mxu0 %v4646_v18  ;;  %v3564_v4 = vld [vmem:[#allocation3 + $0x264] ss:$8 sps:$4 sm:$0xff]  }
 0x168   :  { %1159 = vmatprep.subr.bf16.mxu0 %v3513_v45 }
 0x16b   :  { %1160 = vmatpush1.bf16.msra.mxu0 %v3511_v2 }
 0x16c   :  { %1161 = vmatprep.subr.bf16.mxu0 %v3516_v56 }
 0x16e   :  { %998 = vmatmul.mubr.bf16.gmra.mrb[16].mxu0 %v4143_v39  ;;  %v3528_v39 = vld [vmem:[#allocation3 + $0x1a4] ss:$8 sps:$4 sm:$0xff]  }
 0x16f   :  { %1162 = vmatpush1.bf16.msra.mxu0 %v3514_v22  ;;  %1181 = vmatprep.mubr.bf16.mxu0 %v4646_v18 }
 0x170   :  { %1163 = vmatprep.subr.bf16.mxu0 %v3519_v23 }
 0x173   :  { %1164 = vmatpush1.bf16.msra.mxu0 %v3517_v58 }
 0x174   :  { %1403 = vmatprep.subr.bf16.mxu0 %v3522_v37 }
 0x176   :  { %1182 = vmatmul.mubr.bf16.vlgmr.msra.gmra.mrb[4].mxu0 %v4653_v30 }
 0x177   :  { %1404 = vmatpush1.bf16.msra.mxu0 %v3520_v20  ;;  %1191 = vmatprep.mubr.bf16.mxu0 %v4646_v18 }
 0x178   :  { %1405 = vmatprep.subr.bf16.mxu0 %v3525_v14 }
 0x17b   :  { %1406 = vmatpush1.bf16.msra.mxu0 %v3523_v59 }
 0x17c   :  { %1407 = vmatprep.subr.bf16.mxu0 %v3528_v39 }
 0x17e   :  { %1192 = vmatmul.mubr.bf16.gmra.mrb[8].mxu0 %v4654_v50 }
 0x17f   :  { %1408 = vmatpush1.bf16.msra.mxu0 %v3526_v1  ;;  %1201 = vmatprep.mubr.bf16.mxu0 %v4646_v18 }
 0x180   :  { %1409 = vmatprep.subr.bf16.mxu0 %v3531_v41 }
 0x183   :  { %1410 = vmatpush1.bf16.msra.mxu0 %v3529_v57 }
 0x184   :  { %1411 = vmatprep.subr.bf16.mxu0 %v3534_v21 }
 0x186   :  { %1202 = vmatmul.mubr.bf16.gmra.mrb[12].mxu0 %v4655_v26 }
 0x187   :  { %1412 = vmatpush1.bf16.msra.mxu0 %v3532_v10  ;;  %1211 = vmatprep.mubr.bf16.mxu0 %v4646_v18 }
 0x188   :  { %1413 = vmatprep.subr.bf16.mxu0 %v3537_v7 }
 0x18b   :  { %1414 = vmatpush1.bf16.msra.mxu0 %v3535_v52 }
 0x18c   :  { %1415 = vmatprep.subr.bf16.mxu0 %v3540_v40 }
 0x18e   :  { %1212 = vmatmul.mubr.bf16.gmra.mrb[16].mxu0 %v4656_v11 }
 0x18f   :  { %1416 = vmatpush1.bf16.msra.mxu0 %v3538_v55  ;;  %1435 = vmatprep.mubr.bf16.mxu0 %v4646_v18 }
 0x190   :  { %1417 = vmatprep.subr.bf16.mxu0 %v3543_v61 }
 0x193   :  { %1418 = vmatpush1.bf16.msra.mxu0 %v3541_v46 }
 0x194   :  { %1633 = vmatprep.subr.bf16.mxu0 %v3546_v25 }
 0x196   :  { %1436 = vmatmul.mubr.bf16.vlgmr.msra.gmra.mrb[4].mxu0 %v4168_v35  ;;  %v3558_v35 = vld [vmem:[#allocation3 + $0x244] ss:$8 sps:$4 sm:$0xff]  }
 0x197   :  { %1634 = vmatpush1.bf16.msra.mxu0 %v3544_v0  ;;  %1445 = vmatprep.mubr.bf16.mxu0 %v4646_v18 }
 0x198   :  { %1635 = vmatprep.subr.bf16.mxu0 %v3549_v63 }
 0x19b   :  { %1636 = vmatpush1.bf16.msra.mxu0 %v3547_v16 }
 0x19c   :  { %1637 = vmatprep.subr.bf16.mxu0 %v3552_v12 }
 0x19e   :  { %1446 = vmatmul.mubr.bf16.gmra.mrb[8].mxu0 %v3011_v15  ;;  %v3565_v15 = vld [vmem:[#allocation3 + $0x270] ss:$8 sps:$4 sm:$0xff]  }
 0x19f   :  { %1638 = vmatpush1.bf16.msra.mxu0 %v3550_v48  ;;  %1455 = vmatprep.mubr.bf16.mxu0 %v4646_v18 }
 0x1a0   :  { %1639 = vmatprep.subr.bf16.mxu0 %v3555_v19 }
 0x1a3   :  { %1640 = vmatpush1.bf16.msra.mxu0 %v3553_v31 }
 0x1a4   :  { %1641 = vmatprep.subr.bf16.mxu0 %v3558_v35 }
 0x1a6   :  { %1456 = vmatmul.mubr.bf16.gmra.mrb[12].mxu0 %v4241_v6  ;;  %v3576_v6 = vld [vmem:[#allocation5 + $0xe0] sm:$0xff]  }
 0x1a7   :  { %1642 = vmatpush1.bf16.msra.mxu0 %v3556_v49  ;;  %1465 = vmatprep.mubr.bf16.mxu0 %v4646_v18 }
 0x1a8   :  { %1643 = vmatprep.subr.bf16.mxu0 %v3561_v60  ;;  %3185 = vmatprep.subr.bf16.mxu1 %v3576_v6 }
 0x1a9   :  { %3186 = vmatpush3.bf16.msra.mxu1 %v3577_v51 }
 0x1ab   :  { %1644 = vmatpush1.bf16.msra.mxu0 %v3559_v33 }
 0x1ac   :  { %1645 = vmatprep.subr.bf16.mxu0 %v3564_v4 }
 0x1ae   :  { %1466 = vmatmul.mubr.bf16.gmra.mrb[16].mxu0 %v3013_v29  ;;  %v3580_v29 = vld [vmem:[#allocation5 + $0xf0] sm:$0xff]  }
 0x1af   :  { %1646 = vmatpush1.bf16.msra.mxu0 %v3562_v9  ;;  %1665 = vmatprep.mubr.bf16.mxu0 %v4646_v18 }
 0x1b0   :  { %1647 = vmatprep.subr.bf16.mxu0 %v3567_v13 }
 0x1b3   :  { %1648 = vmatpush1.bf16.msra.mxu0 %v3565_v15 }
 0x1b6   :  { %1666 = vmatmul.mubr.bf16.vlgmr.msra.gmra.mrb[4].mxu0 %v3032_v8  ;;  %v3578_v8 = vld [vmem:[#allocation5 + $0xe8] sm:$0xff]  }
 0x1b7   :  { %1675 = vmatprep.mubr.bf16.mxu0 %v4646_v18  ;;  %3187 = vmatprep.subr.bf16.mxu1 %v3578_v8 }
 0x1b8   :  { %3188 = vmatpush3.bf16.msra.mxu1 %v3579_v27 }
 0x1b9   :  { %3189 = vmatprep.subr.bf16.mxu1 %v3580_v29 }
 0x1bc   :  { %3190 = vmatpush3.bf16.msra.mxu1 %v3581_v38 }
 0x1be   :  { %1676 = vmatmul.mubr.bf16.gmra.mrb[8].mxu0 %v3033_v54  ;;  %v553_v54 = vld [vmem:[%s4607_s8] sm:$0x3] }
 0x1bf   :  { %1685 = vmatprep.mubr.bf16.mxu0 %v4646_v18  ;;  %v4362_v47 = vrot.slane %v553_v54, %v3915_v42  ;;  %v4365_v43 = vrot.slane %v553_v54, %v3921_v44 }
 0x1c6   :  { %1686 = vmatmul.mubr.bf16.gmra.mrb[12].mxu0 %v3034_v36  ;;  %v4368_v36 = vrot.slane %v554_v34, %v3915_v42 }
 0x1c7   :  { %1695 = vmatprep.mubr.bf16.mxu0 %v4646_v18  ;;  %v3582_v18 = vld [vmem:[#allocation5 + $0xf8] sm:$0xff]  }
 0x1c8   :  { %3191 = vmatprep.subr.bf16.mxu1 %v3582_v18 }
 0x1c9   :  { %3192 = vmatpush3.bf16.msra.mxu1 %v3583_v17 }
 0x1ca   :  { %3211 = vmatprep.subr.bf16.mxu1 %v3584_v24 }
 0x1ce   :  { %1696 = vmatmul.mubr.bf16.gmra.mrb[16].mxu0 %v3035_v3  ;;  %v4371_v3 = vrot.slane %v554_v34, %v3921_v44  ;;  %v3596_v34 = vld [vmem:[#allocation5 + $0x70] sm:$0xff]  }
 0x289   :  { %v1667_v45 = vpop.f32.mrb[4].mxu0 }
 0x28a   :  { %v1733_v2 = vmul.f32 %v4362_v47, %v1667_v45  ;;  %v1669_v56 = vpop.f32.mrb[5].mxu0 }
 0x28b   :  { %v1734_v22 = vmul.f32 %v4365_v43, %v1669_v56  ;;  %v1671_v23 = vpop.f32.mrb[6].mxu0 }
 0x28c   :  { %v1760_v58 = vadd.f32 %v4368_v36, %v1733_v2  ;;  %v1735_v37 = vmul.f32 %v4362_v47, %v1671_v23  ;;  %v1673_v20 = vpop.f32.mrb[7].mxu0 }
 0x28d   :  { %v1761_v14 = vadd.f32 %v4371_v3, %v1734_v22  ;;  %v1736_v42 = vmul.f32 %v4365_v43, %v1673_v20 }
 0x28e   :  { %v1776_v30 = vmax.f32 %v1760_v58, 0.0  ;;  %v1762_v44 = vadd.f32 %v4368_v36, %v1735_v37 }
 0x28f   :  { %v1777_v59 = vmax.f32 %v1761_v14, 0.0  ;;  %v1763_v39 = vadd.f32 %v4371_v3, %v1736_v42 }
 0x290   :  { %v1778_v1 = vmax.f32 %v1762_v44, 0.0 }
 0x291   :  { %v3161_v41 = vpack.c.bf16 %v1777_v59, %v1776_v30  ;;  %v1779_v50 = vmax.f32 %v1763_v39, 0.0  ;;  %v1677_v57 = vpop.f32.mrb[8].mxu0 }
 0x292   :  { %v4381_v21 = vpack.c.bf16 %v1778_v1, %v1776_v30  ;;  %v1737_v10 = vmul.f32 %v4362_v47, %v1677_v57  ;;  %v1679_v7 = vpop.f32.mrb[9].mxu0 }
 0x293   :  { %v1867_v26 = vshrl.u32 %v3161_v41, 16  ;;  %v1870_v52 = vshll.u32 %v3161_v41, 16  ;;  %v3162_v40 = vpack.c.bf16 %v1779_v50, %v1778_v1  ;;  %v1738_v55 = vmul.f32 %v4365_v43, %v1679_v7  ;;  %v1681_v61 = vpop.f32.mrb[10].mxu0 }
 0x294   :  { %v1764_v11 = vadd.f32 %v4368_v36, %v1737_v10  ;;  %v1739_v46 = vmul.f32 %v4362_v47, %v1681_v61  ;;  %v1683_v25 = vpop.f32.mrb[11].mxu0  ;;  %v4387_v0 = vpack.c.bf16 %v1779_v50, %v1777_v59  ;;  %v3100_v63 = vrot.slane %v3161_v41, 9 }
 0x295   :  { %v1869_v16 = vrot.slane %v1867_v26, 4  ;;  %v1872_v12 = vrot.slane %v1870_v52, 5  ;;  %v1876_v48 = vshll.u32 %v3162_v40, 16  ;;  %v1880_v19 = vshrl.u32 %v3162_v40, 16 }
 0x296   :  { %v1780_v31 = vmax.f32 %v1764_v11, 0.0  ;;  %v4390_v35 = vadd.f32 %v4371_v3, %v1738_v55  ;;  %v1766_v49 = vadd.f32 %v4368_v36, %v1739_v46  ;;  %v1740_v60 = vmul.f32 %v4365_v43, %v1683_v25 }
 0x297   :  { %v1882_v33 = vrot.slane %v1880_v19, 4  ;;  %v1873_v4 = vor.u32 %v1872_v12, %v1869_v16  ;;  %v1878_v9 = vrot.slane %v1876_v48, 5  ;;  %v2310_v13 = vrot.slane %v3162_v40, 5  ;;  %v3585_v48 = vld [vmem:[#allocation5] sm:$0xff]  }
 0x298   :  { %v1781_v15 = vmax.f32 %v4390_v35, 0.0  ;;  %v1782_v62 = vmax.f32 %v1766_v49, 0.0  ;;  %v1767_v53 = vadd.f32 %v4371_v3, %v1740_v60 }
 0x299   :  { %v1687_v6 = vpop.f32.mrb[12].mxu0  ;;  %v1874_v51 = vrot.slane %v1873_v4, 4  ;;  %v4398_v8 = vsel %vm3971_vm10, %v3100_v63, %v2310_v13  ;;  %v1883_v17 = vor.u32 %v1882_v33, %v1878_v9  ;;  %v2312_v39 = vrot.slane %v2310_v13, 4 }
 0x29a   :  { %v3163_v27 = vpack.c.bf16 %v1781_v15, %v1780_v31  ;;  %v1783_v29 = vmax.f32 %v1767_v53, 0.0  ;;  %v1741_v38 = vmul.f32 %v4362_v47, %v1687_v6  ;;  %v1689_v18 = vpop.f32.mrb[13].mxu0 }
 0x29b   :  { %v1742_v24 = vmul.f32 %v4365_v43, %v1689_v18  ;;  %v1691_v54 = vpop.f32.mrb[14].mxu0  ;;  %v1879_v45 = vsel %vm3986_vm11, %v1874_v51, %v1878_v9  ;;  %v1884_v59 = vrot.slane %v1883_v17, 4  ;;  %v3586_v9 = vld [vmem:[#allocation5 + $0x48] sm:$0xff]  }
 0x29c   :  { %v1886_v2 = vshll.u32 %v3163_v27, 16  ;;  %v1890_v56 = vshrl.u32 %v3163_v27, 16  ;;  %v4406_v22 = vpack.c.bf16 %v1783_v29, %v1782_v62  ;;  %v1768_v23 = vadd.f32 %v4368_v36, %v1741_v38  ;;  %v1693_v58 = vpop.f32.mrb[15].mxu0 }
 0x29d   :  { %v1769_v37 = vadd.f32 %v4371_v3, %v1742_v24  ;;  %v1743_v20 = vmul.f32 %v4362_v47, %v1691_v54  ;;  %v1744_v14 = vmul.f32 %v4365_v43, %v1693_v58  ;;  %v2313_v42 = vrot.slane %v3163_v27, 5 }
 0x29e   :  { %v1892_v30 = vrot.slane %v1890_v56, 4  ;;  %v1784_v44 = vmax.f32 %v1768_v23, 0.0  ;;  %v1888_v57 = vrot.slane %v1886_v2, 5  ;;  %v1896_v10 = vshll.u32 %v4406_v22, 16  ;;  %v3587_v2 = vld [vmem:[#allocation5 + $0x8] sm:$0xff]   ;;  %v3588_v23 = vld [vmem:[#allocation5 + $0x50] sm:$0xff]  }
 0x29f   :  { %v1785_v1 = vmax.f32 %v1769_v37, 0.0  ;;  %v1770_v41 = vadd.f32 %v4368_v36, %v1743_v20  ;;  %v1771_v50 = vadd.f32 %v4371_v3, %v1744_v14  ;;  %v2316_v7 = vrot.slane %v4406_v22, 5 }
 0x2a0   :  { %v4416_v26 = vpack.c.bf16 %v1784_v44, %v1780_v31  ;;  %v4420_v52 = vsel %vm3971_vm10, %v2312_v39, %v2313_v42  ;;  %v1889_v46 = vsel %vm3986_vm11, %v1884_v59, %v1888_v57  ;;  %v1893_v19 = vor.u32 %v1892_v30, %v1888_v57  ;;  %v3589_v39 = vld [vmem:[#allocation5 + $0x10] sm:$0xff]  }
 0x2a1   :  { %v4422_v40 = vpack.c.bf16 %v1785_v1, %v1784_v44  ;;  %v1786_v55 = vmax.f32 %v1770_v41, 0.0  ;;  %v1787_v61 = vmax.f32 %v1771_v50, 0.0  ;;  %v1697_v11 = vpop.f32.mrb[16].mxu0  ;;  %v3060_v16 = vcombine.low %v1879_v45, %v1889_v46 }
 0x2a2   :  { %v1745_v25 = vmul.f32 %v4362_v47, %v1697_v11  ;;  %v1699_v63 = vpop.f32.mrb[17].mxu0  ;;  %v3061_v12 = vcombine.high %v1879_v45, %v1889_v46  ;;  %v1898_v27 = vrot.slane %v1896_v10, 5  ;;  %v1894_v38 = vrot.slane %v1893_v19, 4  ;;  %v3590_v11 = vld [vmem:[#allocation5 + $0x58] sm:$0xff]  }
 0x2a3   :  { %v1901_v31 = vshrl.u32 %v4422_v40, 16  ;;  %v1904_v49 = vshll.u32 %v4422_v40, 16  ;;  %v4429_v60 = vpack.c.bf16 %v1786_v55, %v1784_v44  ;;  %v4431_v33 = vpack.c.bf16 %v1787_v61, %v1785_v1  ;;  %v1701_v4 = vpop.f32.mrb[18].mxu0 }
 0x2a4   :  { %v4433_v13 = vpack.c.bf16 %v1787_v61, %v1786_v55  ;;  %v1772_v62 = vadd.f32 %v4368_v36, %v1745_v25  ;;  %v1746_v53 = vmul.f32 %v4365_v43, %v1699_v63  ;;  %2118 = vmatprep.mubr.bf16.mxu1 %v3061_v12  ;;  %v1747_v6 = vmul.f32 %v4362_v47, %v1701_v4  ;;  %v1703_v51 = vpop.f32.mrb[19].mxu0 }
 0x2a5   :  { %2119 = vmatmul.mubr.bf16.vlgmr.msra.gmra.mrb[28].mxu1 %v3060_v16  ;;  %v1748_v29 = vmul.f32 %v4365_v43, %v1703_v51  ;;  %v2315_v18 = vrot.slane %v2313_v42, 4  ;;  %v1899_v43 = vsel %vm3986_vm11, %v1894_v38, %v1898_v27  ;;  %v1903_v58 = vrot.slane %v1901_v31, 4 }
 0x2a6   :  { %v1910_v17 = vshll.u32 %v4433_v13, 16  ;;  %v1914_v24 = vshrl.u32 %v4433_v13, 16  ;;  %v1788_v54 = vmax.f32 %v1772_v62, 0.0  ;;  %v1773_v45 = vadd.f32 %v4371_v3, %v1746_v53  ;;  %3212 = vmatpush3.bf16.msra.mxu1 %v3585_v48  ;;  %v3592_v53 = vld [vmem:[#allocation5 + $0x60] sm:$0xff]  }
 0x2a7   :  { %v1774_v56 = vadd.f32 %v4368_v36, %v1747_v6  ;;  %v1775_v47 = vadd.f32 %v4371_v3, %v1748_v29  ;;  %3213 = vmatprep.subr.bf16.mxu1 %v3586_v9  ;;  %v1906_v14 = vrot.slane %v1904_v49, 5  ;;  %v4448_v59 = vpack.c.bf16 %v1785_v1, %v1781_v15  ;;  %v3591_v9 = vld [vmem:[#allocation5 + $0x18] sm:$0xff]  }
 0x2a8   :  { %v1916_v37 = vrot.slane %v1914_v24, 4  ;;  %v1789_v20 = vmax.f32 %v1773_v45, 0.0  ;;  %v1912_v42 = vrot.slane %v1910_v17, 5  ;;  %v3102_v36 = vcombine.low %v4398_v8, %v4420_v52 }
 0x2a9   :  { %v1790_v30 = vmax.f32 %v1774_v56, 0.0  ;;  %v1791_v44 = vmax.f32 %v1775_v47, 0.0  ;;  %v1907_v41 = vor.u32 %v1906_v14, %v1903_v58  ;;  %v3103_v57 = vcombine.high %v4398_v8, %v4420_v52  ;;  %v3594_v47 = vld [vmem:[#allocation5 + $0x68] sm:$0xff]  }
 0x2aa   :  { %v3167_v3 = vpack.c.bf16 %v1789_v20, %v1788_v54  ;;  %3214 = vmatpush3.bf16.msra.mxu1 %v3587_v2  ;;  %v1917_v50 = vor.u32 %v1916_v37, %v1912_v42  ;;  %v4458_v35 = vsel %vm3971_vm10, %v2315_v18, %v2316_v7  ;;  %v1818_v15 = vunpack.c.h.b16 %v4429_v60  ;;  %v3617_v8 = vld [vmem:[%s4613_s14 + $0x8] sm:$0xff]   ;;  %v3618_v52 = vld [vmem:[%s4613_s14 + $0x10] sm:$0xff]  }
 0x2ab   :  { %v1798_v10 = vpack.c.bf16 %v1790_v30, %v1788_v54  ;;  %v1799_v55 = vpack.c.bf16 %v1791_v44, %v1789_v20  ;;  %v3168_v61 = vpack.c.bf16 %v1791_v44, %v1790_v30  ;;  %3215 = vmatprep.subr.bf16.mxu1 %v3588_v23  ;;  %v1908_v25 = vrot.slane %v1907_v41, 4  ;;  %v3597_v30 = vld [vmem:[#allocation5 + $0x30] sm:$0xff]   ;;  %v3598_v44 = vld [vmem:[#allocation5 + $0x78] sm:$0xff]   ;;  %v3602_v41 = vld [vmem:[#allocation5 + $0x148] sm:$0xff]  }
 0x2ac   :  { %v1920_v1 = vshll.u32 %v3167_v3, 16  ;;  %v1924_v46 = vshrl.u32 %v3167_v3, 16  ;;  %v1819_v63 = vunpack.c.h.b16 %v4431_v33  ;;  %v1918_v48 = vrot.slane %v1917_v50, 4  ;;  %v3603_v50 = vld [vmem:[#allocation5 + $0x108] sm:$0xff]  }
 0x2ad   :  { %v1820_v16 = vunpack.c.l.b16 %v1798_v10  ;;  %v1821_v12 = vunpack.c.l.b16 %v1799_v55  ;;  %v1930_v31 = vshll.u32 %v3168_v61, 16  ;;  %v1913_v22 = vsel %vm3986_vm11, %v1908_v25, %v1912_v42  ;;  %v3595_v42 = vld [vmem:[#allocation5 + $0x28] sm:$0xff]   ;;  %v3604_v10 = vld [vmem:[#allocation5 + $0x150] sm:$0xff]   ;;  %v3606_v55 = vld [vmem:[#allocation5 + $0x158] sm:$0xff]  }
 0x2ae   :  { %v1926_v19 = vrot.slane %v1924_v46, 4  ;;  %3216 = vmatpush3.bf16.msra.mxu1 %v3589_v39  ;;  %v1922_v49 = vrot.slane %v1920_v1, 5  ;;  %v3063_v4 = vcombine.high %v1899_v43, %v1913_v22  ;;  %v3062_v7 = vcombine.low %v1899_v43, %v1913_v22  ;;  %v3601_v39 = vld [vmem:[#allocation5 + $0x100] sm:$0xff]   ;;  %v3612_v1 = vld [vmem:[#allocation5 + $0x170] sm:$0xff]   ;;  %v3614_v46 = vld [vmem:[#allocation5 + $0x178] sm:$0xff]  }
 0x2af   :  { %3217 = vmatprep.subr.bf16.mxu1 %v3590_v11  ;;  %v2148_v60 = vpack.c.b16 %v1821_v12, %v1819_v63  ;;  %v3101_v62 = vrot.slane %v4422_v40, 9  ;;  %v2147_v51 = vpack.c.b16 %v1820_v16, %v1818_v15  ;;  %v2320_v27 = vrot.slane %v4433_v13, 5  ;;  %v3593_v40 = vld [vmem:[#allocation5 + $0x20] sm:$0xff]   ;;  %v3615_v25 = vld [vmem:[#allocation5 + $0x138] sm:$0xff]  }
 0x2b0   :  { %v1923_v33 = vsel %vm3986_vm11, %v1918_v48, %v1922_v49  ;;  %v1927_v6 = vor.u32 %v1926_v19, %v1922_v49  ;;  %v2326_v29 = vrot.slane %v3168_v61, 5  ;;  %2126 = vmatprep.mubr.bf16.mxu1 %v3063_v4  ;;  %v2323_v38 = vrot.slane %v3167_v3, 5  ;;  %v3599_v3 = vld [vmem:[#allocation5 + $0x38] sm:$0xff]   ;;  %v3608_v11 = vld [vmem:[#allocation5 + $0x160] sm:$0xff]   ;;  %v3622_v49 = vld [vmem:[%s4613_s14 + $0x30] sm:$0xff]  }
 0x2b1   :  { %v1932_v18 = vrot.slane %v1930_v31, 5  ;;  %2127 = vmatmul.mubr.bf16.gmra.mrb[32].mxu1 %v3062_v7  ;;  %v4470_v24 = vsel %vm3971_vm10, %v3101_v62, %v2320_v27  ;;  %v2322_v54 = vrot.slane %v2320_v27, 4  ;;  %v3607_v61 = vld [vmem:[#allocation5 + $0x118] sm:$0xff]   ;;  %v3609_v15 = vld [vmem:[#allocation5 + $0x120] sm:$0xff]   ;;  %v4658_v63 = vmov 0.0  }
 0x2b2   :  { %v1928_v17 = vrot.slane %v1927_v6, 4  ;;  %3218 = vmatpush3.bf16.msra.mxu1 %v3591_v9  ;;  %v3105_v45 = vcombine.high %v4458_v35, %v4470_v24  ;;  %v3104_v2 = vcombine.low %v4458_v35, %v4470_v24  ;;  %v2325_v13 = vrot.slane %v2323_v38, 4  ;;  %v3620_v35 = vld [vmem:[%s4613_s14 + $0x20] sm:$0xff]   ;;  %v3621_v16 = vld [vmem:[%s4613_s14 + $0x28] sm:$0xff]   ;;  %v3623_v7 = vld [vmem:[%s4613_s14 + $0x38] sm:$0xff]  }
 0x2b3   :  { %3219 = vmatprep.subr.bf16.mxu1 %v3592_v53  ;;  %v4480_v23 = vsel %vm3971_vm10, %v2322_v54, %v2323_v38  ;;  %v3624_v9 = vld [vmem:[%s4612_s13 + $0x40] sm:$0xff]  }
 0x2b4   :  { %v1933_v56 = vsel %vm3986_vm11, %v1928_v17, %v1932_v18  ;;  %v2327_v37 = vsel %vm3971_vm10, %v2325_v13, %v2326_v29 }
 0x2b5   :  { %v3065_v43 = vcombine.high %v1923_v33, %v1933_v56  ;;  %v3064_v58 = vcombine.low %v1923_v33, %v1933_v56  ;;  %v3107_v20 = vcombine.high %v4480_v23, %v2327_v37  ;;  %v3106_v14 = vcombine.low %v4480_v23, %v2327_v37 }
 0x2b6   :  { %3220 = vmatpush3.bf16.msra.mxu1 %v3593_v40 }
 0x2b7   :  { %2134 = vmatprep.mubr.bf16.mxu1 %v3065_v43  ;;  %3221 = vmatprep.subr.bf16.mxu1 %v3594_v47 }
 0x2b9   :  { %2135 = vmatmul.mubr.bf16.gmra.mrb[36].mxu1 %v3064_v58 }
 0x2ba   :  { %3222 = vmatpush3.bf16.msra.mxu1 %v3595_v42  ;;  %2283 = vmatprep.mubr.bf16.mxu1 %v4387_v0  ;;  %v3605_v0 = vld [vmem:[#allocation5 + $0x110] sm:$0xff]  }
 0x2bb   :  { %3223 = vmatprep.subr.bf16.mxu1 %v3596_v34 }
 0x2be   :  { %3224 = vmatpush3.bf16.msra.mxu1 %v3597_v30 }
 0x2bf   :  { %3225 = vmatprep.subr.bf16.mxu1 %v3598_v44 }
 0x2c2   :  { %3226 = vmatpush3.bf16.msra.mxu1 %v3599_v3 }
 0x2c3   :  { %3245 = vmatprep.subr.bf16.mxu1 %v3600_v5 }
 0x2c5   :  { %2284 = vmatmul.mubr.bf16.vlgmr.msra.gmra.mrb[40].mxu1 %v4381_v21  ;;  %v3610_v21 = vld [vmem:[#allocation5 + $0x168] sm:$0xff]  }
 0x2c6   :  { %2291 = vmatprep.mubr.bf16.mxu1 %v4448_v59  ;;  %3246 = vmatpush3.bf16.msra.mxu1 %v3601_v39  ;;  %v3611_v59 = vld [vmem:[#allocation5 + $0x128] sm:$0xff]  }
 0x2c7   :  { %3247 = vmatprep.subr.bf16.mxu1 %v3602_v41 }
 0x2ca   :  { %3248 = vmatpush3.bf16.msra.mxu1 %v3603_v50 }
 0x2cb   :  { %3249 = vmatprep.subr.bf16.mxu1 %v3604_v10 }
 0x2cd   :  { %2292 = vmatmul.mubr.bf16.gmra.mrb[44].mxu1 %v4416_v26  ;;  %v3613_v26 = vld [vmem:[#allocation5 + $0x130] sm:$0xff]  }
 0x2ce   :  { %2299 = vmatprep.mubr.bf16.mxu1 %v2148_v60  ;;  %3250 = vmatpush3.bf16.msra.mxu1 %v3605_v0 }
 0x2cf   :  { %3251 = vmatprep.subr.bf16.mxu1 %v3606_v55 }
 0x2d2   :  { %3252 = vmatpush3.bf16.msra.mxu1 %v3607_v61 }
 0x2d3   :  { %3253 = vmatprep.subr.bf16.mxu1 %v3608_v11 }
 0x2d5   :  { %2300 = vmatmul.mubr.bf16.gmra.mrb[48].mxu1 %v2147_v51 }
 0x2d6   :  { %3254 = vmatpush3.bf16.msra.mxu1 %v3609_v15  ;;  %2512 = vmatprep.mubr.bf16.mxu1 %v3103_v57  ;;  %v3616_v57 = vld [vmem:[%s4613_s14] sm:$0xff]  }
 0x2d7   :  { %3255 = vmatprep.subr.bf16.mxu1 %v3610_v21  ;;  %v3124_v21 = vld [vmem:[%s4610_s11] ss:$0 sm:$0xff] }
 0x2da   :  { %3256 = vmatpush3.bf16.msra.mxu1 %v3611_v59 }
 0x2db   :  { %3257 = vmatprep.subr.bf16.mxu1 %v3612_v1 }
 0x2de   :  { %3258 = vmatpush3.bf16.msra.mxu1 %v3613_v26 }
 0x2df   :  { %3259 = vmatprep.subr.bf16.mxu1 %v3614_v46  ;;  %v3125_v46 = vld [vmem:[%s4611_s12] ss:$0 sm:$0xff] }
 0x2e2   :  { %3260 = vmatpush3.bf16.msra.mxu1 %v3615_v25 }
 0x2e3   :  { %3332 = vmatprep.subr.bf16.mxu1 %v4658_v63 }
 0x2e5   :  { %2513 = vmatmul.mubr.bf16.vlgmr.msra.gmra.mrb[52].mxu1 %v3102_v36  ;;  %v3619_v36 = vld [vmem:[%s4613_s14 + $0x18] sm:$0xff]  }
 0x2e6   :  { %2520 = vmatprep.mubr.bf16.mxu1 %v3105_v45  ;;  %3333 = vmatpush3.bf16.msra.mxu1 %v3616_v57 }
 0x2e7   :  { %3334 = vmatprep.subr.bf16.mxu1 %v4658_v63 }
 0x2ea   :  { %3335 = vmatpush3.bf16.msra.mxu1 %v3617_v8 }
 0x2eb   :  { %3336 = vmatprep.subr.bf16.mxu1 %v4658_v63 }
 0x2ed   :  { %2521 = vmatmul.mubr.bf16.gmra.mrb[56].mxu1 %v3104_v2 }
 0x2ee   :  { %2528 = vmatprep.mubr.bf16.mxu1 %v3107_v20  ;;  %3337 = vmatpush3.bf16.msra.mxu1 %v3618_v52 }
 0x2ef   :  { %3338 = vmatprep.subr.bf16.mxu1 %v4658_v63 }
 0x2f2   :  { %3339 = vmatpush3.bf16.msra.mxu1 %v3619_v36 }
 0x2f3   :  { %3340 = vmatprep.subr.bf16.mxu1 %v4658_v63 }
 0x2f5   :  { %2529 = vmatmul.mubr.bf16.gmra.mrb[60].mxu1 %v3106_v14 }
 0x2f6   :  { %3348 = vmatprep.mubr.msk.bf16.mxu1 %vm3724_vm2, %v4658_v63  ;;  %3341 = vmatpush3.bf16.msra.mxu1 %v3620_v35  ;;  %vm2903_vm2 = vcmask 1024  }
 0x2f7   :  { %3342 = vmatprep.subr.bf16.mxu1 %v4658_v63 }
 0x2fa   :  { %3343 = vmatpush3.bf16.msra.mxu1 %v3621_v16  ;;  %v4659_v16 = vld [vmem:[#allocation9_spill] sm:$0xff] }
 0x2fb   :  { %3344 = vmatprep.subr.bf16.mxu1 %v4658_v63 }
 0x2fe   :  { %3345 = vmatpush3.bf16.msra.mxu1 %v3622_v49 }
 0x2ff   :  { %3346 = vmatprep.subr.bf16.mxu1 %v4658_v63 }
 0x302   :  { %3347 = vmatpush3.bf16.msra.mxu1 %v3623_v7 }
 0x303   :  { %3288 = vmatprep.subr.bf16.mxu1 %v3624_v9 }
 0x378   :  { %v3193_v12 = vpop.f32.mrb[28].mxu1 }
 0x379   :  { %v3194_v48 = vpop.f32.mrb[29].mxu1 }
 0x37a   :  { %v3195_v19 = vadd.f32 %v3194_v48, %v3193_v12  ;;  %v3196_v31 = vpop.f32.mrb[30].mxu1  ;;  %v2576_v12 = vadd.s32 16, %v4659_v16  ;;  %v349_v16 = vpack.c.bf16 %v4280_v28, %v4280_v28  ;;  %v3630_v28 = vld [vmem:[%s4612_s13 + $0x58] sm:$0xff]  }
 0x37b   :  { %v3197_v22 = vpop.f32.mrb[31].mxu1 }
 0x37c   :  { %v3198_v4 = vadd.f32 %v3197_v22, %v3196_v31  ;;  %vm2579_vm0 = vcmp.lt.s32.totalorder %v2576_v12, 19  ;;  %v3627_v12 = vld [vmem:[%s4612_s13 + $0x8] sm:$0xff]  }
 0x384   :  { %v3199_v60 = vpop.f32.mrb[32].mxu1 }
 0x385   :  { %v3200_v62 = vpop.f32.mrb[33].mxu1 }
 0x386   :  { %v3201_v53 = vadd.f32 %v3200_v62, %v3199_v60  ;;  %v3202_v33 = vpop.f32.mrb[34].mxu1 }
 0x387   :  { %v3203_v6 = vpop.f32.mrb[35].mxu1 }
 0x388   :  { %v3204_v51 = vadd.f32 %v3203_v6, %v3202_v33 }
 0x38c   :  { %v3205_v27 = vpop.f32.mrb[36].mxu1 }
 0x38d   :  { %v3206_v29 = vpop.f32.mrb[37].mxu1 }
 0x38e   :  { %v3207_v38 = vadd.f32 %v3206_v29, %v3205_v27  ;;  %v3208_v18 = vpop.f32.mrb[38].mxu1 }
 0x38f   :  { %v3209_v17 = vpop.f32.mrb[39].mxu1 }
 0x390   :  { %v3210_v24 = vadd.f32 %v3209_v17, %v3208_v18 }
 0x398   :  { %v3227_v54 = vpop.f32.mrb[40].mxu1 }
 0x399   :  { %v3228_v40 = vpop.f32.mrb[41].mxu1 }
 0x39a   :  { %v3229_v45 = vadd.f32 %v3228_v40, %v3227_v54  ;;  %v3230_v2 = vpop.f32.mrb[42].mxu1 }
 0x39b   :  { %v3231_v13 = vpop.f32.mrb[43].mxu1 }
 0x39c   :  { %v2286_v56 = vadd.f32 %v3229_v45, %v3195_v19  ;;  %v3232_v47 = vadd.f32 %v3231_v13, %v3230_v2 }
 0x39e   :  { %v2289_v23 = vadd.f32 %v3232_v47, %v3198_v4 }
 0x3a0   :  { %v3233_v43 = vpop.f32.mrb[44].mxu1 }
 0x3a1   :  { %v3234_v58 = vpop.f32.mrb[45].mxu1 }
 0x3a2   :  { %v3235_v37 = vadd.f32 %v3234_v58, %v3233_v43  ;;  %v3236_v20 = vpop.f32.mrb[46].mxu1 }
 0x3a3   :  { %v3237_v14 = vpop.f32.mrb[47].mxu1 }
 0x3a4   :  { %v2294_v42 = vadd.f32 %v3235_v37, %v3201_v53  ;;  %v3238_v34 = vadd.f32 %v3237_v14, %v3236_v20 }
 0x3a6   :  { %v2297_v30 = vadd.f32 %v3238_v34, %v3204_v51 }
 0x3a8   :  { %v3239_v44 = vpop.f32.mrb[48].mxu1 }
 0x3a9   :  { %v3240_v3 = vpop.f32.mrb[49].mxu1 }
 0x3aa   :  { %v3241_v5 = vadd.f32 %v3240_v3, %v3239_v44  ;;  %v3242_v39 = vpop.f32.mrb[50].mxu1 }
 0x3ab   :  { %v3243_v41 = vpop.f32.mrb[51].mxu1 }
 0x3ac   :  { %v2302_v50 = vadd.f32 %v3241_v5, %v3207_v38  ;;  %v3244_v10 = vadd.f32 %v3243_v41, %v3242_v39  ;;  %v2582_v38 = vsel %vm2579_vm0, 0.05263158, %v4658_v63 }
 0x3ae   :  { %v2305_v0 = vadd.f32 %v3244_v10, %v3210_v24 }
 0x3b8   :  { %v3261_v55 = vpop.f32.mrb[52].mxu1 }
 0x3b9   :  { %v3262_v61 = vpop.f32.mrb[53].mxu1 }
 0x3ba   :  { %v3263_v11 = vadd.f32 %v3262_v61, %v3261_v55  ;;  %v3264_v15 = vpop.f32.mrb[54].mxu1 }
 0x3bb   :  { %v3265_v59 = vpop.f32.mrb[55].mxu1 }
 0x3bc   :  { %v2537_v1 = vadd.f32 %v3263_v11, %v2286_v56  ;;  %v3266_v26 = vadd.f32 %v3265_v59, %v3264_v15 }
 0x3be   :  { %v2549_v25 = vmul.f32 %v3124_v21, %v2537_v1  ;;  %v2538_v57 = vadd.f32 %v3266_v26, %v2289_v23 }
 0x3c0   :  { %v2561_v8 = vadd.f32 %v3125_v46, %v2549_v25  ;;  %v2550_v52 = vmul.f32 %v3124_v21, %v2538_v57  ;;  %v3267_v36 = vpop.f32.mrb[56].mxu1 }
 0x3c1   :  { %v3268_v35 = vpop.f32.mrb[57].mxu1 }
 0x3c2   :  { %v2567_v48 = vmax.f32 %v2561_v8, 0.0  ;;  %v2562_v19 = vadd.f32 %v3125_v46, %v2550_v52  ;;  %v3269_v31 = vadd.f32 %v3268_v35, %v3267_v36  ;;  %v3270_v22 = vpop.f32.mrb[58].mxu1  ;;  %v3625_v52 = vld [vmem:[%s4612_s13] sm:$0xff]   ;;  %v3626_v35 = vld [vmem:[%s4612_s13 + $0x48] sm:$0xff]  }
 0x3c3   :  { %v3271_v49 = vpop.f32.mrb[59].mxu1 }
 0x3c4   :  { %v2568_v4 = vmax.f32 %v2562_v19, 0.0  ;;  %v2539_v7 = vadd.f32 %v3269_v31, %v2294_v42  ;;  %v3272_v9 = vadd.f32 %v3271_v49, %v3270_v22  ;;  %v2583_v60 = vmul.f32 0.05263158, %v2567_v48  ;;  %v3628_v48 = vld [vmem:[%s4612_s13 + $0x50] sm:$0xff]   ;;  %v3631_v31 = vld [vmem:[%s4612_s13 + $0x18] sm:$0xff]   ;;  %v3632_v22 = vld [vmem:[%s4612_s13 + $0x60] sm:$0xff]  }
 0x3c5   :  { %v3629_v19 = vld [vmem:[%s4612_s13 + $0x10] sm:$0xff]   ;;  %v3633_v49 = vld [vmem:[%s4612_s13 + $0x20] sm:$0xff]  }
 0x3c6   :  { %v2584_v62 = vmul.f32 0.05263158, %v2568_v4  ;;  %v2551_v53 = vmul.f32 %v3124_v21, %v2539_v7  ;;  %v2540_v33 = vadd.f32 %v3272_v9, %v2297_v30  ;;  %v3634_v4 = vld [vmem:[%s4612_s13 + $0x68] sm:$0xff]   ;;  %v3636_v9 = vld [vmem:[%s4612_s13 + $0x70] sm:$0xff]  }
 0x3c7   :  { %v3635_v7 = vld [vmem:[%s4612_s13 + $0x28] sm:$0xff]  }
 0x3c8   :  { %v2589_v6 = vadd.f32 %v2584_v62, %v2583_v60  ;;  %v2563_v51 = vadd.f32 %v3125_v46, %v2551_v53  ;;  %v2552_v27 = vmul.f32 %v3124_v21, %v2540_v33  ;;  %v3273_v29 = vpop.f32.mrb[60].mxu1  ;;  %v3637_v60 = vld [vmem:[%s4612_s13 + $0x30] sm:$0xff]   ;;  %v3638_v62 = vld [vmem:[%s4612_s13 + $0x78] sm:$0xff]   ;;  %v348_v33 = vpack.c.bf16 %v4284_v32, %v4284_v32 }
 0x3c9   :  { %v3274_v18 = vpop.f32.mrb[61].mxu1  ;;  %v3639_v53 = vld [vmem:[%s4612_s13 + $0x38] sm:$0xff]  }
 0x3ca   :  { %v2569_v17 = vmax.f32 %v2563_v51, 0.0  ;;  %v3275_v24 = vadd.f32 %v3274_v18, %v3273_v29  ;;  %v3276_v54 = vpop.f32.mrb[62].mxu1  ;;  %v2564_v2 = vadd.f32 %v3125_v46, %v2552_v27 }
 0x3cb   :  { %v3277_v40 = vpop.f32.mrb[63].mxu1 }
 0x3cc   :  { %v2585_v45 = vmul.f32 %v2582_v38, %v2569_v17  ;;  %v2541_v13 = vadd.f32 %v3275_v24, %v2302_v50  ;;  %v3278_v56 = vadd.f32 %v3277_v40, %v3276_v54  ;;  %v2570_v37 = vmax.f32 %v2564_v2, 0.0  ;;  %v3150_v54 = vld [vmem:[#allocation2] ss:$0 sm:$0xff] }
 0x3ce   :  { %v2590_v47 = vadd.f32 %v2589_v6, %v2585_v45  ;;  %v2553_v23 = vmul.f32 %v3124_v21, %v2541_v13  ;;  %v2542_v43 = vadd.f32 %v3278_v56, %v2305_v0  ;;  %v2586_v44 = vmul.f32 0.05263158, %v2570_v37 }
 0x3d0   :  { %v2591_v58 = vrot.slane %v2590_v47, 4  ;;  %v2565_v20 = vadd.f32 %v3125_v46, %v2553_v23  ;;  %v2554_v14 = vmul.f32 %v3124_v21, %v2542_v43 }
 0x3d2   :  { %v2592_v42 = vadd.f32 %v2591_v58, %v2590_v47  ;;  %v2571_v34 = vmax.f32 %v2565_v20, 0.0  ;;  %v2566_v30 = vadd.f32 %v3125_v46, %v2554_v14 }
 0x3d4   :  { %v2593_v63 = vrot.slane %v2592_v42, 2  ;;  %v2587_v3 = vmul.f32 0.05263158, %v2571_v34  ;;  %v2572_v5 = vmax.f32 %v2566_v30, 0.0 }
 0x3d6   :  { %v2597_v39 = vadd.f32 %v2587_v3, %v2586_v44  ;;  %v2588_v41 = vmul.f32 %v2582_v38, %v2572_v5  ;;  %v2594_v10 = vadd.f32 %v2593_v63, %v2592_v42 }
 0x3d8   :  { %v2598_v55 = vadd.f32 %v2597_v39, %v2588_v41  ;;  %v2595_v61 = vrot.slane %v2594_v10, 1 }
 0x3da   :  { %v2599_v50 = vrot.slane %v2598_v55, 4  ;;  %v2596_v0 = vadd.f32 %v2595_v61, %v2594_v10 }
 0x3dc   :  { %v2600_v11 = vadd.f32 %v2599_v50, %v2598_v55  ;;  %v2605_v21 = vpack.c.bf16 %v2596_v0, %v2596_v0 }
 0x3de   :  { %v2601_v15 = vrot.slane %v2600_v11, 2  ;;  %v2657_v46 = vunpack.c.l.b16 %v2605_v21 }
 0x3e0   :  { %v2602_v59 = vadd.f32 %v2601_v15, %v2600_v11 }
 0x3e2   :  { %v2603_v1 = vrot.slane %v2602_v59, 1 }
 0x3e4   :  { %v2604_v26 = vadd.f32 %v2603_v1, %v2602_v59 }
 0x3e6   :  { %v2606_v25 = vpack.c.bf16 %v2604_v26, %v2604_v26 }
 0x3e8   :  { %v2658_v57 = vunpack.c.l.b16 %v2606_v25 }
 0x3ea   :  { %v2660_v8 = vsel %vm2659_vm1, %v2658_v57, %v2657_v46 }
 0x3eb   :  { %v2661_v36 = vpack.c.b16 %v2660_v8, %v2660_v8 }
 0x3ed   :  { %3349 = vmatmul.mubr.bf16.vlgmr.msra.gmra.mrb[64].mxu1 %v2661_v36 }
 0x3ee   :  { %3289 = vmatpush3.bf16.msra.mxu1 %v3625_v52  ;;  %2879 = vmatprep.mubr.bf16.mxu1 %v349_v16 }
 0x3ef   :  { %3290 = vmatprep.subr.bf16.mxu1 %v3626_v35 }
 0x3f2   :  { %3291 = vmatpush3.bf16.msra.mxu1 %v3627_v12 }
 0x3f3   :  { %3292 = vmatprep.subr.bf16.mxu1 %v3628_v48 }
 0x3f6   :  { %3293 = vmatpush3.bf16.msra.mxu1 %v3629_v19 }
 0x3f7   :  { %3294 = vmatprep.subr.bf16.mxu1 %v3630_v28 }
 0x3fa   :  { %3295 = vmatpush3.bf16.msra.mxu1 %v3631_v31 }
 0x3fb   :  { %3296 = vmatprep.subr.bf16.mxu1 %v3632_v22 }
 0x3fe   :  { %3297 = vmatpush3.bf16.msra.mxu1 %v3633_v49 }
 0x3ff   :  { %3298 = vmatprep.subr.bf16.mxu1 %v3634_v4 }
 0x402   :  { %3299 = vmatpush3.bf16.msra.mxu1 %v3635_v7 }
 0x403   :  { %3300 = vmatprep.subr.bf16.mxu1 %v3636_v9 }
 0x406   :  { %3301 = vmatpush3.bf16.msra.mxu1 %v3637_v60 }
 0x407   :  { %3302 = vmatprep.subr.bf16.mxu1 %v3638_v62 }
 0x40a   :  { %3303 = vmatpush3.bf16.msra.mxu1 %v3639_v53 }
 0x40d   :  { %2880 = vmatmul.mubr.bf16.vlgmr.msra.gmra.mrb[68].mxu1 %v348_v33 }
 0x4c0   :  { %v2745_v6 = vpop.f32.mrb[64].mxu1 }
 0x4c1   :  { %v3350_v51 = vpop.f32.mrb[65].mxu1 }
 0x4c2   :  { %v2748_v27 = vpop.f32.mrb[66].mxu1 }
 0x4c3   :  { %v3351_v29 = vpop.f32.mrb[67].mxu1 }
 0x4e0   :  { %v3304_v38 = vpop.f32.mrb[68].mxu1 }
 0x4e1   :  { %v3305_v18 = vpop.f32.mrb[69].mxu1 }
 0x4e2   :  { %v3306_v17 = vadd.f32 %v3305_v18, %v3304_v38  ;;  %v3307_v24 = vpop.f32.mrb[70].mxu1 }
 0x4e3   :  { %v3308_v40 = vpop.f32.mrb[71].mxu1 }
 0x4e4   :  { %v2882_v45 = vadd.f32 %v3306_v17, %v2745_v6 }
 0x4e6   :  { %v2894_v2 = vadd.f32 %v3150_v54, %v2882_v45 }
 0x4e8   :  { %v2895_v13 = vsub.f32 %v2894_v2, %v2894_v2 }
 0x4ea   :  { %v2896_v56 = vmul.f32 1.442695, %v2895_v13 }
 0x4ec   :  { %3664 = vpow2.f32 %v2896_v56 }
 0x4f6   :  { %v3665_v47 = vpop.eup %3664 }
 0x4f7   :  { %3666 = vlog2.f32 %v3665_v47 }
 0x501   :  { %v3667_v23 = vpop.eup %3666 }
 0x502   :  { %v2900_v32 = vmul.f32 0.6931472, %v3667_v23 }
 0x504   :  { %v2901_v43 = vadd.f32 %v2900_v32, %v2894_v2 }
 0x506   :  { %v2902_v58 = vsub.f32 %v2894_v2, %v2901_v43 }
 0x508   :  { %2904 = vst.msk [vmem:[%s4615_s16] sm:$0x3] %vm2903_vm2, %v2902_v58 }
 0x509   :  { %2909 = vsyncpa [#allocation4], 1 }
 0x50a   :  { %2910 = vsyncpa [#allocation6], 1 }

// kernel: tpu_custom_call.1
= control target key start
LH: loop header
LB: loop body
LE: loop exit
PB: predicated region body
PF: predicated region fallthrough
CT: control target
= control target key end

     0   :  { %s4599_s0 = inlined_call_operand.vmem [shape: bf16[2,32], index: 0, kind: input, shape index: {}]   ;;  %s4600_s1 = inlined_call_operand.vmem [shape: bf16[80,8], index: 1, kind: input, shape index: {}]   ;;  %s4601_s2 = inlined_call_operand.vmem [shape: bf16[32,768], index: 2, kind: input, shape index: {}]   ;;  %s4602_s3 = inlined_call_operand.vmem [shape: f32[1,768], index: 3, kind: input, shape index: {}]   ;;  %s4603_s4 = inlined_call_operand.vmem [shape: bf16[8,128], index: 4, kind: input, shape index: {}]   ;;  %s4604_s5 = inlined_call_operand.vmem [shape: f32[1,128], index: 5, kind: input, shape index: {}]   ;;  %s4605_s6 = inlined_call_operand.vmem [shape: f32[1,128], index: 6, kind: input, shape index: {}]   ;;  %s4606_s7 = inlined_call_operand.hbm [shape: bf16[640,256], index: 7, kind: input, shape index: {}]   ;;  %s4607_s8 = inlined_call_operand.vmem [shape: f32[1,256], index: 8, kind: input, shape index: {}]   ;;  %s4608_s9 = inlined_call_operand.vmem [shape: f32[1,256], index: 9, kind: input, shape index: {}]   ;;  %s4609_s10 = inlined_call_operand.hbm [shape: bf16[768,128], index: 10, kind: input, shape index: {}]   ;;  %s4610_s11 = inlined_call_operand.vmem [shape: f32[1,128], index: 11, kind: input, shape index: {}]   ;;  %s4611_s12 = inlined_call_operand.vmem [shape: f32[1,128], index: 12, kind: input, shape index: {}]   ;;  %s4612_s13 = inlined_call_operand.vmem [shape: bf16[256,1], index: 13, kind: input, shape index: {}]   ;;  %s4613_s14 = inlined_call_operand.vmem [shape: bf16[128,1], index: 14, kind: input, shape index: {}]   ;;  %s4614_s15 = inlined_call_operand.<no memory space> [shape: f32[1,1], index: 15, kind: input, shape index: {}]   ;;  %s4615_s16 = inlined_call_operand.vmem [shape: f32[2,1], index: 16, kind: output, shape index: {}]  }
   0x1   :  { %4629 = sst [smem:[#allocation11_spill]] %s4599_s0  ;;  %v21_v0 = vstv %s4614_s15 }
   0x2   :  { %22 = vst [vmem:[#allocation2] sm:$0x1] %v21_v0 }
   0x3   :  { %23 = vsyncpa [#allocation4], 0 }
   0x4   :  { %24 = vsyncpa [#allocation6], 0  ;;  %s3716_s23 = smov [#allocation3]   ;;  %s3668_s27 = scalar_lea.hbm %s4606_s7, 10240 }
   0x5   :  { %s44_s24 = sshll.u32 %s3716_s23, 4  ;;  %p3669_p0 = scmp.ne.s32.totalorder %s4606_s7, %s3668_s27  ;;  %s45_s24 = int_to_ptr.vmem [resolvable:$true] %s44_s24 }
   0x6   :  { %p3672_p1 = scmp.lt.u32.totalorder %s3668_s27, %s4606_s7 }
   0x8   :  { %p3674_p2 = pnand %p3672_p1, %p3669_p0 }
   0xa   :  { %3677 = shalt.err (!%p3674_p2)
}
   0xb   :  { %s3678_s15 = scalar_lea.vmem %s45_s24, 10240  ;;  %p3683_p4 = scmp.lt.s32.totalorder %s45_s24, %s45_s24 }
   0xc   :  { %p3679_p3 = scmp.ne.s32.totalorder %s45_s24, %s3678_s15  ;;  %p3684_p5 = scmp.lt.s32.totalorder %s3678_s15, %s3678_s15 }
   0xe   :  { %p3685_p6 = por %p3684_p5, %p3683_p4 }
  0x10   :  { %p3686_p7 = pnand %p3685_p6, %p3679_p3 }
  0x12   :  { %3689 = shalt.err (!%p3686_p7)
}
  0x13   :  { %s3717_s17 = smov 128   ;;  %s3718_s18 = smov 8  }
  0x14   :  { %50 = dma.hbm_to_vmem [thread:$0]  %s4606_s7, 10240, %s45_s24, [#allocation4], %s3717_s17, %s3717_s17, %s3718_s18  }
  0x15   :  { %s3719_s21 = smov [#allocation5]   ;;  %s3690_s26 = scalar_lea.hbm %s4609_s10, 6144 }
  0x16   :  { %s60_s22 = sshll.u32 %s3719_s21, 4  ;;  %p3691_p8 = scmp.ne.s32.totalorder %s4609_s10, %s3690_s26  ;;  %s61_s22 = int_to_ptr.vmem [resolvable:$true] %s60_s22 }
  0x17   :  { %p3694_p9 = scmp.lt.u32.totalorder %s3690_s26, %s4609_s10 }
  0x19   :  { %p3696_p10 = pnand %p3694_p9, %p3691_p8 }
  0x1b   :  { %3699 = shalt.err (!%p3696_p10)
}
  0x1c   :  { %s3700_s0 = scalar_lea.vmem %s61_s22, 6144  ;;  %p3705_p12 = scmp.lt.s32.totalorder %s61_s22, %s61_s22 }
  0x1d   :  { %p3701_p11 = scmp.ne.s32.totalorder %s61_s22, %s3700_s0  ;;  %p3706_p13 = scmp.lt.s32.totalorder %s3700_s0, %s3700_s0 }
  0x1f   :  { %p3707_p0 = por %p3706_p13, %p3705_p12 }
  0x21   :  { %p3708_p1 = pnand %p3707_p0, %p3701_p11 }
  0x23   :  { %3711 = shalt.err (!%p3708_p1)
}
  0x24   :  { %s3720_s7 = smov 64   ;;  %s3721_s24 = smov 4  }
  0x25   :  { %66 = dma.hbm_to_vmem [thread:$0]  %s4609_s10, 6144, %s61_s22, [#allocation6], %s3720_s7, %s3720_s7, %s3721_s24  }
  0x26   :  { %3712 = dma.done.wait [#allocation4], 10240  }
  0x27   :  { %3713 = vsyncadd [#allocation4], 4294957056 }
  0x28   :  { %3714 = dma.done.wait [#allocation6], 6144  }
  0x29   :  { %3715 = vsyncadd [#allocation6], 4294961152  ;;  %v4624_v1 = vmov 0   ;;  %v3425_v2 = vld [vmem:[%s4601_s2 + $0x4] ss:$24 sps:$4 sm:$0xff]   ;;  %s4630_s30 = sld [smem:[#allocation11_spill]]  ;;  %v99_v40 = vlaneseq }
  0x2a   :  { %225 = vmatprep.mubr.bf16.mxu1 %v4624_v1  ;;  %307 = vmatprep.mubr.bf16.mxu0 %v4624_v1  ;;  %v3427_v3 = vld [vmem:[%s4601_s2] ss:$24 sps:$4 sm:$0xff]   ;;  %v3428_v4 = vld [vmem:[%s4601_s2 + $0x34] ss:$24 sps:$4 sm:$0xff]   ;;  %v3430_v5 = vld [vmem:[%s4601_s2 + $0x30] ss:$24 sps:$4 sm:$0xff]  }
  0x2b   :  { %193 = vmatprep.subr.bf16.mxu1 %v3425_v2  ;;  %v3433_v6 = vld [vmem:[%s4601_s2 + $0xc] ss:$24 sps:$4 sm:$0xff]   ;;  %v3431_v8 = vld [vmem:[%s4601_s2 + $0x8] ss:$24 sps:$4 sm:$0xff]   ;;  %vm189_vm0 = vcmask 261120   ;;  %vm402_vm1 = vcmask 1043456  }
  0x2c   :  { %194 = vmatpush1.bf16.msra.mxu1 %v3427_v3  ;;  %v3437_v9 = vld [vmem:[%s4601_s2 + $0x14] ss:$24 sps:$4 sm:$0xff]   ;;  %v3439_v10 = vld [vmem:[%s4601_s2 + $0x10] ss:$24 sps:$4 sm:$0xff]   ;;  %v3440_v11 = vld [vmem:[%s4601_s2 + $0x44] ss:$24 sps:$4 sm:$0xff]  }
  0x2d   :  { %195 = vmatprep.subr.bf16.mxu1 %v3428_v4  ;;  %v3436_v12 = vld [vmem:[%s4601_s2 + $0x3c] ss:$24 sps:$4 sm:$0xff]   ;;  %275 = vmatprep.subr.bf16.mxu0 %v3437_v9  ;;  %v3442_v13 = vld [vmem:[%s4601_s2 + $0x40] ss:$24 sps:$4 sm:$0xff]   ;;  %v4616_v16 = vmov 0.0   ;;  %vm3724_vm2 = vmmov 0  }
  0x2e   :  { %276 = vmatpush1.bf16.msra.mxu0 %v3439_v10  ;;  %v3434_v14 = vld [vmem:[%s4601_s2 + $0x38] ss:$24 sps:$4 sm:$0xff]   ;;  %v360_v15 = vld [vmem:[%s4603_s4] sm:$0xf]  ;;  %vm386_vm3 = vcmask 64512   ;;  %v3444_v19 = vld [vmem:[%s4600_s1 + $0x8] sm:$0xff]  }
  0x2f   :  { %v84_v7 = vld [vmem:[%s4630_s30] sm:$0x1]  ;;  %277 = vmatprep.subr.bf16.mxu0 %v3440_v11  ;;  %v404_v17 = vsel %vm402_vm1, %v360_v15, 0  ;;  %v3445_v20 = vld [vmem:[%s4600_s1 + $0x10] sm:$0xff]   ;;  %v3446_v21 = vld [vmem:[%s4600_s1 + $0x18] sm:$0xff]   ;;  %v3912_v41 = vshrl.u32 %v99_v40, 7 }
  0x30   :  { %196 = vmatpush1.bf16.msra.mxu1 %v3430_v5  ;;  %v3443_v18 = vld [vmem:[%s4600_s1] sm:$0xff]   ;;  %v3451_v26 = vld [vmem:[#allocation3 + $0x90] ss:$8 sps:$4 sm:$0xff]   ;;  %vm1008_vm4 = vcmask 1042432   ;;  %vm1009_vm5 = vcmask 1046532   ;;  %vm1492_vm13 = vcmask 1041408  }
  0x31   :  { %234 = vmatprep.subr.bf16.mxu1 %v3433_v6  ;;  %v3447_v22 = vld [vmem:[%s4600_s1 + $0x20] sm:$0xff]   ;;  %v3457_v30 = vld [vmem:[#allocation3 + $0xb0] ss:$8 sps:$4 sm:$0xff]   ;;  %4631 = vst [vmem:[#allocation9_spill] sm:$0xff] %v3912_v41  ;;  %v3915_v42 = vsub.s32 0, %v3912_v41  ;;  %v3921_v44 = vsub.s32 1, %v3912_v41  ;;  %vm3971_vm10 = vmor %vm1008_vm4, %vm1009_vm5 }
  0x32   :  { %278 = vmatpush1.bf16.msra.mxu0 %v3442_v13  ;;  %v3450_v23 = vld [vmem:[#allocation3 + $0x84] ss:$8 sps:$4 sm:$0xff]   ;;  %v3448_v24 = vld [vmem:[#allocation3 + $0x80] ss:$8 sps:$4 sm:$0xff]   ;;  %v3453_v25 = vld [vmem:[#allocation3 + $0x94] ss:$8 sps:$4 sm:$0xff]  }
  0x33   :  { %2923 = vmatmul.mubr.msk.bf16.vlgmr.msra.gmra.mrb[0].mxu1 %vm189_vm0, %v84_v7  ;;  %774 = vmatprep.subr.bf16.mxu0 %v3450_v23  ;;  %v3456_v27 = vld [vmem:[#allocation3 + $0xa4] ss:$8 sps:$4 sm:$0xff]   ;;  %v3454_v28 = vld [vmem:[#allocation3 + $0xa0] ss:$8 sps:$4 sm:$0xff]   ;;  %v3459_v29 = vld [vmem:[#allocation3 + $0xb4] ss:$8 sps:$4 sm:$0xff]  }
  0x34   :  { %235 = vmatpush1.bf16.msra.mxu1 %v3431_v8  ;;  %266 = vmatprep.mubr.bf16.mxu1 %v4624_v1  ;;  %v3462_v31 = vld [vmem:[#allocation3 + $0xc4] ss:$8 sps:$4 sm:$0xff]   ;;  %v3460_v32 = vld [vmem:[#allocation3 + $0xc0] ss:$8 sps:$4 sm:$0xff]   ;;  %v3465_v33 = vld [vmem:[#allocation3 + $0xd4] ss:$8 sps:$4 sm:$0xff]  }
  0x35   :  { %236 = vmatprep.subr.bf16.mxu1 %v3436_v12  ;;  %2925 = vmatmul.mubr.msk.bf16.vlgmr.msra.gmra.mrb[0].mxu0 %vm189_vm0, %v84_v7  ;;  %v3463_v34 = vld [vmem:[#allocation3 + $0xd0] ss:$8 sps:$4 sm:$0xff]   ;;  %v3468_v35 = vld [vmem:[#allocation3 + $0xe4] ss:$8 sps:$4 sm:$0xff]   ;;  %v3466_v36 = vld [vmem:[#allocation3 + $0xe0] ss:$8 sps:$4 sm:$0xff]  }
  0x36   :  { %806 = vmatprep.mubr.bf16.mxu0 %v4624_v1  ;;  %775 = vmatpush1.bf16.msra.mxu0 %v3448_v24  ;;  %v3471_v37 = vld [vmem:[#allocation3 + $0xf4] ss:$8 sps:$4 sm:$0xff]   ;;  %v3469_v38 = vld [vmem:[#allocation3 + $0xf0] ss:$8 sps:$4 sm:$0xff]   ;;  %v3474_v39 = vld [vmem:[#allocation3 + $0x4] ss:$8 sps:$4 sm:$0xff]  }
  0x37   :  { %776 = vmatprep.subr.bf16.mxu0 %v3453_v25  ;;  %v97_v43 = vld [vmem:[%s4602_s3] sm:$0x3f]  ;;  %v117_v47 = vsub.s32 4, %v3912_v41  ;;  %v121_v49 = vsub.s32 5, %v3912_v41  ;;  %v109_v58 = vsub.s32 2, %v3912_v41  ;;  %v113_v60 = vsub.s32 3, %v3912_v41 }
  0x38   :  { %237 = vmatpush1.bf16.msra.mxu1 %v3434_v14  ;;  %v102_v45 = vrot.slane %v97_v43, %v3915_v42  ;;  %v106_v46 = vrot.slane %v97_v43, %v3921_v44  ;;  %v3932_v14 = vld [vmem:[%s4604_s5] ss:$0 sm:$0xff]  ;;  %vm571_vm6 = vsmask.f32 3328  ;;  %vm572_vm7 = vsmask.f32 7440 }
  0x39   :  { %3310 = vmatprep.subr.bf16.mxu1 %v4616_v16  ;;  %v118_v56 = vrot.slane %v97_v43, %v117_v47  ;;  %v122_v59 = vrot.slane %v97_v43, %v121_v49  ;;  %v110_v0 = vrot.slane %v97_v43, %v109_v58  ;;  %v114_v5 = vrot.slane %v97_v43, %v113_v60  ;;  %vm3986_vm11 = vmor %vm571_vm6, %vm572_vm7  ;;  %v3493_v41 = vld [vmem:[#allocation3 + $0x70] ss:$8 sps:$4 sm:$0xff]  }
  0x3a   :  { %777 = vmatpush1.bf16.msra.mxu0 %v3451_v26  ;;  %vm1238_vm8 = vsmask.f32 2304  ;;  %vm1239_vm9 = vsmask.f32 6416  ;;  %vm1493_vm14 = vcmask 1045508   ;;  %vm2659_vm1 = vcmask 1041409  }
  0x3b   :  { %2924 = vmatmul.mubr.msk.bf16.vlgmr.msra.gmra.mrb[4].mxu1 %vm189_vm0, %v84_v7  ;;  %778 = vmatprep.subr.bf16.mxu0 %v3456_v27  ;;  %vm4000_vm12 = vmor %vm1238_vm8, %vm1239_vm9 }
  0x3c   :  { %3311 = vmatpush3.bf16.msra.mxu1 %v404_v17  ;;  %3312 = vmatprep.mubr.msk.bf16.mxu1 %vm3724_vm2, %v4616_v16  ;;  %vm4204_vm15 = vmor %vm1492_vm13, %vm1493_vm14 }
  0x3e   :  { %779 = vmatpush1.bf16.msra.mxu0 %v3454_v28 }
  0x3f   :  { %780 = vmatprep.subr.bf16.mxu0 %v3459_v29 }
  0x42   :  { %781 = vmatpush1.bf16.msra.mxu0 %v3457_v30 }
  0x43   :  { %3313 = vmatmul.mubr.msk.bf16.vlgmr.msra.gmra.mrb[8].mxu1 %vm386_vm3, %v3443_v18  ;;  %782 = vmatprep.subr.bf16.mxu0 %v3462_v31 }
  0x44   :  { %3316 = vmatprep.mubr.msk.bf16.mxu1 %vm3724_vm2, %v4616_v16 }
  0x46   :  { %783 = vmatpush1.bf16.msra.mxu0 %v3460_v32 }
  0x47   :  { %784 = vmatprep.subr.bf16.mxu0 %v3465_v33 }
  0x4a   :  { %785 = vmatpush1.bf16.msra.mxu0 %v3463_v34 }
  0x4b   :  { %3317 = vmatmul.mubr.msk.bf16.gmra.mrb[12].mxu1 %vm386_vm3, %v3444_v19  ;;  %786 = vmatprep.subr.bf16.mxu0 %v3468_v35 }
  0x4c   :  { %3320 = vmatprep.mubr.msk.bf16.mxu1 %vm3724_vm2, %v4616_v16 }
  0x4e   :  { %787 = vmatpush1.bf16.msra.mxu0 %v3466_v36 }
  0x4f   :  { %788 = vmatprep.subr.bf16.mxu0 %v3471_v37 }
  0x52   :  { %789 = vmatpush1.bf16.msra.mxu0 %v3469_v38 }
  0x53   :  { %3321 = vmatmul.mubr.msk.bf16.gmra.mrb[16].mxu1 %vm386_vm3, %v3445_v20  ;;  %935 = vmatprep.subr.bf16.mxu0 %v3474_v39  ;;  %v3937_v20 = vld [vmem:[%s4605_s6] ss:$0 sm:$0xff] }
  0x54   :  { %3324 = vmatprep.mubr.msk.bf16.mxu1 %vm3724_vm2, %v4616_v16 }
  0x5b   :  { %3325 = vmatmul.mubr.msk.bf16.gmra.mrb[20].mxu1 %vm386_vm3, %v3446_v21 }
  0x5c   :  { %3328 = vmatprep.mubr.msk.bf16.mxu1 %vm3724_vm2, %v4616_v16 }
  0x63   :  { %3329 = vmatmul.mubr.msk.bf16.gmra.mrb[24].mxu1 %vm386_vm3, %v3447_v22 }
 0x106   :  { %v227_v48 = vpop.f32.mrb[0].mxu1 }
 0x107   :  { %v228_v50 = vadd.f32 %v227_v48, %v102_v45  ;;  %v229_v51 = vpop.f32.mrb[1].mxu1 }
 0x108   :  { %v230_v52 = vadd.f32 %v229_v51, %v106_v46  ;;  %v231_v53 = vpop.f32.mrb[2].mxu1  ;;  %v309_v61 = vpop.f32.mrb[0].mxu0 }
 0x109   :  { %v2926_v54 = vmul.f32 -1.442695, %v228_v50  ;;  %v232_v55 = vpop.f32.mrb[3].mxu1  ;;  %v310_v62 = vadd.f32 %v309_v61, %v118_v56  ;;  %v311_v63 = vpop.f32.mrb[1].mxu0 }
 0x10a   :  { %v2927_v57 = vmul.f32 -1.442695, %v230_v52  ;;  %v312_v3 = vadd.f32 %v311_v63, %v122_v59  ;;  %v313_v4 = vpop.f32.mrb[2].mxu0 }
 0x10b   :  { %3640 = vpow2.f32 %v2926_v54  ;;  %v2928_v7 = vmul.f32 -1.442695, %v310_v62  ;;  %v314_v8 = vpop.f32.mrb[3].mxu0 }
 0x10c   :  { %3642 = vpow2.f32 %v2927_v57  ;;  %v2929_v10 = vmul.f32 -1.442695, %v312_v3 }
 0x10d   :  { %3644 = vpow2.f32 %v2928_v7 }
 0x10e   :  { %v268_v2 = vpop.f32.mrb[4].mxu1  ;;  %3646 = vpow2.f32 %v2929_v10 }
 0x10f   :  { %v270_v6 = vpop.f32.mrb[5].mxu1  ;;  %v269_v12 = vadd.f32 %v268_v2, %v110_v0 }
 0x110   :  { %v272_v9 = vpop.f32.mrb[6].mxu1  ;;  %v271_v13 = vadd.f32 %v270_v6, %v114_v5  ;;  %v3600_v5 = vld [vmem:[#allocation5 + $0x140] sm:$0xff]  }
 0x111   :  { %v273_v11 = vpop.f32.mrb[7].mxu1  ;;  %3648 = vtanh.f32 %v269_v12 }
 0x112   :  { %3650 = vtanh.f32 %v271_v13 }
 0x115   :  { %v3641_v15 = vpop.eup %3640 }
 0x116   :  { %v3643_v17 = vpop.eup %3642  ;;  %v322_v18 = vadd.f32 1.0, %v3641_v15  ;;  %v440_v19 = vpop.f32.mrb[8].mxu1 }
 0x117   :  { %v323_v21 = vadd.f32 1.0, %v3643_v17  ;;  %v486_v22 = vmul.f32 %v3932_v14, %v440_v19  ;;  %v3314_v23 = vpop.f32.mrb[9].mxu1  ;;  %v3645_v30 = vpop.eup %3644 }
 0x118   :  { %3652 = vrcp.f32 %v322_v18  ;;  %v443_v24 = vpop.f32.mrb[10].mxu1  ;;  %v3647_v33 = vpop.eup %3646  ;;  %v336_v34 = vadd.f32 1.0, %v3645_v30  ;;  %v4634_v18 = vmov 0 }
 0x119   :  { %3654 = vrcp.f32 %v323_v21  ;;  %v503_v25 = vadd.f32 %v3937_v20, %v486_v22  ;;  %v487_v26 = vmul.f32 %v3932_v14, %v443_v24  ;;  %v3315_v27 = vpop.f32.mrb[11].mxu1  ;;  %v337_v36 = vadd.f32 1.0, %v3647_v33 }
 0x11a   :  { %3656 = vrcp.f32 %v336_v34  ;;  %v4635_v18 = vsel %vm3986_vm11, 4294967295, %v4634_v18 }
 0x11b   :  { %v3942_v28 = vmax.f32 %v503_v25, 0.0  ;;  %v504_v29 = vadd.f32 %v3937_v20, %v487_v26  ;;  %v3649_v43 = vpop.eup %3648  ;;  %3658 = vrcp.f32 %v337_v36  ;;  %4636 = vst [vmem:[#allocation10_spill] sm:$0xff] %v4635_v18  ;;  %v4646_v18 = vmov 0   ;;  %v3573_v26 = vld [vmem:[#allocation5 + $0x90] sm:$0xff]  }
 0x11c   :  { %v3651_v49 = vpop.eup %3650 }
 0x11d   :  { %v3947_v31 = vpack.c.bf16 %v3942_v28, %v3942_v28  ;;  %v3949_v32 = vmax.f32 %v504_v29, 0.0 }
 0x11e   :  { %v448_v35 = vpop.f32.mrb[12].mxu1 }
 0x11f   :  { %v575_v37 = vshrl.u32 %v3947_v31, 16  ;;  %v578_v38 = vshll.u32 %v3947_v31, 16  ;;  %v2988_v39 = vrot.slane %v3947_v31, 9  ;;  %v3318_v40 = vpop.f32.mrb[13].mxu1  ;;  %v3959_v47 = vpack.c.bf16 %v3949_v32, %v3949_v32 }
 0x120   :  { %v451_v48 = vpop.f32.mrb[14].mxu1  ;;  %v488_v62 = vmul.f32 %v3932_v14, %v448_v35 }
 0x121   :  { %v577_v50 = vrot.slane %v575_v37, 4  ;;  %v580_v51 = vrot.slane %v578_v38, 5  ;;  %v1241_v52 = vrot.slane %v575_v37, 5  ;;  %v3319_v53 = vpop.f32.mrb[15].mxu1  ;;  %v1242_v55 = vrot.slane %v578_v38, 6 }
 0x122   :  { %v3653_v54 = vpop.eup %3652  ;;  %v584_v56 = vshll.u32 %v3959_v47, 16  ;;  %v588_v57 = vshrl.u32 %v3959_v47, 16  ;;  %v1013_v58 = vrot.slane %v3959_v47, 5  ;;  %v4618_v61 = vrot.slane %v3959_v47, 6 }
 0x123   :  { %v3655_v59 = vpop.eup %3654  ;;  %v342_v60 = vmul.f32 %v3653_v54, %v3649_v43  ;;  %v489_v63 = vmul.f32 %v3932_v14, %v451_v48  ;;  %v1243_v2 = vor.u32 %v1242_v55, %v1241_v52  ;;  %v505_v9 = vadd.f32 %v3937_v20, %v488_v62 }
 0x124   :  { %v343_v0 = vmul.f32 %v3655_v59, %v3651_v49  ;;  %v590_v3 = vrot.slane %v588_v57, 4  ;;  %v3967_v4 = vrot.slane %v1013_v58, 4  ;;  %v1245_v6 = vrot.slane %v588_v57, 5  ;;  %v4009_v36 = vpop.eup %3656 }
 0x125   :  { %3660 = vtanh.f32 %v342_v60  ;;  %v1246_v7 = vrot.slane %v584_v56, 6  ;;  %v3977_v8 = vrot.slane %v4618_v61, 4  ;;  %v506_v10 = vadd.f32 %v3937_v20, %v489_v63  ;;  %v4023_v43 = vpop.eup %3658 }
 0x126   :  { %3662 = vtanh.f32 %v343_v0  ;;  %v456_v11 = vpop.f32.mrb[16].mxu1  ;;  %v581_v12 = vor.u32 %v580_v51, %v577_v50  ;;  %v586_v19 = vrot.slane %v584_v56, 5  ;;  %v3992_v21 = vsel %vm3971_vm10, %v2988_v39, %v1013_v58 }
 0x127   :  { %v3981_v13 = vor.u32 %v1246_v7, %v1245_v6  ;;  %v490_v15 = vmul.f32 %v3932_v14, %v456_v11  ;;  %v3322_v17 = vpop.f32.mrb[17].mxu1  ;;  %v3994_v22 = vmax.f32 %v505_v9, 0.0  ;;  %v3996_v23 = vmax.f32 %v506_v10, 0.0 }
 0x128   :  { %v459_v24 = vpop.f32.mrb[18].mxu1  ;;  %v582_v25 = vrot.slane %v581_v12, 4  ;;  %v4004_v27 = vrot.slane %v1243_v2, 4  ;;  %v591_v34 = vor.u32 %v590_v3, %v586_v19 }
 0x129   :  { %v507_v29 = vadd.f32 %v3937_v20, %v490_v15  ;;  %v491_v30 = vmul.f32 %v3932_v14, %v459_v24  ;;  %v3323_v33 = vpop.f32.mrb[19].mxu1  ;;  %v1249_v35 = vrot.slane %v3981_v13, 4  ;;  %v4013_v37 = vpack.c.bf16 %v3994_v22, %v3994_v22 }
 0x12a   :  { %v4017_v38 = vpack.c.bf16 %v3996_v23, %v3996_v23  ;;  %v587_v39 = vsel %vm3986_vm11, %v582_v25, %v586_v19  ;;  %v592_v50 = vrot.slane %v591_v34, 4  ;;  %v1248_v51 = vsel %vm4000_vm12, %v4004_v27, %v3981_v13 }
 0x12b   :  { %v517_v48 = vmax.f32 %v507_v29, 0.0  ;;  %v508_v49 = vadd.f32 %v3937_v20, %v491_v30  ;;  %v594_v52 = vshll.u32 %v4013_v37, 16  ;;  %v598_v53 = vshrl.u32 %v4013_v37, 16 }
 0x12c   :  { %v1016_v54 = vrot.slane %v4013_v37, 5  ;;  %v608_v56 = vshrl.u32 %v4017_v38, 16  ;;  %v604_v59 = vshll.u32 %v4017_v38, 16 }
 0x12d   :  { %v4035_v57 = vpack.c.bf16 %v517_v48, %v517_v48  ;;  %v518_v58 = vmax.f32 %v508_v49, 0.0  ;;  %v1250_v60 = vrot.slane %v598_v53, 5  ;;  %v1251_v62 = vrot.slane %v594_v52, 6  ;;  %v3472_v49 = vld [vmem:[#allocation3] ss:$8 sps:$4 sm:$0xff]  }
 0x12e   :  { %v464_v63 = vpop.f32.mrb[20].mxu1  ;;  %v596_v0 = vrot.slane %v594_v52, 5  ;;  %v600_v2 = vrot.slane %v598_v53, 4  ;;  %v606_v11 = vrot.slane %v604_v59, 5  ;;  %v610_v25 = vrot.slane %v608_v56, 4 }
 0x12f   :  { %v4038_v3 = vpop.eup %3660  ;;  %v525_v6 = vpack.c.bf16 %v518_v58, %v517_v48  ;;  %v4040_v7 = vpack.c.bf16 %v518_v58, %v518_v58  ;;  %v492_v9 = vmul.f32 %v3932_v14, %v464_v63  ;;  %v3326_v10 = vpop.f32.mrb[21].mxu1  ;;  %v4047_v15 = vor.u32 %v1251_v62, %v1250_v60  ;;  %v3477_v60 = vld [vmem:[#allocation3 + $0x14] ss:$8 sps:$4 sm:$0xff]  }
 0x130   :  { %v4045_v12 = vpop.eup %3662  ;;  %v597_v17 = vsel %vm3986_vm11, %v592_v50, %v596_v0  ;;  %v467_v19 = vpop.f32.mrb[22].mxu1  ;;  %v601_v24 = vor.u32 %v600_v2, %v596_v0  ;;  %v611_v50 = vor.u32 %v610_v25, %v606_v11  ;;  %v614_v63 = vshll.u32 %v4035_v57, 16  ;;  %v3480_v25 = vld [vmem:[#allocation3 + $0x24] ss:$8 sps:$4 sm:$0xff]  }
 0x131   :  { %v4053_v29 = vunpack.c.h.b16 %v525_v6  ;;  %v619_v30 = vshrl.u32 %v4040_v7, 16  ;;  %v622_v33 = vshll.u32 %v4040_v7, 16  ;;  %v509_v34 = vadd.f32 %v3937_v20, %v492_v9  ;;  %v3327_v48 = vpop.f32.mrb[23].mxu1 }
 0x132   :  { %v2952_v52 = vcombine.low %v587_v39, %v597_v17  ;;  %v493_v53 = vmul.f32 %v3932_v14, %v467_v19  ;;  %v602_v58 = vrot.slane %v601_v24, 4  ;;  %v612_v9 = vrot.slane %v611_v50, 4  ;;  %v3475_v24 = vld [vmem:[#allocation3 + $0x10] ss:$8 sps:$4 sm:$0xff]  }
 0x133   :  { %v519_v62 = vmax.f32 %v509_v34, 0.0  ;;  %v621_v0 = vrot.slane %v619_v30, 4  ;;  %v624_v2 = vrot.slane %v622_v33, 5  ;;  %v4070_v10 = vsel %vm3971_vm10, %v3967_v4, %v1016_v54 }
 0x134   :  { %807 = vmatmul.mubr.bf16.vlgmr.msra.gmra.mrb[4].mxu0 %v2952_v52  ;;  %v510_v6 = vadd.f32 %v3937_v20, %v493_v53  ;;  %v607_v39 = vsel %vm3986_vm11, %v602_v58, %v606_v11  ;;  %v616_v19 = vrot.slane %v614_v63, 5  ;;  %v1018_v53 = vrot.slane %v1016_v54, 4 }
 0x135   :  { %v4072_v17 = vpack.c.bf16 %v519_v62, %v519_v62  ;;  %936 = vmatpush1.bf16.msra.mxu0 %v3472_v49  ;;  %816 = vmatprep.mubr.bf16.mxu0 %v4624_v1  ;;  %v625_v34 = vor.u32 %v624_v2, %v621_v0  ;;  %v1019_v4 = vrot.slane %v4017_v38, 5  ;;  %v1022_v58 = vrot.slane %v4035_v57, 5 }
 0x136   :  { %v520_v48 = vmax.f32 %v510_v6, 0.0  ;;  %v472_v52 = vpop.f32.mrb[24].mxu1  ;;  %937 = vmatprep.subr.bf16.mxu0 %v3477_v60  ;;  %v617_v16 = vsel %vm3986_vm11, %v612_v9, %v616_v19  ;;  %v1263_v13 = vrot.slane %v614_v63, 6 }
 0x137   :  { %v632_v49 = vshrl.u32 %v4072_v17, 16  ;;  %v494_v50 = vmul.f32 %v3932_v14, %v472_v52  ;;  %v3330_v40 = vpop.f32.mrb[25].mxu1  ;;  %v626_v0 = vrot.slane %v625_v34, 4  ;;  %v2953_v6 = vcombine.low %v607_v39, %v617_v16  ;;  %v3478_v52 = vld [vmem:[#allocation3 + $0x20] ss:$8 sps:$4 sm:$0xff]  }
 0x138   :  { %v4085_v2 = vpack.c.bf16 %v520_v48, %v519_v62  ;;  %v4087_v11 = vpack.c.bf16 %v520_v48, %v520_v48  ;;  %v475_v60 = vpop.f32.mrb[26].mxu1  ;;  %v4619_v54 = vshll.u32 %v4072_v17, 16  ;;  %v4096_v40 = vsel %vm3971_vm10, %v1018_v53, %v1019_v4  ;;  %v3483_v16 = vld [vmem:[#allocation3 + $0x34] ss:$8 sps:$4 sm:$0xff]  }
 0x139   :  { %v511_v46 = vadd.f32 %v3937_v20, %v494_v50  ;;  %938 = vmatpush1.bf16.msra.mxu0 %v3475_v24  ;;  %v495_v55 = vmul.f32 %v3932_v14, %v475_v60  ;;  %v3331_v45 = vpop.f32.mrb[27].mxu1  ;;  %v634_v9 = vrot.slane %v632_v49, 4  ;;  %v1021_v48 = vrot.slane %v1019_v4, 4 }
 0x13a   :  { %v4621_v62 = vshrl.u32 %v4087_v11, 16  ;;  %939 = vmatprep.subr.bf16.mxu0 %v3480_v25  ;;  %v630_v39 = vrot.slane %v4619_v54, 5  ;;  %v4620_v19 = vshll.u32 %v4087_v11, 16  ;;  %v539_v14 = vunpack.c.l.b16 %v4085_v2 }
 0x13b   :  { %v521_v45 = vmax.f32 %v511_v46, 0.0  ;;  %v512_v24 = vadd.f32 %v3937_v20, %v495_v55  ;;  %v540_v34 = vunpack.c.h.b16 %v4085_v2  ;;  %v3481_v46 = vld [vmem:[#allocation3 + $0x30] ss:$8 sps:$4 sm:$0xff]   ;;  %v4119_v55 = vsel %vm3971_vm10, %v1021_v48, %v1022_v58 }
 0x13c   :  { %817 = vmatmul.mubr.bf16.gmra.mrb[8].mxu0 %v2953_v6  ;;  %v631_v53 = vsel %vm3986_vm11, %v626_v0, %v630_v39  ;;  %v635_v50 = vor.u32 %v634_v9, %v630_v39  ;;  %v640_v25 = vrot.slane %v4620_v19, 5  ;;  %v644_v60 = vrot.slane %v4621_v62, 4  ;;  %v3486_v0 = vld [vmem:[#allocation3 + $0x44] ss:$8 sps:$4 sm:$0xff]   ;;  %v3484_v6 = vld [vmem:[#allocation3 + $0x40] ss:$8 sps:$4 sm:$0xff]  }
 0x13d   :  { %v4111_v61 = vpack.c.bf16 %v521_v45, %v521_v45  ;;  %v522_v54 = vmax.f32 %v512_v24, 0.0  ;;  %940 = vmatpush1.bf16.msra.mxu0 %v3478_v52  ;;  %826 = vmatprep.mubr.bf16.mxu0 %v4624_v1  ;;  %v4115_v20 = vpack.c.b16 %v539_v14, %v4053_v29  ;;  %v2989_v9 = vrot.slane %v4040_v7, 9  ;;  %v3489_v19 = vld [vmem:[#allocation3 + $0x54] ss:$8 sps:$4 sm:$0xff]  }
 0x13e   :  { %941 = vmatprep.subr.bf16.mxu0 %v3483_v16  ;;  %v636_v4 = vrot.slane %v635_v50, 4  ;;  %v645_v2 = vor.u32 %v644_v60, %v640_v25  ;;  %v1026_v14 = vrot.slane %v4072_v17, 5  ;;  %v1029_v48 = vrot.slane %v4087_v11, 5 }
 0x13f   :  { %v4623_v52 = vshrl.u32 %v4111_v61, 16  ;;  %v527_v39 = vpack.c.bf16 %v522_v54, %v521_v45  ;;  %v4125_v24 = vpack.c.bf16 %v522_v54, %v522_v54  ;;  %v4622_v29 = vshll.u32 %v4111_v61, 16 }
 0x140   :  { %v641_v58 = vsel %vm3986_vm11, %v636_v4, %v640_v25  ;;  %v646_v16 = vrot.slane %v645_v2, 4  ;;  %v4139_v25 = vsel %vm3971_vm10, %v2989_v9, %v1026_v14  ;;  %v1028_v4 = vrot.slane %v1026_v14, 4  ;;  %v3569_v14 = vld [vmem:[#allocation5 + $0x80] sm:$0xff]  }
 0x141   :  { %v541_v50 = vunpack.c.l.b16 %v527_v39  ;;  %942 = vmatpush1.bf16.msra.mxu0 %v3481_v46  ;;  %v2954_v60 = vcombine.low %v631_v53, %v641_v58  ;;  %v650_v54 = vrot.slane %v4622_v29, 5  ;;  %v654_v45 = vrot.slane %v4623_v52, 4 }
 0x142   :  { %943 = vmatprep.subr.bf16.mxu0 %v3486_v0  ;;  %v658_v62 = vshll.u32 %v4125_v24, 16  ;;  %v1031_v2 = vrot.slane %v1029_v48, 4  ;;  %v1032_v58 = vrot.slane %v4111_v61, 5  ;;  %v4148_v0 = vsel %vm3971_vm10, %v1028_v4, %v1029_v48 }
 0x143   :  { %v651_v53 = vsel %vm3986_vm11, %v646_v16, %v650_v54  ;;  %v655_v46 = vor.u32 %v654_v45, %v650_v54  ;;  %v4143_v39 = vpack.c.b16 %v541_v50, %v540_v34  ;;  %v1035_v52 = vrot.slane %v4125_v24, 5  ;;  %v3487_v16 = vld [vmem:[#allocation3 + $0x50] ss:$8 sps:$4 sm:$0xff]  }
 0x144   :  { %827 = vmatmul.mubr.bf16.gmra.mrb[12].mxu0 %v2954_v60  ;;  %v660_v29 = vrot.slane %v658_v62, 5  ;;  %v1253_v9 = vsel %vm4000_vm12, %v1249_v35, %v4047_v15  ;;  %v4161_v48 = vsel %vm3971_vm10, %v1031_v2, %v1032_v58  ;;  %v1034_v50 = vrot.slane %v1032_v58, 4  ;;  %v3492_v60 = vld [vmem:[#allocation3 + $0x64] ss:$8 sps:$4 sm:$0xff]  }
 0x145   :  { %944 = vmatpush1.bf16.msra.mxu0 %v3484_v6  ;;  %836 = vmatprep.mubr.bf16.mxu0 %v4624_v1  ;;  %v656_v34 = vrot.slane %v655_v46, 4  ;;  %v4168_v35 = vcombine.low %v1248_v51, %v1253_v9  ;;  %v1254_v6 = vrot.slane %v4047_v15, 4  ;;  %v1255_v54 = vrot.slane %v608_v56, 5  ;;  %v3490_v15 = vld [vmem:[#allocation3 + $0x60] ss:$8 sps:$4 sm:$0xff]  }
 0x146   :  { %945 = vmatprep.subr.bf16.mxu0 %v3489_v19  ;;  %v1256_v45 = vrot.slane %v604_v59, 6  ;;  %v4179_v19 = vsel %vm3971_vm10, %v1034_v50, %v1035_v52  ;;  %v1260_v2 = vshrl.u32 %v4035_v57, 16  ;;  %v1266_v59 = vrot.slane %v619_v30, 5  ;;  %v3568_v51 = vld [vmem:[#allocation5 + $0xc0] sm:$0xff]   ;;  %v3570_v1 = vld [vmem:[#allocation5 + $0xc8] sm:$0xff]  }
 0x147   :  { %v661_v4 = vsel %vm3986_vm11, %v656_v34, %v660_v29  ;;  %v1267_v52 = vrot.slane %v622_v33, 6  ;;  %v1270_v46 = vrot.slane %v632_v49, 5  ;;  %v4639_v58 = vshll.u32 %v4072_v17, 16  ;;  %3177 = vmatprep.subr.bf16.mxu1 %v3568_v51  ;;  %v3510_v33 = vld [vmem:[#allocation3 + $0x144] ss:$8 sps:$4 sm:$0xff]  }
 0x148   :  { %v2955_v27 = vcombine.low %v651_v53, %v661_v4  ;;  %v1257_v56 = vor.u32 %v1256_v45, %v1255_v54  ;;  %v1262_v29 = vrot.slane %v1260_v2, 5  ;;  %v3495_v53 = vld [vmem:[#allocation3 + $0x74] ss:$8 sps:$4 sm:$0xff]   ;;  %v4640_v30 = vshrl.u32 %v4087_v11, 16  ;;  %3178 = vmatpush3.bf16.msra.mxu1 %v3569_v14 }
 0x149   :  { %946 = vmatpush1.bf16.msra.mxu0 %v3487_v16  ;;  %v1271_v63 = vrot.slane %v4639_v58, 6  ;;  %v4641_v50 = vshll.u32 %v4087_v11, 16  ;;  %v4644_v4 = vshrl.u32 %v4111_v61, 16  ;;  %3179 = vmatprep.subr.bf16.mxu1 %v3570_v1  ;;  %v1506_v14 = vrot.slane %v4035_v57, 6 }
 0x14a   :  { %947 = vmatprep.subr.bf16.mxu0 %v3492_v60  ;;  %v4196_v9 = vsel %vm4000_vm12, %v1254_v6, %v1257_v56  ;;  %v1259_v34 = vrot.slane %v1257_v56, 4  ;;  %v1275_v16 = vrot.slane %v4640_v30, 5  ;;  %v1264_v49 = vor.u32 %v1263_v13, %v1262_v29 }
 0x14b   :  { %v1276_v54 = vrot.slane %v4641_v50, 6  ;;  %v1268_v60 = vor.u32 %v1267_v52, %v1266_v59  ;;  %v1272_v45 = vor.u32 %v1271_v63, %v1270_v46  ;;  %v1280_v6 = vrot.slane %v4644_v4, 5  ;;  %v3498_v46 = vld [vmem:[#allocation3 + $0x104] ss:$8 sps:$4 sm:$0xff]  }
 0x14c   :  { %837 = vmatmul.mubr.bf16.gmra.mrb[16].mxu0 %v2955_v27  ;;  %v4645_v56 = vshll.u32 %v4111_v61, 16  ;;  %v1285_v30 = vshrl.u32 %v4125_v24, 16  ;;  %v1288_v50 = vrot.slane %v658_v62, 6  ;;  %v4216_v13 = vsel %vm4000_vm12, %v1259_v34, %v1264_v49  ;;  %v3571_v4 = vld [vmem:[#allocation5 + $0x88] sm:$0xff]  }
 0x14d   :  { %v1277_v2 = vor.u32 %v1276_v54, %v1275_v16  ;;  %948 = vmatpush1.bf16.msra.mxu0 %v3490_v15  ;;  %967 = vmatprep.mubr.bf16.mxu0 %v4646_v18  ;;  %v1269_v59 = vrot.slane %v1268_v60, 4  ;;  %v1274_v27 = vrot.slane %v1272_v45, 4  ;;  %v4647_v29 = vrot.slane %v3959_v47, 6 }
 0x14e   :  { %v1281_v58 = vrot.slane %v4645_v56, 6  ;;  %v4648_v52 = vrot.slane %v3947_v31, 10  ;;  %949 = vmatprep.subr.bf16.mxu0 %v3495_v53  ;;  %v3011_v15 = vcombine.low %v4196_v9, %v4216_v13  ;;  %v1287_v54 = vrot.slane %v1285_v30, 5  ;;  %v3572_v56 = vld [vmem:[#allocation5 + $0xd0] sm:$0xff]   ;;  %3180 = vmatpush3.bf16.msra.mxu1 %v3571_v4  ;;  %v3508_v4 = vld [vmem:[#allocation3 + $0x140] ss:$8 sps:$4 sm:$0xff]  }
 0x14f   :  { %v1279_v63 = vrot.slane %v1277_v2, 4  ;;  %v1273_v34 = vsel %vm4000_vm12, %v1269_v59, %v1272_v45  ;;  %v1278_v47 = vsel %vm4000_vm12, %v1274_v27, %v1277_v2  ;;  %v4649_v31 = vrot.slane %v4013_v37, 6  ;;  %v3501_v59 = vld [vmem:[#allocation3 + $0x114] ss:$8 sps:$4 sm:$0xff]   ;;  %3181 = vmatprep.subr.bf16.mxu1 %v3572_v56  ;;  %v3516_v56 = vld [vmem:[#allocation3 + $0x164] ss:$8 sps:$4 sm:$0xff]  }
 0x150   :  { %v4224_v62 = vsel %vm4204_vm15, %v4648_v52, %v4647_v29  ;;  %v1282_v16 = vor.u32 %v1281_v58, %v1280_v6  ;;  %v4241_v6 = vcombine.low %v1273_v34, %v1278_v47  ;;  %v1289_v2 = vor.u32 %v1288_v50, %v1287_v54  ;;  %v3496_v58 = vld [vmem:[#allocation3 + $0x100] ss:$8 sps:$4 sm:$0xff]   ;;  %v3567_v13 = vld [vmem:[#allocation3 + $0x274] ss:$8 sps:$4 sm:$0xff]  }
 0x151   :  { %v4237_v53 = vsel %vm4204_vm15, %v3977_v8, %v4649_v31  ;;  %v4650_v49 = vmov %v4649_v31  ;;  %950 = vmatpush1.bf16.msra.mxu0 %v3493_v41  ;;  %v1503_v37 = vrot.slane %v4017_v38, 6  ;;  %v3031_v30 = vrot.slane %v4040_v7, 10  ;;  %v3507_v31 = vld [vmem:[#allocation3 + $0x134] ss:$8 sps:$4 sm:$0xff]   ;;  %v3562_v9 = vld [vmem:[#allocation3 + $0x260] ss:$8 sps:$4 sm:$0xff]  }
 0x152   :  { %v1502_v60 = vrot.slane %v4650_v49, 4  ;;  %v4245_v51 = vsel %vm4000_vm12, %v1279_v63, %v1282_v16  ;;  %v1284_v45 = vrot.slane %v1282_v16, 4  ;;  %v3032_v8 = vcombine.low %v4224_v62, %v4237_v53  ;;  %1149 = vmatprep.subr.bf16.mxu0 %v3498_v46  ;;  %v3499_v63 = vld [vmem:[#allocation3 + $0x110] ss:$8 sps:$4 sm:$0xff]   ;;  %v3504_v16 = vld [vmem:[#allocation3 + $0x124] ss:$8 sps:$4 sm:$0xff]   ;;  %3182 = vmatpush3.bf16.msra.mxu1 %v3573_v26 }
 0x153   :  { %v1510_v1 = vrot.slane %v4072_v17, 6  ;;  %v1513_v41 = vrot.slane %v4087_v11, 6  ;;  %v1516_v50 = vrot.slane %v4111_v61, 6  ;;  %v1505_v57 = vrot.slane %v1503_v37, 4  ;;  %v3574_v62 = vld [vmem:[#allocation5 + $0xd8] sm:$0xff]  }
 0x154   :  { %v4254_v27 = vsel %vm4000_vm12, %v1284_v45, %v1289_v2  ;;  %v4263_v38 = vsel %vm4204_vm15, %v1502_v60, %v1503_v37  ;;  %v1519_v7 = vrot.slane %v4125_v24, 6  ;;  %v4651_v52 = vpack.c.bf16 %v3949_v32, %v3942_v28  ;;  %v3505_v60 = vld [vmem:[#allocation3 + $0x130] ss:$8 sps:$4 sm:$0xff]   ;;  %v3513_v45 = vld [vmem:[#allocation3 + $0x154] ss:$8 sps:$4 sm:$0xff]   ;;  %3183 = vmatprep.subr.bf16.mxu1 %v3574_v62 }
 0x155   :  { %v3013_v29 = vcombine.low %v4245_v51, %v4254_v27  ;;  %v4271_v17 = vsel %vm4204_vm15, %v3031_v30, %v1510_v1  ;;  %v1512_v61 = vrot.slane %v1510_v1, 4  ;;  %v1515_v11 = vrot.slane %v1513_v41, 4  ;;  %v3511_v2 = vld [vmem:[#allocation3 + $0x150] ss:$8 sps:$4 sm:$0xff]   ;;  %v3522_v37 = vld [vmem:[#allocation3 + $0x184] ss:$8 sps:$4 sm:$0xff]  }
 0x156   :  { %968 = vmatmul.mubr.bf16.vlgmr.msra.gmra.mrb[4].mxu0 %v4651_v52  ;;  %v1518_v46 = vrot.slane %v1516_v50, 4  ;;  %v4276_v24 = vsel %vm4204_vm15, %v1505_v57, %v1506_v14  ;;  %v4280_v28 = vmul.f32 %v4045_v12, %v4023_v43  ;;  %v4284_v32 = vmul.f32 %v4038_v3, %v4009_v36  ;;  %v3502_v12 = vld [vmem:[#allocation3 + $0x120] ss:$8 sps:$4 sm:$0xff]   ;;  %v3525_v14 = vld [vmem:[#allocation3 + $0x194] ss:$8 sps:$4 sm:$0xff]  }
 0x157   :  { %1150 = vmatpush1.bf16.msra.mxu0 %v3496_v58  ;;  %977 = vmatprep.mubr.bf16.mxu0 %v4646_v18  ;;  %v3033_v54 = vcombine.low %v4263_v38, %v4276_v24  ;;  %v4290_v34 = vsel %vm4204_vm15, %v1512_v61, %v1513_v41  ;;  %v4294_v47 = vsel %vm4204_vm15, %v1515_v11, %v1516_v50  ;;  %v3517_v58 = vld [vmem:[#allocation3 + $0x170] ss:$8 sps:$4 sm:$0xff]   ;;  %v3526_v1 = vld [vmem:[#allocation3 + $0x1a0] ss:$8 sps:$4 sm:$0xff]   ;;  %v3531_v41 = vld [vmem:[#allocation3 + $0x1b4] ss:$8 sps:$4 sm:$0xff]  }
 0x158   :  { %1151 = vmatprep.subr.bf16.mxu0 %v3501_v59  ;;  %v4298_v43 = vsel %vm4204_vm15, %v1518_v46, %v1519_v7  ;;  %v3034_v36 = vcombine.low %v4271_v17, %v4290_v34  ;;  %v4652_v49 = vpack.c.bf16 %v3996_v23, %v3994_v22  ;;  %v3514_v22 = vld [vmem:[#allocation3 + $0x160] ss:$8 sps:$4 sm:$0xff]   ;;  %v3519_v23 = vld [vmem:[#allocation3 + $0x174] ss:$8 sps:$4 sm:$0xff]   ;;  %v4653_v30 = vcombine.low %v3992_v21, %v4070_v10  ;;  %v3523_v59 = vld [vmem:[#allocation3 + $0x190] ss:$8 sps:$4 sm:$0xff]  }
 0x159   :  { %v3035_v3 = vcombine.low %v4294_v47, %v4298_v43  ;;  %v4654_v50 = vcombine.low %v4096_v40, %v4119_v55  ;;  %v3529_v57 = vld [vmem:[#allocation3 + $0x1b0] ss:$8 sps:$4 sm:$0xff]   ;;  %v3534_v21 = vld [vmem:[#allocation3 + $0x1c4] ss:$8 sps:$4 sm:$0xff]   ;;  %v3532_v10 = vld [vmem:[#allocation3 + $0x1c0] ss:$8 sps:$4 sm:$0xff]   ;;  %v4655_v26 = vcombine.low %v4139_v25, %v4148_v0  ;;  %v4656_v11 = vcombine.low %v4161_v48, %v4179_v19 }
 0x15a   :  { %v3537_v7 = vld [vmem:[#allocation3 + $0x1d4] ss:$8 sps:$4 sm:$0xff]   ;;  %v3535_v52 = vld [vmem:[#allocation3 + $0x1d0] ss:$8 sps:$4 sm:$0xff]   ;;  %v3540_v40 = vld [vmem:[#allocation3 + $0x1e4] ss:$8 sps:$4 sm:$0xff]  }
 0x15b   :  { %1152 = vmatpush1.bf16.msra.mxu0 %v3499_v63  ;;  %v3538_v55 = vld [vmem:[#allocation3 + $0x1e0] ss:$8 sps:$4 sm:$0xff]   ;;  %v3543_v61 = vld [vmem:[#allocation3 + $0x1f4] ss:$8 sps:$4 sm:$0xff]   ;;  %v3541_v46 = vld [vmem:[#allocation3 + $0x1f0] ss:$8 sps:$4 sm:$0xff]  }
 0x15c   :  { %1153 = vmatprep.subr.bf16.mxu0 %v3504_v16  ;;  %v3546_v25 = vld [vmem:[#allocation3 + $0x204] ss:$8 sps:$4 sm:$0xff]   ;;  %v3544_v0 = vld [vmem:[#allocation3 + $0x200] ss:$8 sps:$4 sm:$0xff]   ;;  %v3549_v63 = vld [vmem:[#allocation3 + $0x214] ss:$8 sps:$4 sm:$0xff]  }
 0x15d   :  { %v3547_v16 = vld [vmem:[#allocation3 + $0x210] ss:$8 sps:$4 sm:$0xff]   ;;  %v3550_v48 = vld [vmem:[#allocation3 + $0x220] ss:$8 sps:$4 sm:$0xff]   ;;  %v3555_v19 = vld [vmem:[#allocation3 + $0x234] ss:$8 sps:$4 sm:$0xff]  }
 0x15e   :  { %978 = vmatmul.mubr.bf16.gmra.mrb[8].mxu0 %v4652_v49  ;;  %v3556_v49 = vld [vmem:[#allocation3 + $0x240] ss:$8 sps:$4 sm:$0xff]   ;;  %v3575_v53 = vld [vmem:[#allocation5 + $0x98] sm:$0xff]   ;;  %v3581_v38 = vld [vmem:[#allocation5 + $0xb0] sm:$0xff]  }
 0x15f   :  { %1154 = vmatpush1.bf16.msra.mxu0 %v3502_v12  ;;  %987 = vmatprep.mubr.bf16.mxu0 %v4646_v18  ;;  %v3552_v12 = vld [vmem:[#allocation3 + $0x224] ss:$8 sps:$4 sm:$0xff]   ;;  %v3583_v17 = vld [vmem:[#allocation5 + $0xb8] sm:$0xff]  }
 0x160   :  { %1155 = vmatprep.subr.bf16.mxu0 %v3507_v31  ;;  %v3553_v31 = vld [vmem:[#allocation3 + $0x230] ss:$8 sps:$4 sm:$0xff]   ;;  %3184 = vmatpush3.bf16.msra.mxu1 %v3575_v53  ;;  %v3577_v51 = vld [vmem:[#allocation5 + $0xa0] sm:$0xff]   ;;  %v3579_v27 = vld [vmem:[#allocation5 + $0xa8] sm:$0xff]  }
 0x161   :  { %v3584_v24 = vld [vmem:[#allocation5 + $0x40] sm:$0xff]  }
 0x162   :  { %v554_v34 = vld [vmem:[%s4608_s9] sm:$0x3] }
 0x163   :  { %1156 = vmatpush1.bf16.msra.mxu0 %v3505_v60  ;;  %v3561_v60 = vld [vmem:[#allocation3 + $0x254] ss:$8 sps:$4 sm:$0xff]  }
 0x164   :  { %1157 = vmatprep.subr.bf16.mxu0 %v3510_v33  ;;  %v3559_v33 = vld [vmem:[#allocation3 + $0x250] ss:$8 sps:$4 sm:$0xff]  }
 0x166   :  { %988 = vmatmul.mubr.bf16.gmra.mrb[12].mxu0 %v4115_v20  ;;  %v3520_v20 = vld [vmem:[#allocation3 + $0x180] ss:$8 sps:$4 sm:$0xff]  }
 0x167   :  { %1158 = vmatpush1.bf16.msra.mxu0 %v3508_v4  ;;  %997 = vmatprep.mubr.bf16.mxu0 %v4646_v18  ;;  %v3564_v4 = vld [vmem:[#allocation3 + $0x264] ss:$8 sps:$4 sm:$0xff]  }
 0x168   :  { %1159 = vmatprep.subr.bf16.mxu0 %v3513_v45 }
 0x16b   :  { %1160 = vmatpush1.bf16.msra.mxu0 %v3511_v2 }
 0x16c   :  { %1161 = vmatprep.subr.bf16.mxu0 %v3516_v56 }
 0x16e   :  { %998 = vmatmul.mubr.bf16.gmra.mrb[16].mxu0 %v4143_v39  ;;  %v3528_v39 = vld [vmem:[#allocation3 + $0x1a4] ss:$8 sps:$4 sm:$0xff]  }
 0x16f   :  { %1162 = vmatpush1.bf16.msra.mxu0 %v3514_v22  ;;  %1181 = vmatprep.mubr.bf16.mxu0 %v4646_v18 }
 0x170   :  { %1163 = vmatprep.subr.bf16.mxu0 %v3519_v23 }
 0x173   :  { %1164 = vmatpush1.bf16.msra.mxu0 %v3517_v58 }
 0x174   :  { %1403 = vmatprep.subr.bf16.mxu0 %v3522_v37 }
 0x176   :  { %1182 = vmatmul.mubr.bf16.vlgmr.msra.gmra.mrb[4].mxu0 %v4653_v30 }
 0x177   :  { %1404 = vmatpush1.bf16.msra.mxu0 %v3520_v20  ;;  %1191 = vmatprep.mubr.bf16.mxu0 %v4646_v18 }
 0x178   :  { %1405 = vmatprep.subr.bf16.mxu0 %v3525_v14 }
 0x17b   :  { %1406 = vmatpush1.bf16.msra.mxu0 %v3523_v59 }
 0x17c   :  { %1407 = vmatprep.subr.bf16.mxu0 %v3528_v39 }
 0x17e   :  { %1192 = vmatmul.mubr.bf16.gmra.mrb[8].mxu0 %v4654_v50 }
 0x17f   :  { %1408 = vmatpush1.bf16.msra.mxu0 %v3526_v1  ;;  %1201 = vmatprep.mubr.bf16.mxu0 %v4646_v18 }
 0x180   :  { %1409 = vmatprep.subr.bf16.mxu0 %v3531_v41 }
 0x183   :  { %1410 = vmatpush1.bf16.msra.mxu0 %v3529_v57 }
 0x184   :  { %1411 = vmatprep.subr.bf16.mxu0 %v3534_v21 }
 0x186   :  { %1202 = vmatmul.mubr.bf16.gmra.mrb[12].mxu0 %v4655_v26 }
 0x187   :  { %1412 = vmatpush1.bf16.msra.mxu0 %v3532_v10  ;;  %1211 = vmatprep.mubr.bf16.mxu0 %v4646_v18 }
 0x188   :  { %1413 = vmatprep.subr.bf16.mxu0 %v3537_v7 }
 0x18b   :  { %1414 = vmatpush1.bf16.msra.mxu0 %v3535_v52 }
 0x18c   :  { %1415 = vmatprep.subr.bf16.mxu0 %v3540_v40 }
 0x18e   :  { %1212 = vmatmul.mubr.bf16.gmra.mrb[16].mxu0 %v4656_v11 }
 0x18f   :  { %1416 = vmatpush1.bf16.msra.mxu0 %v3538_v55  ;;  %1435 = vmatprep.mubr.bf16.mxu0 %v4646_v18 }
 0x190   :  { %1417 = vmatprep.subr.bf16.mxu0 %v3543_v61 }
 0x193   :  { %1418 = vmatpush1.bf16.msra.mxu0 %v3541_v46 }
 0x194   :  { %1633 = vmatprep.subr.bf16.mxu0 %v3546_v25 }
 0x196   :  { %1436 = vmatmul.mubr.bf16.vlgmr.msra.gmra.mrb[4].mxu0 %v4168_v35  ;;  %v3558_v35 = vld [vmem:[#allocation3 + $0x244] ss:$8 sps:$4 sm:$0xff]  }
 0x197   :  { %1634 = vmatpush1.bf16.msra.mxu0 %v3544_v0  ;;  %1445 = vmatprep.mubr.bf16.mxu0 %v4646_v18 }
 0x198   :  { %1635 = vmatprep.subr.bf16.mxu0 %v3549_v63 }
 0x19b   :  { %1636 = vmatpush1.bf16.msra.mxu0 %v3547_v16 }
 0x19c   :  { %1637 = vmatprep.subr.bf16.mxu0 %v3552_v12 }
 0x19e   :  { %1446 = vmatmul.mubr.bf16.gmra.mrb[8].mxu0 %v3011_v15  ;;  %v3565_v15 = vld [vmem:[#allocation3 + $0x270] ss:$8 sps:$4 sm:$0xff]  }
 0x19f   :  { %1638 = vmatpush1.bf16.msra.mxu0 %v3550_v48  ;;  %1455 = vmatprep.mubr.bf16.mxu0 %v4646_v18 }
 0x1a0   :  { %1639 = vmatprep.subr.bf16.mxu0 %v3555_v19 }
 0x1a3   :  { %1640 = vmatpush1.bf16.msra.mxu0 %v3553_v31 }
 0x1a4   :  { %1641 = vmatprep.subr.bf16.mxu0 %v3558_v35 }
 0x1a6   :  { %1456 = vmatmul.mubr.bf16.gmra.mrb[12].mxu0 %v4241_v6  ;;  %v3576_v6 = vld [vmem:[#allocation5 + $0xe0] sm:$0xff]  }
 0x1a7   :  { %1642 = vmatpush1.bf16.msra.mxu0 %v3556_v49  ;;  %1465 = vmatprep.mubr.bf16.mxu0 %v4646_v18 }
 0x1a8   :  { %1643 = vmatprep.subr.bf16.mxu0 %v3561_v60  ;;  %3185 = vmatprep.subr.bf16.mxu1 %v3576_v6 }
 0x1a9   :  { %3186 = vmatpush3.bf16.msra.mxu1 %v3577_v51 }
 0x1ab   :  { %1644 = vmatpush1.bf16.msra.mxu0 %v3559_v33 }
 0x1ac   :  { %1645 = vmatprep.subr.bf16.mxu0 %v3564_v4 }
 0x1ae   :  { %1466 = vmatmul.mubr.bf16.gmra.mrb[16].mxu0 %v3013_v29  ;;  %v3580_v29 = vld [vmem:[#allocation5 + $0xf0] sm:$0xff]  }
 0x1af   :  { %1646 = vmatpush1.bf16.msra.mxu0 %v3562_v9  ;;  %1665 = vmatprep.mubr.bf16.mxu0 %v4646_v18 }
 0x1b0   :  { %1647 = vmatprep.subr.bf16.mxu0 %v3567_v13 }
 0x1b3   :  { %1648 = vmatpush1.bf16.msra.mxu0 %v3565_v15 }
 0x1b6   :  { %1666 = vmatmul.mubr.bf16.vlgmr.msra.gmra.mrb[4].mxu0 %v3032_v8  ;;  %v3578_v8 = vld [vmem:[#allocation5 + $0xe8] sm:$0xff]  }
 0x1b7   :  { %1675 = vmatprep.mubr.bf16.mxu0 %v4646_v18  ;;  %3187 = vmatprep.subr.bf16.mxu1 %v3578_v8 }
 0x1b8   :  { %3188 = vmatpush3.bf16.msra.mxu1 %v3579_v27 }
 0x1b9   :  { %3189 = vmatprep.subr.bf16.mxu1 %v3580_v29 }
 0x1bc   :  { %3190 = vmatpush3.bf16.msra.mxu1 %v3581_v38 }
 0x1be   :  { %1676 = vmatmul.mubr.bf16.gmra.mrb[8].mxu0 %v3033_v54  ;;  %v553_v54 = vld [vmem:[%s4607_s8] sm:$0x3] }
 0x1bf   :  { %1685 = vmatprep.mubr.bf16.mxu0 %v4646_v18  ;;  %v4362_v47 = vrot.slane %v553_v54, %v3915_v42  ;;  %v4365_v43 = vrot.slane %v553_v54, %v3921_v44 }
 0x1c6   :  { %1686 = vmatmul.mubr.bf16.gmra.mrb[12].mxu0 %v3034_v36  ;;  %v4368_v36 = vrot.slane %v554_v34, %v3915_v42 }
 0x1c7   :  { %1695 = vmatprep.mubr.bf16.mxu0 %v4646_v18  ;;  %v3582_v18 = vld [vmem:[#allocation5 + $0xf8] sm:$0xff]  }
 0x1c8   :  { %3191 = vmatprep.subr.bf16.mxu1 %v3582_v18 }
 0x1c9   :  { %3192 = vmatpush3.bf16.msra.mxu1 %v3583_v17 }
 0x1ca   :  { %3211 = vmatprep.subr.bf16.mxu1 %v3584_v24 }
 0x1ce   :  { %1696 = vmatmul.mubr.bf16.gmra.mrb[16].mxu0 %v3035_v3  ;;  %v4371_v3 = vrot.slane %v554_v34, %v3921_v44  ;;  %v3596_v34 = vld [vmem:[#allocation5 + $0x70] sm:$0xff]  }
 0x289   :  { %v1667_v45 = vpop.f32.mrb[4].mxu0 }
 0x28a   :  { %v1733_v2 = vmul.f32 %v4362_v47, %v1667_v45  ;;  %v1669_v56 = vpop.f32.mrb[5].mxu0 }
 0x28b   :  { %v1734_v22 = vmul.f32 %v4365_v43, %v1669_v56  ;;  %v1671_v23 = vpop.f32.mrb[6].mxu0 }
 0x28c   :  { %v1760_v58 = vadd.f32 %v4368_v36, %v1733_v2  ;;  %v1735_v37 = vmul.f32 %v4362_v47, %v1671_v23  ;;  %v1673_v20 = vpop.f32.mrb[7].mxu0 }
 0x28d   :  { %v1761_v14 = vadd.f32 %v4371_v3, %v1734_v22  ;;  %v1736_v42 = vmul.f32 %v4365_v43, %v1673_v20 }
 0x28e   :  { %v1776_v30 = vmax.f32 %v1760_v58, 0.0  ;;  %v1762_v44 = vadd.f32 %v4368_v36, %v1735_v37 }
 0x28f   :  { %v1777_v59 = vmax.f32 %v1761_v14, 0.0  ;;  %v1763_v39 = vadd.f32 %v4371_v3, %v1736_v42 }
 0x290   :  { %v1778_v1 = vmax.f32 %v1762_v44, 0.0 }
 0x291   :  { %v3161_v41 = vpack.c.bf16 %v1777_v59, %v1776_v30  ;;  %v1779_v50 = vmax.f32 %v1763_v39, 0.0  ;;  %v1677_v57 = vpop.f32.mrb[8].mxu0 }
 0x292   :  { %v4381_v21 = vpack.c.bf16 %v1778_v1, %v1776_v30  ;;  %v1737_v10 = vmul.f32 %v4362_v47, %v1677_v57  ;;  %v1679_v7 = vpop.f32.mrb[9].mxu0 }
 0x293   :  { %v1867_v26 = vshrl.u32 %v3161_v41, 16  ;;  %v1870_v52 = vshll.u32 %v3161_v41, 16  ;;  %v3162_v40 = vpack.c.bf16 %v1779_v50, %v1778_v1  ;;  %v1738_v55 = vmul.f32 %v4365_v43, %v1679_v7  ;;  %v1681_v61 = vpop.f32.mrb[10].mxu0 }
 0x294   :  { %v1764_v11 = vadd.f32 %v4368_v36, %v1737_v10  ;;  %v1739_v46 = vmul.f32 %v4362_v47, %v1681_v61  ;;  %v1683_v25 = vpop.f32.mrb[11].mxu0  ;;  %v4387_v0 = vpack.c.bf16 %v1779_v50, %v1777_v59  ;;  %v3100_v63 = vrot.slane %v3161_v41, 9 }
 0x295   :  { %v1869_v16 = vrot.slane %v1867_v26, 4  ;;  %v1872_v12 = vrot.slane %v1870_v52, 5  ;;  %v1876_v48 = vshll.u32 %v3162_v40, 16  ;;  %v1880_v19 = vshrl.u32 %v3162_v40, 16 }
 0x296   :  { %v1780_v31 = vmax.f32 %v1764_v11, 0.0  ;;  %v4390_v35 = vadd.f32 %v4371_v3, %v1738_v55  ;;  %v1766_v49 = vadd.f32 %v4368_v36, %v1739_v46  ;;  %v1740_v60 = vmul.f32 %v4365_v43, %v1683_v25 }
 0x297   :  { %v1882_v33 = vrot.slane %v1880_v19, 4  ;;  %v1873_v4 = vor.u32 %v1872_v12, %v1869_v16  ;;  %v1878_v9 = vrot.slane %v1876_v48, 5  ;;  %v2310_v13 = vrot.slane %v3162_v40, 5  ;;  %v3585_v48 = vld [vmem:[#allocation5] sm:$0xff]  }
 0x298   :  { %v1781_v15 = vmax.f32 %v4390_v35, 0.0  ;;  %v1782_v62 = vmax.f32 %v1766_v49, 0.0  ;;  %v1767_v53 = vadd.f32 %v4371_v3, %v1740_v60 }
 0x299   :  { %v1687_v6 = vpop.f32.mrb[12].mxu0  ;;  %v1874_v51 = vrot.slane %v1873_v4, 4  ;;  %v4398_v8 = vsel %vm3971_vm10, %v3100_v63, %v2310_v13  ;;  %v1883_v17 = vor.u32 %v1882_v33, %v1878_v9  ;;  %v2312_v39 = vrot.slane %v2310_v13, 4 }
 0x29a   :  { %v3163_v27 = vpack.c.bf16 %v1781_v15, %v1780_v31  ;;  %v1783_v29 = vmax.f32 %v1767_v53, 0.0  ;;  %v1741_v38 = vmul.f32 %v4362_v47, %v1687_v6  ;;  %v1689_v18 = vpop.f32.mrb[13].mxu0 }
 0x29b   :  { %v1742_v24 = vmul.f32 %v4365_v43, %v1689_v18  ;;  %v1691_v54 = vpop.f32.mrb[14].mxu0  ;;  %v1879_v45 = vsel %vm3986_vm11, %v1874_v51, %v1878_v9  ;;  %v1884_v59 = vrot.slane %v1883_v17, 4  ;;  %v3586_v9 = vld [vmem:[#allocation5 + $0x48] sm:$0xff]  }
 0x29c   :  { %v1886_v2 = vshll.u32 %v3163_v27, 16  ;;  %v1890_v56 = vshrl.u32 %v3163_v27, 16  ;;  %v4406_v22 = vpack.c.bf16 %v1783_v29, %v1782_v62  ;;  %v1768_v23 = vadd.f32 %v4368_v36, %v1741_v38  ;;  %v1693_v58 = vpop.f32.mrb[15].mxu0 }
 0x29d   :  { %v1769_v37 = vadd.f32 %v4371_v3, %v1742_v24  ;;  %v1743_v20 = vmul.f32 %v4362_v47, %v1691_v54  ;;  %v1744_v14 = vmul.f32 %v4365_v43, %v1693_v58  ;;  %v2313_v42 = vrot.slane %v3163_v27, 5 }
 0x29e   :  { %v1892_v30 = vrot.slane %v1890_v56, 4  ;;  %v1784_v44 = vmax.f32 %v1768_v23, 0.0  ;;  %v1888_v57 = vrot.slane %v1886_v2, 5  ;;  %v1896_v10 = vshll.u32 %v4406_v22, 16  ;;  %v3587_v2 = vld [vmem:[#allocation5 + $0x8] sm:$0xff]   ;;  %v3588_v23 = vld [vmem:[#allocation5 + $0x50] sm:$0xff]  }
 0x29f   :  { %v1785_v1 = vmax.f32 %v1769_v37, 0.0  ;;  %v1770_v41 = vadd.f32 %v4368_v36, %v1743_v20  ;;  %v1771_v50 = vadd.f32 %v4371_v3, %v1744_v14  ;;  %v2316_v7 = vrot.slane %v4406_v22, 5 }
 0x2a0   :  { %v4416_v26 = vpack.c.bf16 %v1784_v44, %v1780_v31  ;;  %v4420_v52 = vsel %vm3971_vm10, %v2312_v39, %v2313_v42  ;;  %v1889_v46 = vsel %vm3986_vm11, %v1884_v59, %v1888_v57  ;;  %v1893_v19 = vor.u32 %v1892_v30, %v1888_v57  ;;  %v3589_v39 = vld [vmem:[#allocation5 + $0x10] sm:$0xff]  }
 0x2a1   :  { %v4422_v40 = vpack.c.bf16 %v1785_v1, %v1784_v44  ;;  %v1786_v55 = vmax.f32 %v1770_v41, 0.0  ;;  %v1787_v61 = vmax.f32 %v1771_v50, 0.0  ;;  %v1697_v11 = vpop.f32.mrb[16].mxu0  ;;  %v3060_v16 = vcombine.low %v1879_v45, %v1889_v46 }
 0x2a2   :  { %v1745_v25 = vmul.f32 %v4362_v47, %v1697_v11  ;;  %v1699_v63 = vpop.f32.mrb[17].mxu0  ;;  %v3061_v12 = vcombine.high %v1879_v45, %v1889_v46  ;;  %v1898_v27 = vrot.slane %v1896_v10, 5  ;;  %v1894_v38 = vrot.slane %v1893_v19, 4  ;;  %v3590_v11 = vld [vmem:[#allocation5 + $0x58] sm:$0xff]  }
 0x2a3   :  { %v1901_v31 = vshrl.u32 %v4422_v40, 16  ;;  %v1904_v49 = vshll.u32 %v4422_v40, 16  ;;  %v4429_v60 = vpack.c.bf16 %v1786_v55, %v1784_v44  ;;  %v4431_v33 = vpack.c.bf16 %v1787_v61, %v1785_v1  ;;  %v1701_v4 = vpop.f32.mrb[18].mxu0 }
 0x2a4   :  { %v4433_v13 = vpack.c.bf16 %v1787_v61, %v1786_v55  ;;  %v1772_v62 = vadd.f32 %v4368_v36, %v1745_v25  ;;  %v1746_v53 = vmul.f32 %v4365_v43, %v1699_v63  ;;  %2118 = vmatprep.mubr.bf16.mxu1 %v3061_v12  ;;  %v1747_v6 = vmul.f32 %v4362_v47, %v1701_v4  ;;  %v1703_v51 = vpop.f32.mrb[19].mxu0 }
 0x2a5   :  { %2119 = vmatmul.mubr.bf16.vlgmr.msra.gmra.mrb[28].mxu1 %v3060_v16  ;;  %v1748_v29 = vmul.f32 %v4365_v43, %v1703_v51  ;;  %v2315_v18 = vrot.slane %v2313_v42, 4  ;;  %v1899_v43 = vsel %vm3986_vm11, %v1894_v38, %v1898_v27  ;;  %v1903_v58 = vrot.slane %v1901_v31, 4 }
 0x2a6   :  { %v1910_v17 = vshll.u32 %v4433_v13, 16  ;;  %v1914_v24 = vshrl.u32 %v4433_v13, 16  ;;  %v1788_v54 = vmax.f32 %v1772_v62, 0.0  ;;  %v1773_v45 = vadd.f32 %v4371_v3, %v1746_v53  ;;  %3212 = vmatpush3.bf16.msra.mxu1 %v3585_v48  ;;  %v3592_v53 = vld [vmem:[#allocation5 + $0x60] sm:$0xff]  }
 0x2a7   :  { %v1774_v56 = vadd.f32 %v4368_v36, %v1747_v6  ;;  %v1775_v47 = vadd.f32 %v4371_v3, %v1748_v29  ;;  %3213 = vmatprep.subr.bf16.mxu1 %v3586_v9  ;;  %v1906_v14 = vrot.slane %v1904_v49, 5  ;;  %v4448_v59 = vpack.c.bf16 %v1785_v1, %v1781_v15  ;;  %v3591_v9 = vld [vmem:[#allocation5 + $0x18] sm:$0xff]  }
 0x2a8   :  { %v1916_v37 = vrot.slane %v1914_v24, 4  ;;  %v1789_v20 = vmax.f32 %v1773_v45, 0.0  ;;  %v1912_v42 = vrot.slane %v1910_v17, 5  ;;  %v3102_v36 = vcombine.low %v4398_v8, %v4420_v52 }
 0x2a9   :  { %v1790_v30 = vmax.f32 %v1774_v56, 0.0  ;;  %v1791_v44 = vmax.f32 %v1775_v47, 0.0  ;;  %v1907_v41 = vor.u32 %v1906_v14, %v1903_v58  ;;  %v3103_v57 = vcombine.high %v4398_v8, %v4420_v52  ;;  %v3594_v47 = vld [vmem:[#allocation5 + $0x68] sm:$0xff]  }
 0x2aa   :  { %v3167_v3 = vpack.c.bf16 %v1789_v20, %v1788_v54  ;;  %3214 = vmatpush3.bf16.msra.mxu1 %v3587_v2  ;;  %v1917_v50 = vor.u32 %v1916_v37, %v1912_v42  ;;  %v4458_v35 = vsel %vm3971_vm10, %v2315_v18, %v2316_v7  ;;  %v1818_v15 = vunpack.c.h.b16 %v4429_v60  ;;  %v3617_v8 = vld [vmem:[%s4613_s14 + $0x8] sm:$0xff]   ;;  %v3618_v52 = vld [vmem:[%s4613_s14 + $0x10] sm:$0xff]  }
 0x2ab   :  { %v1798_v10 = vpack.c.bf16 %v1790_v30, %v1788_v54  ;;  %v1799_v55 = vpack.c.bf16 %v1791_v44, %v1789_v20  ;;  %v3168_v61 = vpack.c.bf16 %v1791_v44, %v1790_v30  ;;  %3215 = vmatprep.subr.bf16.mxu1 %v3588_v23  ;;  %v1908_v25 = vrot.slane %v1907_v41, 4  ;;  %v3597_v30 = vld [vmem:[#allocation5 + $0x30] sm:$0xff]   ;;  %v3598_v44 = vld [vmem:[#allocation5 + $0x78] sm:$0xff]   ;;  %v3602_v41 = vld [vmem:[#allocation5 + $0x148] sm:$0xff]  }
 0x2ac   :  { %v1920_v1 = vshll.u32 %v3167_v3, 16  ;;  %v1924_v46 = vshrl.u32 %v3167_v3, 16  ;;  %v1819_v63 = vunpack.c.h.b16 %v4431_v33  ;;  %v1918_v48 = vrot.slane %v1917_v50, 4  ;;  %v3603_v50 = vld [vmem:[#allocation5 + $0x108] sm:$0xff]  }
 0x2ad   :  { %v1820_v16 = vunpack.c.l.b16 %v1798_v10  ;;  %v1821_v12 = vunpack.c.l.b16 %v1799_v55  ;;  %v1930_v31 = vshll.u32 %v3168_v61, 16  ;;  %v1913_v22 = vsel %vm3986_vm11, %v1908_v25, %v1912_v42  ;;  %v3595_v42 = vld [vmem:[#allocation5 + $0x28] sm:$0xff]   ;;  %v3604_v10 = vld [vmem:[#allocation5 + $0x150] sm:$0xff]   ;;  %v3606_v55 = vld [vmem:[#allocation5 + $0x158] sm:$0xff]  }
 0x2ae   :  { %v1926_v19 = vrot.slane %v1924_v46, 4  ;;  %3216 = vmatpush3.bf16.msra.mxu1 %v3589_v39  ;;  %v1922_v49 = vrot.slane %v1920_v1, 5  ;;  %v3063_v4 = vcombine.high %v1899_v43, %v1913_v22  ;;  %v3062_v7 = vcombine.low %v1899_v43, %v1913_v22  ;;  %v3601_v39 = vld [vmem:[#allocation5 + $0x100] sm:$0xff]   ;;  %v3612_v1 = vld [vmem:[#allocation5 + $0x170] sm:$0xff]   ;;  %v3614_v46 = vld [vmem:[#allocation5 + $0x178] sm:$0xff]  }
 0x2af   :  { %3217 = vmatprep.subr.bf16.mxu1 %v3590_v11  ;;  %v2148_v60 = vpack.c.b16 %v1821_v12, %v1819_v63  ;;  %v3101_v62 = vrot.slane %v4422_v40, 9  ;;  %v2147_v51 = vpack.c.b16 %v1820_v16, %v1818_v15  ;;  %v2320_v27 = vrot.slane %v4433_v13, 5  ;;  %v3593_v40 = vld [vmem:[#allocation5 + $0x20] sm:$0xff]   ;;  %v3615_v25 = vld [vmem:[#allocation5 + $0x138] sm:$0xff]  }
 0x2b0   :  { %v1923_v33 = vsel %vm3986_vm11, %v1918_v48, %v1922_v49  ;;  %v1927_v6 = vor.u32 %v1926_v19, %v1922_v49  ;;  %v2326_v29 = vrot.slane %v3168_v61, 5  ;;  %2126 = vmatprep.mubr.bf16.mxu1 %v3063_v4  ;;  %v2323_v38 = vrot.slane %v3167_v3, 5  ;;  %v3599_v3 = vld [vmem:[#allocation5 + $0x38] sm:$0xff]   ;;  %v3608_v11 = vld [vmem:[#allocation5 + $0x160] sm:$0xff]   ;;  %v3622_v49 = vld [vmem:[%s4613_s14 + $0x30] sm:$0xff]  }
 0x2b1   :  { %v1932_v18 = vrot.slane %v1930_v31, 5  ;;  %2127 = vmatmul.mubr.bf16.gmra.mrb[32].mxu1 %v3062_v7  ;;  %v4470_v24 = vsel %vm3971_vm10, %v3101_v62, %v2320_v27  ;;  %v2322_v54 = vrot.slane %v2320_v27, 4  ;;  %v3607_v61 = vld [vmem:[#allocation5 + $0x118] sm:$0xff]   ;;  %v3609_v15 = vld [vmem:[#allocation5 + $0x120] sm:$0xff]   ;;  %v4658_v63 = vmov 0.0  }
 0x2b2   :  { %v1928_v17 = vrot.slane %v1927_v6, 4  ;;  %3218 = vmatpush3.bf16.msra.mxu1 %v3591_v9  ;;  %v3105_v45 = vcombine.high %v4458_v35, %v4470_v24  ;;  %v3104_v2 = vcombine.low %v4458_v35, %v4470_v24  ;;  %v2325_v13 = vrot.slane %v2323_v38, 4  ;;  %v3620_v35 = vld [vmem:[%s4613_s14 + $0x20] sm:$0xff]   ;;  %v3621_v16 = vld [vmem:[%s4613_s14 + $0x28] sm:$0xff]   ;;  %v3623_v7 = vld [vmem:[%s4613_s14 + $0x38] sm:$0xff]  }
 0x2b3   :  { %3219 = vmatprep.subr.bf16.mxu1 %v3592_v53  ;;  %v4480_v23 = vsel %vm3971_vm10, %v2322_v54, %v2323_v38  ;;  %v3624_v9 = vld [vmem:[%s4612_s13 + $0x40] sm:$0xff]  }
 0x2b4   :  { %v1933_v56 = vsel %vm3986_vm11, %v1928_v17, %v1932_v18  ;;  %v2327_v37 = vsel %vm3971_vm10, %v2325_v13, %v2326_v29 }
 0x2b5   :  { %v3065_v43 = vcombine.high %v1923_v33, %v1933_v56  ;;  %v3064_v58 = vcombine.low %v1923_v33, %v1933_v56  ;;  %v3107_v20 = vcombine.high %v4480_v23, %v2327_v37  ;;  %v3106_v14 = vcombine.low %v4480_v23, %v2327_v37 }
 0x2b6   :  { %3220 = vmatpush3.bf16.msra.mxu1 %v3593_v40 }
 0x2b7   :  { %2134 = vmatprep.mubr.bf16.mxu1 %v3065_v43  ;;  %3221 = vmatprep.subr.bf16.mxu1 %v3594_v47 }
 0x2b9   :  { %2135 = vmatmul.mubr.bf16.gmra.mrb[36].mxu1 %v3064_v58 }
 0x2ba   :  { %3222 = vmatpush3.bf16.msra.mxu1 %v3595_v42  ;;  %2283 = vmatprep.mubr.bf16.mxu1 %v4387_v0  ;;  %v3605_v0 = vld [vmem:[#allocation5 + $0x110] sm:$0xff]  }
 0x2bb   :  { %3223 = vmatprep.subr.bf16.mxu1 %v3596_v34 }
 0x2be   :  { %3224 = vmatpush3.bf16.msra.mxu1 %v3597_v30 }
 0x2bf   :  { %3225 = vmatprep.subr.bf16.mxu1 %v3598_v44 }
 0x2c2   :  { %3226 = vmatpush3.bf16.msra.mxu1 %v3599_v3 }
 0x2c3   :  { %3245 = vmatprep.subr.bf16.mxu1 %v3600_v5 }
 0x2c5   :  { %2284 = vmatmul.mubr.bf16.vlgmr.msra.gmra.mrb[40].mxu1 %v4381_v21  ;;  %v3610_v21 = vld [vmem:[#allocation5 + $0x168] sm:$0xff]  }
 0x2c6   :  { %2291 = vmatprep.mubr.bf16.mxu1 %v4448_v59  ;;  %3246 = vmatpush3.bf16.msra.mxu1 %v3601_v39  ;;  %v3611_v59 = vld [vmem:[#allocation5 + $0x128] sm:$0xff]  }
 0x2c7   :  { %3247 = vmatprep.subr.bf16.mxu1 %v3602_v41 }
 0x2ca   :  { %3248 = vmatpush3.bf16.msra.mxu1 %v3603_v50 }
 0x2cb   :  { %3249 = vmatprep.subr.bf16.mxu1 %v3604_v10 }
 0x2cd   :  { %2292 = vmatmul.mubr.bf16.gmra.mrb[44].mxu1 %v4416_v26  ;;  %v3613_v26 = vld [vmem:[#allocation5 + $0x130] sm:$0xff]  }
 0x2ce   :  { %2299 = vmatprep.mubr.bf16.mxu1 %v2148_v60  ;;  %3250 = vmatpush3.bf16.msra.mxu1 %v3605_v0 }
 0x2cf   :  { %3251 = vmatprep.subr.bf16.mxu1 %v3606_v55 }
 0x2d2   :  { %3252 = vmatpush3.bf16.msra.mxu1 %v3607_v61 }
 0x2d3   :  { %3253 = vmatprep.subr.bf16.mxu1 %v3608_v11 }
 0x2d5   :  { %2300 = vmatmul.mubr.bf16.gmra.mrb[48].mxu1 %v2147_v51 }
 0x2d6   :  { %3254 = vmatpush3.bf16.msra.mxu1 %v3609_v15  ;;  %2512 = vmatprep.mubr.bf16.mxu1 %v3103_v57  ;;  %v3616_v57 = vld [vmem:[%s4613_s14] sm:$0xff]  }
 0x2d7   :  { %3255 = vmatprep.subr.bf16.mxu1 %v3610_v21  ;;  %v3124_v21 = vld [vmem:[%s4610_s11] ss:$0 sm:$0xff] }
 0x2da   :  { %3256 = vmatpush3.bf16.msra.mxu1 %v3611_v59 }
 0x2db   :  { %3257 = vmatprep.subr.bf16.mxu1 %v3612_v1 }
 0x2de   :  { %3258 = vmatpush3.bf16.msra.mxu1 %v3613_v26 }
 0x2df   :  { %3259 = vmatprep.subr.bf16.mxu1 %v3614_v46  ;;  %v3125_v46 = vld [vmem:[%s4611_s12] ss:$0 sm:$0xff] }
 0x2e2   :  { %3260 = vmatpush3.bf16.msra.mxu1 %v3615_v25 }
 0x2e3   :  { %3332 = vmatprep.subr.bf16.mxu1 %v4658_v63 }
 0x2e5   :  { %2513 = vmatmul.mubr.bf16.vlgmr.msra.gmra.mrb[52].mxu1 %v3102_v36  ;;  %v3619_v36 = vld [vmem:[%s4613_s14 + $0x18] sm:$0xff]  }
 0x2e6   :  { %2520 = vmatprep.mubr.bf16.mxu1 %v3105_v45  ;;  %3333 = vmatpush3.bf16.msra.mxu1 %v3616_v57 }
 0x2e7   :  { %3334 = vmatprep.subr.bf16.mxu1 %v4658_v63 }
 0x2ea   :  { %3335 = vmatpush3.bf16.msra.mxu1 %v3617_v8 }
 0x2eb   :  { %3336 = vmatprep.subr.bf16.mxu1 %v4658_v63 }
 0x2ed   :  { %2521 = vmatmul.mubr.bf16.gmra.mrb[56].mxu1 %v3104_v2 }
 0x2ee   :  { %2528 = vmatprep.mubr.bf16.mxu1 %v3107_v20  ;;  %3337 = vmatpush3.bf16.msra.mxu1 %v3618_v52 }
 0x2ef   :  { %3338 = vmatprep.subr.bf16.mxu1 %v4658_v63 }
 0x2f2   :  { %3339 = vmatpush3.bf16.msra.mxu1 %v3619_v36 }
 0x2f3   :  { %3340 = vmatprep.subr.bf16.mxu1 %v4658_v63 }
 0x2f5   :  { %2529 = vmatmul.mubr.bf16.gmra.mrb[60].mxu1 %v3106_v14 }
 0x2f6   :  { %3348 = vmatprep.mubr.msk.bf16.mxu1 %vm3724_vm2, %v4658_v63  ;;  %3341 = vmatpush3.bf16.msra.mxu1 %v3620_v35  ;;  %vm2903_vm2 = vcmask 1024  }
 0x2f7   :  { %3342 = vmatprep.subr.bf16.mxu1 %v4658_v63 }
 0x2fa   :  { %3343 = vmatpush3.bf16.msra.mxu1 %v3621_v16  ;;  %v4659_v16 = vld [vmem:[#allocation9_spill] sm:$0xff] }
 0x2fb   :  { %3344 = vmatprep.subr.bf16.mxu1 %v4658_v63 }
 0x2fe   :  { %3345 = vmatpush3.bf16.msra.mxu1 %v3622_v49 }
 0x2ff   :  { %3346 = vmatprep.subr.bf16.mxu1 %v4658_v63 }
 0x302   :  { %3347 = vmatpush3.bf16.msra.mxu1 %v3623_v7 }
 0x303   :  { %3288 = vmatprep.subr.bf16.mxu1 %v3624_v9 }
 0x378   :  { %v3193_v12 = vpop.f32.mrb[28].mxu1 }
 0x379   :  { %v3194_v48 = vpop.f32.mrb[29].mxu1 }
 0x37a   :  { %v3195_v19 = vadd.f32 %v3194_v48, %v3193_v12  ;;  %v3196_v31 = vpop.f32.mrb[30].mxu1  ;;  %v2576_v12 = vadd.s32 16, %v4659_v16  ;;  %v349_v16 = vpack.c.bf16 %v4280_v28, %v4280_v28  ;;  %v3630_v28 = vld [vmem:[%s4612_s13 + $0x58] sm:$0xff]  }
 0x37b   :  { %v3197_v22 = vpop.f32.mrb[31].mxu1 }
 0x37c   :  { %v3198_v4 = vadd.f32 %v3197_v22, %v3196_v31  ;;  %vm2579_vm0 = vcmp.lt.s32.totalorder %v2576_v12, 19  ;;  %v3627_v12 = vld [vmem:[%s4612_s13 + $0x8] sm:$0xff]  }
 0x384   :  { %v3199_v60 = vpop.f32.mrb[32].mxu1 }
 0x385   :  { %v3200_v62 = vpop.f32.mrb[33].mxu1 }
 0x386   :  { %v3201_v53 = vadd.f32 %v3200_v62, %v3199_v60  ;;  %v3202_v33 = vpop.f32.mrb[34].mxu1 }
 0x387   :  { %v3203_v6 = vpop.f32.mrb[35].mxu1 }
 0x388   :  { %v3204_v51 = vadd.f32 %v3203_v6, %v3202_v33 }
 0x38c   :  { %v3205_v27 = vpop.f32.mrb[36].mxu1 }
 0x38d   :  { %v3206_v29 = vpop.f32.mrb[37].mxu1 }
 0x38e   :  { %v3207_v38 = vadd.f32 %v3206_v29, %v3205_v27  ;;  %v3208_v18 = vpop.f32.mrb[38].mxu1 }
 0x38f   :  { %v3209_v17 = vpop.f32.mrb[39].mxu1 }
 0x390   :  { %v3210_v24 = vadd.f32 %v3209_v17, %v3208_v18 }
 0x398   :  { %v3227_v54 = vpop.f32.mrb[40].mxu1 }
 0x399   :  { %v3228_v40 = vpop.f32.mrb[41].mxu1 }
 0x39a   :  { %v3229_v45 = vadd.f32 %v3228_v40, %v3227_v54  ;;  %v3230_v2 = vpop.f32.mrb[42].mxu1 }
 0x39b   :  { %v3231_v13 = vpop.f32.mrb[43].mxu1 }
 0x39c   :  { %v2286_v56 = vadd.f32 %v3229_v45, %v3195_v19  ;;  %v3232_v47 = vadd.f32 %v3231_v13, %v3230_v2 }
 0x39e   :  { %v2289_v23 = vadd.f32 %v3232_v47, %v3198_v4 }
 0x3a0   :  { %v3233_v43 = vpop.f32.mrb[44].mxu1 }
 0x3a1   :  { %v3234_v58 = vpop.f32.mrb[45].mxu1 }
 0x3a2   :  { %v3235_v37 = vadd.f32 %v3234_v58, %v3233_v43  ;;  %v3236_v20 = vpop.f32.mrb[46].mxu1 }
 0x3a3   :  { %v3237_v14 = vpop.f32.mrb[47].mxu1 }
 0x3a4   :  { %v2294_v42 = vadd.f32 %v3235_v37, %v3201_v53  ;;  %v3238_v34 = vadd.f32 %v3237_v14, %v3236_v20 }
 0x3a6   :  { %v2297_v30 = vadd.f32 %v3238_v34, %v3204_v51 }
 0x3a8   :  { %v3239_v44 = vpop.f32.mrb[48].mxu1 }
 0x3a9   :  { %v3240_v3 = vpop.f32.mrb[49].mxu1 }
 0x3aa   :  { %v3241_v5 = vadd.f32 %v3240_v3, %v3239_v44  ;;  %v3242_v39 = vpop.f32.mrb[50].mxu1 }
 0x3ab   :  { %v3243_v41 = vpop.f32.mrb[51].mxu1 }
 0x3ac   :  { %v2302_v50 = vadd.f32 %v3241_v5, %v3207_v38  ;;  %v3244_v10 = vadd.f32 %v3243_v41, %v3242_v39  ;;  %v2582_v38 = vsel %vm2579_vm0, 0.05263158, %v4658_v63 }
 0x3ae   :  { %v2305_v0 = vadd.f32 %v3244_v10, %v3210_v24 }
 0x3b8   :  { %v3261_v55 = vpop.f32.mrb[52].mxu1 }
 0x3b9   :  { %v3262_v61 = vpop.f32.mrb[53].mxu1 }
 0x3ba   :  { %v3263_v11 = vadd.f32 %v3262_v61, %v3261_v55  ;;  %v3264_v15 = vpop.f32.mrb[54].mxu1 }
 0x3bb   :  { %v3265_v59 = vpop.f32.mrb[55].mxu1 }
 0x3bc   :  { %v2537_v1 = vadd.f32 %v3263_v11, %v2286_v56  ;;  %v3266_v26 = vadd.f32 %v3265_v59, %v3264_v15 }
 0x3be   :  { %v2549_v25 = vmul.f32 %v3124_v21, %v2537_v1  ;;  %v2538_v57 = vadd.f32 %v3266_v26, %v2289_v23 }
 0x3c0   :  { %v2561_v8 = vadd.f32 %v3125_v46, %v2549_v25  ;;  %v2550_v52 = vmul.f32 %v3124_v21, %v2538_v57  ;;  %v3267_v36 = vpop.f32.mrb[56].mxu1 }
 0x3c1   :  { %v3268_v35 = vpop.f32.mrb[57].mxu1 }
 0x3c2   :  { %v2567_v48 = vmax.f32 %v2561_v8, 0.0  ;;  %v2562_v19 = vadd.f32 %v3125_v46, %v2550_v52  ;;  %v3269_v31 = vadd.f32 %v3268_v35, %v3267_v36  ;;  %v3270_v22 = vpop.f32.mrb[58].mxu1  ;;  %v3625_v52 = vld [vmem:[%s4612_s13] sm:$0xff]   ;;  %v3626_v35 = vld [vmem:[%s4612_s13 + $0x48] sm:$0xff]  }
 0x3c3   :  { %v3271_v49 = vpop.f32.mrb[59].mxu1 }
 0x3c4   :  { %v2568_v4 = vmax.f32 %v2562_v19, 0.0  ;;  %v2539_v7 = vadd.f32 %v3269_v31, %v2294_v42  ;;  %v3272_v9 = vadd.f32 %v3271_v49, %v3270_v22  ;;  %v2583_v60 = vmul.f32 0.05263158, %v2567_v48  ;;  %v3628_v48 = vld [vmem:[%s4612_s13 + $0x50] sm:$0xff]   ;;  %v3631_v31 = vld [vmem:[%s4612_s13 + $0x18] sm:$0xff]   ;;  %v3632_v22 = vld [vmem:[%s4612_s13 + $0x60] sm:$0xff]  }
 0x3c5   :  { %v3629_v19 = vld [vmem:[%s4612_s13 + $0x10] sm:$0xff]   ;;  %v3633_v49 = vld [vmem:[%s4612_s13 + $0x20] sm:$0xff]  }
 0x3c6   :  { %v2584_v62 = vmul.f32 0.05263158, %v2568_v4  ;;  %v2551_v53 = vmul.f32 %v3124_v21, %v2539_v7  ;;  %v2540_v33 = vadd.f32 %v3272_v9, %v2297_v30  ;;  %v3634_v4 = vld [vmem:[%s4612_s13 + $0x68] sm:$0xff]   ;;  %v3636_v9 = vld [vmem:[%s4612_s13 + $0x70] sm:$0xff]  }
 0x3c7   :  { %v3635_v7 = vld [vmem:[%s4612_s13 + $0x28] sm:$0xff]  }
 0x3c8   :  { %v2589_v6 = vadd.f32 %v2584_v62, %v2583_v60  ;;  %v2563_v51 = vadd.f32 %v3125_v46, %v2551_v53  ;;  %v2552_v27 = vmul.f32 %v3124_v21, %v2540_v33  ;;  %v3273_v29 = vpop.f32.mrb[60].mxu1  ;;  %v3637_v60 = vld [vmem:[%s4612_s13 + $0x30] sm:$0xff]   ;;  %v3638_v62 = vld [vmem:[%s4612_s13 + $0x78] sm:$0xff]   ;;  %v348_v33 = vpack.c.bf16 %v4284_v32, %v4284_v32 }
 0x3c9   :  { %v3274_v18 = vpop.f32.mrb[61].mxu1  ;;  %v3639_v53 = vld [vmem:[%s4612_s13 + $0x38] sm:$0xff]  }
 0x3ca   :  { %v2569_v17 = vmax.f32 %v2563_v51, 0.0  ;;  %v3275_v24 = vadd.f32 %v3274_v18, %v3273_v29  ;;  %v3276_v54 = vpop.f32.mrb[62].mxu1  ;;  %v2564_v2 = vadd.f32 %v3125_v46, %v2552_v27 }
 0x3cb   :  { %v3277_v40 = vpop.f32.mrb[63].mxu1 }
 0x3cc   :  { %v2585_v45 = vmul.f32 %v2582_v38, %v2569_v17  ;;  %v2541_v13 = vadd.f32 %v3275_v24, %v2302_v50  ;;  %v3278_v56 = vadd.f32 %v3277_v40, %v3276_v54  ;;  %v2570_v37 = vmax.f32 %v2564_v2, 0.0  ;;  %v3150_v54 = vld [vmem:[#allocation2] ss:$0 sm:$0xff] }
 0x3ce   :  { %v2590_v47 = vadd.f32 %v2589_v6, %v2585_v45  ;;  %v2553_v23 = vmul.f32 %v3124_v21, %v2541_v13  ;;  %v2542_v43 = vadd.f32 %v3278_v56, %v2305_v0  ;;  %v2586_v44 = vmul.f32 0.05263158, %v2570_v37 }
 0x3d0   :  { %v2591_v58 = vrot.slane %v2590_v47, 4  ;;  %v2565_v20 = vadd.f32 %v3125_v46, %v2553_v23  ;;  %v2554_v14 = vmul.f32 %v3124_v21, %v2542_v43 }
 0x3d2   :  { %v2592_v42 = vadd.f32 %v2591_v58, %v2590_v47  ;;  %v2571_v34 = vmax.f32 %v2565_v20, 0.0  ;;  %v2566_v30 = vadd.f32 %v3125_v46, %v2554_v14 }
 0x3d4   :  { %v2593_v63 = vrot.slane %v2592_v42, 2  ;;  %v2587_v3 = vmul.f32 0.05263158, %v2571_v34  ;;  %v2572_v5 = vmax.f32 %v2566_v30, 0.0 }
 0x3d6   :  { %v2597_v39 = vadd.f32 %v2587_v3, %v2586_v44  ;;  %v2588_v41 = vmul.f32 %v2582_v38, %v2572_v5  ;;  %v2594_v10 = vadd.f32 %v2593_v63, %v2592_v42 }
 0x3d8   :  { %v2598_v55 = vadd.f32 %v2597_v39, %v2588_v41  ;;  %v2595_v61 = vrot.slane %v2594_v10, 1 }
 0x3da   :  { %v2599_v50 = vrot.slane %v2598_v55, 4  ;;  %v2596_v0 = vadd.f32 %v2595_v61, %v2594_v10 }
 0x3dc   :  { %v2600_v11 = vadd.f32 %v2599_v50, %v2598_v55  ;;  %v2605_v21 = vpack.c.bf16 %v2596_v0, %v2596_v0 }
 0x3de   :  { %v2601_v15 = vrot.slane %v2600_v11, 2  ;;  %v2657_v46 = vunpack.c.l.b16 %v2605_v21 }
 0x3e0   :  { %v2602_v59 = vadd.f32 %v2601_v15, %v2600_v11 }
 0x3e2   :  { %v2603_v1 = vrot.slane %v2602_v59, 1 }
 0x3e4   :  { %v2604_v26 = vadd.f32 %v2603_v1, %v2602_v59 }
 0x3e6   :  { %v2606_v25 = vpack.c.bf16 %v2604_v26, %v2604_v26 }
 0x3e8   :  { %v2658_v57 = vunpack.c.l.b16 %v2606_v25 }
 0x3ea   :  { %v2660_v8 = vsel %vm2659_vm1, %v2658_v57, %v2657_v46 }
 0x3eb   :  { %v2661_v36 = vpack.c.b16 %v2660_v8, %v2660_v8 }
 0x3ed   :  { %3349 = vmatmul.mubr.bf16.vlgmr.msra.gmra.mrb[64].mxu1 %v2661_v36 }
 0x3ee   :  { %3289 = vmatpush3.bf16.msra.mxu1 %v3625_v52  ;;  %2879 = vmatprep.mubr.bf16.mxu1 %v349_v16 }
 0x3ef   :  { %3290 = vmatprep.subr.bf16.mxu1 %v3626_v35 }
 0x3f2   :  { %3291 = vmatpush3.bf16.msra.mxu1 %v3627_v12 }
 0x3f3   :  { %3292 = vmatprep.subr.bf16.mxu1 %v3628_v48 }
 0x3f6   :  { %3293 = vmatpush3.bf16.msra.mxu1 %v3629_v19 }
 0x3f7   :  { %3294 = vmatprep.subr.bf16.mxu1 %v3630_v28 }
 0x3fa   :  { %3295 = vmatpush3.bf16.msra.mxu1 %v3631_v31 }
 0x3fb   :  { %3296 = vmatprep.subr.bf16.mxu1 %v3632_v22 }
 0x3fe   :  { %3297 = vmatpush3.bf16.msra.mxu1 %v3633_v49 }
 0x3ff   :  { %3298 = vmatprep.subr.bf16.mxu1 %v3634_v4 }
 0x402   :  { %3299 = vmatpush3.bf16.msra.mxu1 %v3635_v7 }
 0x403   :  { %3300 = vmatprep.subr.bf16.mxu1 %v3636_v9 }
 0x406   :  { %3301 = vmatpush3.bf16.msra.mxu1 %v3637_v60 }
 0x407   :  { %3302 = vmatprep.subr.bf16.mxu1 %v3638_v62 }
 0x40a   :  { %3303 = vmatpush3.bf16.msra.mxu1 %v3639_v53 }
 0x40d   :  { %2880 = vmatmul.mubr.bf16.vlgmr.msra.gmra.mrb[68].mxu1 %v348_v33 }
 0x4c0   :  { %v2745_v6 = vpop.f32.mrb[64].mxu1 }
 0x4c1   :  { %v3350_v51 = vpop.f32.mrb[65].mxu1 }
 0x4c2   :  { %v2748_v27 = vpop.f32.mrb[66].mxu1 }
 0x4c3   :  { %v3351_v29 = vpop.f32.mrb[67].mxu1 }
 0x4e0   :  { %v3304_v38 = vpop.f32.mrb[68].mxu1 }
 0x4e1   :  { %v3305_v18 = vpop.f32.mrb[69].mxu1 }
 0x4e2   :  { %v3306_v17 = vadd.f32 %v3305_v18, %v3304_v38  ;;  %v3307_v24 = vpop.f32.mrb[70].mxu1 }
 0x4e3   :  { %v3308_v40 = vpop.f32.mrb[71].mxu1 }
 0x4e4   :  { %v2882_v45 = vadd.f32 %v3306_v17, %v2745_v6 }
 0x4e6   :  { %v2894_v2 = vadd.f32 %v3150_v54, %v2882_v45 }
 0x4e8   :  { %v2895_v13 = vsub.f32 %v2894_v2, %v2894_v2 }
 0x4ea   :  { %v2896_v56 = vmul.f32 1.442695, %v2895_v13 }
 0x4ec   :  { %3664 = vpow2.f32 %v2896_v56 }
 0x4f6   :  { %v3665_v47 = vpop.eup %3664 }
 0x4f7   :  { %3666 = vlog2.f32 %v3665_v47 }
 0x501   :  { %v3667_v23 = vpop.eup %3666 }
 0x502   :  { %v2900_v32 = vmul.f32 0.6931472, %v3667_v23 }
 0x504   :  { %v2901_v43 = vadd.f32 %v2900_v32, %v2894_v2 }
 0x506   :  { %v2902_v58 = vsub.f32 %v2894_v2, %v2901_v43 }
 0x508   :  { %2904 = vst.msk [vmem:[%s4615_s16] sm:$0x3] %vm2903_vm2, %v2902_v58 }
 0x509   :  { %2909 = vsyncpa [#allocation4], 1 }
 0x50a   :  { %2910 = vsyncpa [#allocation6], 1 }

</bundles_post_ra>
